<compile_context>
chip_gen: v5e
topology: v5e:2x2
jax: 0.10.0
libtpu: 0.0.40
codegen_flags: <defaults>
</compile_context>

<pallas_src>
import functools

import jax
import jax.numpy as jnp
from jax.experimental import pallas as pl
from jax.experimental.pallas import tpu as pltpu


# --------------------------- fused forward kernel --------------------------- #
def fused_kernel(x_ref, w1_ref, b1_ref, w2_ref, b2_ref, w3_ref, b3_ref,
                 *rest, L, H, pred_len, num_layers, bt):
    lstm_refs = rest[:3 * num_layers]
    wp_ref = rest[3 * num_layers + 0]
    bp_ref = rest[3 * num_layers + 1]
    o_ref = rest[3 * num_layers + 2]

    M = L * bt  # rows are (time, sample)-major: row = t * bt + b

    # ---- Conv1d ('same') + ReLU as a single im2col matmul per layer -------- #
    def conv_relu(zb, w_ref, b_ref, k):
        # zb: (M, Cin) bf16 value.  w_ref: (k*Cin, Cout) bf16.  b_ref: (1, Cout) f32.
        p = (k - 1) // 2
        cin = zb.shape[-1]
        halo = jnp.zeros((p * bt, cin), jnp.bfloat16)
        padded = jnp.concatenate([halo, zb, halo], axis=0)      # ((L+k-1)*bt, Cin)
        # tap t of the im2col operand = rows [t*bt, t*bt + M) of the padded seq
        cols = jnp.concatenate(
            [padded[t * bt:t * bt + M, :] for t in range(k)], axis=-1)  # (M, k*Cin)
        acc = jnp.dot(cols, w_ref[...], preferred_element_type=jnp.float32)
        return jnp.maximum(acc + b_ref[...], 0.0)               # (M, Cout) f32

    z = x_ref[0].astype(jnp.bfloat16)                           # (M, in_ch), cast once
    z = conv_relu(z, w1_ref, b1_ref, 5).astype(jnp.bfloat16)    # (M, 64)
    z = conv_relu(z, w2_ref, b2_ref, 5).astype(jnp.bfloat16)    # (M, 128)
    z = conv_relu(z, w3_ref, b3_ref, 3).astype(jnp.bfloat16)    # (M, 128)

    # ---- LSTM stack: hoisted input projection + vreg-resident recurrence --- #
    def lstm_layer(seq_bf16, wih_ref, whh_ref, b_ref):
        # Time-invariant projection (x @ W_ih + (b_ih + b_hh)) as ONE matmul.
        gx = (jnp.dot(seq_bf16, wih_ref[...],
                      preferred_element_type=jnp.float32)
              + b_ref[...])                                     # (M, 4H) f32, vreg-resident
        whh = whh_ref[...]                                      # (H, 4H) bf16, hoisted
        h = jnp.zeros((bt, H), jnp.float32)
        c = jnp.zeros((bt, H), jnp.float32)
        hs = []
        for t in range(L):                                      # static full unroll (L small)
            gates = gx[t * bt:(t + 1) * bt, :] + jnp.dot(
                h.astype(jnp.bfloat16), whh, preferred_element_type=jnp.float32)
            sig = jax.nn.sigmoid(gates)                         # one full-width EUP pass
            tnh = jnp.tanh(gates)                               # one full-width EUP pass
            i_g = sig[:, 0 * H:1 * H]                           # PyTorch gate order i,f,g,o
            f_g = sig[:, 1 * H:2 * H]
            g_g = tnh[:, 2 * H:3 * H]
            o_g = sig[:, 3 * H:4 * H]
            c = f_g * c + i_g * g_g
            h = o_g * jnp.tanh(c)
            hs.append(h)                                        # (bt, H) f32 each
        return hs

    hs = lstm_layer(z, lstm_refs[0], lstm_refs[1], lstm_refs[2])
    for l in range(1, num_layers):
        seq = jnp.concatenate(hs, axis=0).astype(jnp.bfloat16)  # (M, H), (t, b)-major
        hs = lstm_layer(seq, lstm_refs[3 * l + 0], lstm_refs[3 * l + 1],
                        lstm_refs[3 * l + 2])

    # ---- prediction head: Conv1d(H -> in_ch, k=1) == per-step linear ------- #
    feat = jnp.concatenate(hs[L - pred_len:], axis=0).astype(jnp.bfloat16)  # (pred_len*bt, H)
    pred = jnp.dot(feat, wp_ref[...],
                   preferred_element_type=jnp.float32) + bp_ref[...]
    o_ref[0] = pred.astype(o_ref.dtype)                         # (pred_len*bt, in_ch)


# ------------------------------- wrapper ----------------------------------- #
def _cost_estimate(B, L, in_ch, H, num_layers, pred_len, inputs):
    flops = 0
    flops += 2 * L * 5 * in_ch * 64                     # conv1 (im2col matmul)
    flops += 2 * L * 5 * 64 * 128                       # conv2
    flops += 2 * L * 3 * 128 * 128                      # conv3
    for cin in [128] + [H] * (num_layers - 1):
        flops += 2 * L * cin * 4 * H                    # hoisted input projection
        flops += 2 * L * H * 4 * H                      # recurrent matmuls
    flops += 2 * pred_len * H * in_ch                   # pred head
    flops *= B
    transcendentals = B * num_layers * L * 9 * H        # sigmoid(4H)+tanh(4H)+tanh(H)
    bytes_accessed = sum(int(a.size) * a.dtype.itemsize for a in inputs)
    bytes_accessed += B * pred_len * in_ch * 4
    return pl.CostEstimate(flops=flops, transcendentals=transcendentals,
                           bytes_accessed=bytes_accessed)


def cnn_lstm_forward(x, params, *, pred_len, num_layers, num_blocks=None):
    # x: (B, in_ch, L) -- PyTorch NCL layout
    B, in_ch, L = x.shape
    H = params["lstm_whh_t_0"].shape[0]
    assert pred_len <= L

    if num_blocks is None:
        # One block = whole batch folded into matmul M (best on single-TC
        # v5e/v6e).  Two blocks shard sub-batches across the v7x megacore once
        # the batch is large enough to keep both TensorCores fed.
        num_blocks = 2 if (B % 2 == 0 and B >= 4) else 1
    if B % num_blocks != 0:
        num_blocks = 1
    bt = B // num_blocks

    # (B, C, L) -> (num_blocks, L*bt, C) with rows in (time, sample)-major order
    # (tiny wrapper-side layout plumbing; all compute stays in the kernel).
    xt = jnp.transpose(x, (2, 0, 1))                              # (L, B, C)
    xt = xt.reshape(L, num_blocks, bt, in_ch)
    xt = jnp.transpose(xt, (1, 0, 2, 3)).reshape(num_blocks, L * bt, in_ch)

    inputs = [xt,
              params["conv1_w"], params["conv1_b"],
              params["conv2_w"], params["conv2_b"],
              params["conv3_w"], params["conv3_b"]]
    for l in range(num_layers):
        inputs += [params[f"lstm_wih_t_{l}"],
                   params[f"lstm_whh_t_{l}"],
                   params[f"lstm_b_{l}"]]
    inputs += [params["pred_w"], params["pred_b"]]

    def full_spec(a):
        nd = a.ndim
        return pl.BlockSpec(a.shape, lambda i, _nd=nd: (0,) * _nd)

    in_specs = ([pl.BlockSpec((1, L * bt, in_ch), lambda i: (i, 0, 0))]
                + [full_spec(a) for a in inputs[1:]])
    out_specs = pl.BlockSpec((1, pred_len * bt, in_ch), lambda i: (i, 0, 0))

    kern = functools.partial(fused_kernel, L=L, H=H, pred_len=pred_len,
                             num_layers=num_layers, bt=bt)
    out = pl.pallas_call(
        kern,
        out_shape=jax.ShapeDtypeStruct((num_blocks, pred_len * bt, in_ch),
                                       jnp.float32),
        grid=(num_blocks,),
        in_specs=in_specs,
        out_specs=out_specs,
        compiler_params=pltpu.CompilerParams(
            dimension_semantics=("parallel",)),       # sub-batches -> v7x megacore
        cost_estimate=_cost_estimate(B, L, in_ch, H, num_layers, pred_len, inputs),
    )(*inputs)

    # (num_blocks, pred_len*bt, in_ch) [(t, b)-major rows] -> (B, in_ch, pred_len)
    out = out.reshape(num_blocks, pred_len, bt, in_ch)
    out = jnp.transpose(out, (0, 2, 3, 1)).reshape(B, in_ch, pred_len)
    return out


# ------------------------------ parameters --------------------------------- #
def init_params(key, *, in_ch, hidden, num_layers):
    ks = jax.random.split(key, 8 + 4 * num_layers)
    s = 0.1
    wdt = jnp.bfloat16      # MXU operand dtype (f32 accumulation inside kernel)
    p = {}
    # Conv weights stored im2col-ready: (k, Cin, Cout) -> (k*Cin, Cout).
    p["conv1_w"] = (s * jax.random.normal(ks[0], (5, in_ch, 64), jnp.float32)
                    ).reshape(5 * in_ch, 64).astype(wdt)
    p["conv1_b"] = s * jax.random.normal(ks[1], (1, 64), jnp.float32)
    p["conv2_w"] = (s * jax.random.normal(ks[2], (5, 64, 128), jnp.float32)
                    ).reshape(5 * 64, 128).astype(wdt)
    p["conv2_b"] = s * jax.random.normal(ks[3], (1, 128), jnp.float32)
    p["conv3_w"] = (s * jax.random.normal(ks[4], (3, 128, 128), jnp.float32)
                    ).reshape(3 * 128, 128).astype(wdt)
    p["conv3_b"] = s * jax.random.normal(ks[5], (1, 128), jnp.float32)
    idx = 6
    for l in range(num_layers):
        in_size = 128 if l == 0 else hidden
        # Stored pre-transposed (In, 4H) / (H, 4H); bias = b_ih + b_hh folded;
        # PyTorch gate order i, f, g, o.
        p[f"lstm_wih_t_{l}"] = (s * jax.random.normal(
            ks[idx], (in_size, 4 * hidden), jnp.float32)).astype(wdt)
        p[f"lstm_whh_t_{l}"] = (s * jax.random.normal(
            ks[idx + 1], (hidden, 4 * hidden), jnp.float32)).astype(wdt)
        p[f"lstm_b_{l}"] = (s * jax.random.normal(ks[idx + 2], (1, 4 * hidden), jnp.float32)
                            + s * jax.random.normal(ks[idx + 3], (1, 4 * hidden), jnp.float32))
        idx += 4
    p["pred_w"] = (s * jax.random.normal(ks[idx], (hidden, in_ch), jnp.float32)).astype(wdt)
    p["pred_b"] = s * jax.random.normal(ks[idx + 1], (1, in_ch), jnp.float32)
    return p


if __name__ == "__main__":
    B, in_ch, L = 2, 4, 16
    pred_len, hidden, num_layers = 8, 32, 3

    key = jax.random.PRNGKey(0)
    kx, kp = jax.random.split(key)
    x = jax.random.normal(kx, (B, in_ch, L), jnp.float32)   # PyTorch NCL input
    params = init_params(kp, in_ch=in_ch, hidden=hidden, num_layers=num_layers)

    fwd = jax.jit(functools.partial(cnn_lstm_forward,
                                    pred_len=pred_len, num_layers=num_layers))
    out = fwd(x, params)
    jax.block_until_ready(out)
    assert out.shape == (B, in_ch, pred_len), out.shape
    print("KERNEL_OK")
</pallas_src>

<mosaic_0001>
module attributes {stable_mosaic.version = 11 : i64} {
  func.func @fused_kernel(%arg0: i32, %arg1: memref<1x32x4xf32, #tpu.memory_space<vmem>>, %arg2: memref<20x64xbf16, #tpu.memory_space<vmem>>, %arg3: memref<1x64xf32, #tpu.memory_space<vmem>>, %arg4: memref<320x128xbf16, #tpu.memory_space<vmem>>, %arg5: memref<1x128xf32, #tpu.memory_space<vmem>>, %arg6: memref<384x128xbf16, #tpu.memory_space<vmem>>, %arg7: memref<1x128xf32, #tpu.memory_space<vmem>>, %arg8: memref<128x128xbf16, #tpu.memory_space<vmem>>, %arg9: memref<32x128xbf16, #tpu.memory_space<vmem>>, %arg10: memref<1x128xf32, #tpu.memory_space<vmem>>, %arg11: memref<32x128xbf16, #tpu.memory_space<vmem>>, %arg12: memref<32x128xbf16, #tpu.memory_space<vmem>>, %arg13: memref<1x128xf32, #tpu.memory_space<vmem>>, %arg14: memref<32x128xbf16, #tpu.memory_space<vmem>>, %arg15: memref<32x128xbf16, #tpu.memory_space<vmem>>, %arg16: memref<1x128xf32, #tpu.memory_space<vmem>>, %arg17: memref<32x4xbf16, #tpu.memory_space<vmem>>, %arg18: memref<1x4xf32, #tpu.memory_space<vmem>>, %arg19: memref<1x16x4xf32, #tpu.memory_space<vmem>>) attributes {dimension_semantics = [#tpu.dimension_semantics<parallel>], iteration_bounds = array<i64: 1>, scalar_prefetch = 0 : i64, scratch_operands = 0 : i64, tpu.core_type = #tpu.core_type<tc>, window_params = [{transform_indices = @transform_0, window_bounds = array<i64: 1, 32, 4>}, {pipeline_mode = #tpu.pipeline_mode<synchronous>, transform_indices = @transform_1, window_bounds = array<i64: 20, 64>}, {pipeline_mode = #tpu.pipeline_mode<synchronous>, transform_indices = @transform_2, window_bounds = array<i64: 1, 64>}, {pipeline_mode = #tpu.pipeline_mode<synchronous>, transform_indices = @transform_3, window_bounds = array<i64: 320, 128>}, {pipeline_mode = #tpu.pipeline_mode<synchronous>, transform_indices = @transform_4, window_bounds = array<i64: 1, 128>}, {pipeline_mode = #tpu.pipeline_mode<synchronous>, transform_indices = @transform_5, window_bounds = array<i64: 384, 128>}, {pipeline_mode = #tpu.pipeline_mode<synchronous>, transform_indices = @transform_6, window_bounds = array<i64: 1, 128>}, {pipeline_mode = #tpu.pipeline_mode<synchronous>, transform_indices = @transform_7, window_bounds = array<i64: 128, 128>}, {pipeline_mode = #tpu.pipeline_mode<synchronous>, transform_indices = @transform_8, window_bounds = array<i64: 32, 128>}, {pipeline_mode = #tpu.pipeline_mode<synchronous>, transform_indices = @transform_9, window_bounds = array<i64: 1, 128>}, {pipeline_mode = #tpu.pipeline_mode<synchronous>, transform_indices = @transform_10, window_bounds = array<i64: 32, 128>}, {pipeline_mode = #tpu.pipeline_mode<synchronous>, transform_indices = @transform_11, window_bounds = array<i64: 32, 128>}, {pipeline_mode = #tpu.pipeline_mode<synchronous>, transform_indices = @transform_12, window_bounds = array<i64: 1, 128>}, {pipeline_mode = #tpu.pipeline_mode<synchronous>, transform_indices = @transform_13, window_bounds = array<i64: 32, 128>}, {pipeline_mode = #tpu.pipeline_mode<synchronous>, transform_indices = @transform_14, window_bounds = array<i64: 32, 128>}, {pipeline_mode = #tpu.pipeline_mode<synchronous>, transform_indices = @transform_15, window_bounds = array<i64: 1, 128>}, {pipeline_mode = #tpu.pipeline_mode<synchronous>, transform_indices = @transform_16, window_bounds = array<i64: 32, 4>}, {pipeline_mode = #tpu.pipeline_mode<synchronous>, transform_indices = @transform_17, window_bounds = array<i64: 1, 4>}, {transform_indices = @transform_18, window_bounds = array<i64: 1, 16, 4>}]} {
    %c0 = arith.constant 0 : index
    %c0_0 = arith.constant 0 : index
    %c0_1 = arith.constant 0 : index
    %0 = vector.load %arg1[%c0, %c0_0, %c0_1] : memref<1x32x4xf32, #tpu.memory_space<vmem>>, vector<1x32x4xf32>
    %1 = vector.shape_cast %0 : vector<1x32x4xf32> to vector<32x4xf32>
    %2 = arith.truncf %1 : vector<32x4xf32> to vector<32x4xbf16>
    %cst = arith.constant 0.000000e+00 : bf16
    %3 = vector.broadcast %cst : bf16 to vector<4x4xbf16>
    %4 = tpu.concatenate %3, %2, %3 in 0 : vector<4x4xbf16>, vector<32x4xbf16>, vector<4x4xbf16> -> vector<40x4xbf16>
    %5 = vector.extract_strided_slice %4 {offsets = [0, 0], sizes = [32, 4], strides = [1, 1]} : vector<40x4xbf16> to vector<32x4xbf16>
    %6 = vector.extract_strided_slice %4 {offsets = [2, 0], sizes = [32, 4], strides = [1, 1]} : vector<40x4xbf16> to vector<32x4xbf16>
    %7 = vector.extract_strided_slice %4 {offsets = [4, 0], sizes = [32, 4], strides = [1, 1]} : vector<40x4xbf16> to vector<32x4xbf16>
    %8 = vector.extract_strided_slice %4 {offsets = [6, 0], sizes = [32, 4], strides = [1, 1]} : vector<40x4xbf16> to vector<32x4xbf16>
    %9 = vector.extract_strided_slice %4 {offsets = [8, 0], sizes = [32, 4], strides = [1, 1]} : vector<40x4xbf16> to vector<32x4xbf16>
    %10 = tpu.concatenate %5, %6, %7, %8, %9 in 1 : vector<32x4xbf16>, vector<32x4xbf16>, vector<32x4xbf16>, vector<32x4xbf16>, vector<32x4xbf16> -> vector<32x20xbf16>
    %c0_2 = arith.constant 0 : index
    %c0_3 = arith.constant 0 : index
    %11 = vector.load %arg2[%c0_2, %c0_3] : memref<20x64xbf16, #tpu.memory_space<vmem>>, vector<20x64xbf16>
    %cst_4 = arith.constant dense<0.000000e+00> : vector<32x64xf32>
    %12 = tpu.matmul %10, %11, %cst_4 {dimension_numbers = #tpu.dot_dimension_numbers<[1], [0], [0], [1], [0, 0, 1, 1], [], []>} : vector<32x20xbf16>, vector<20x64xbf16>, vector<32x64xf32> -> vector<32x64xf32>
    %c0_5 = arith.constant 0 : index
    %c0_6 = arith.constant 0 : index
    %13 = vector.load %arg3[%c0_5, %c0_6] : memref<1x64xf32, #tpu.memory_space<vmem>>, vector<1x64xf32>
    %14 = vector.broadcast %13 : vector<1x64xf32> to vector<32x64xf32>
    %15 = arith.addf %12, %14 : vector<32x64xf32>
    %cst_7 = arith.constant 0.000000e+00 : f32
    %16 = vector.broadcast %cst_7 : f32 to vector<32x64xf32>
    %17 = arith.maximumf %15, %16 : vector<32x64xf32>
    %18 = arith.truncf %17 : vector<32x64xf32> to vector<32x64xbf16>
    %cst_8 = arith.constant 0.000000e+00 : bf16
    %19 = vector.broadcast %cst_8 : bf16 to vector<4x64xbf16>
    %20 = tpu.concatenate %19, %18, %19 in 0 : vector<4x64xbf16>, vector<32x64xbf16>, vector<4x64xbf16> -> vector<40x64xbf16>
    %21 = vector.extract_strided_slice %20 {offsets = [0, 0], sizes = [32, 64], strides = [1, 1]} : vector<40x64xbf16> to vector<32x64xbf16>
    %22 = vector.extract_strided_slice %20 {offsets = [2, 0], sizes = [32, 64], strides = [1, 1]} : vector<40x64xbf16> to vector<32x64xbf16>
    %23 = vector.extract_strided_slice %20 {offsets = [4, 0], sizes = [32, 64], strides = [1, 1]} : vector<40x64xbf16> to vector<32x64xbf16>
    %24 = vector.extract_strided_slice %20 {offsets = [6, 0], sizes = [32, 64], strides = [1, 1]} : vector<40x64xbf16> to vector<32x64xbf16>
    %25 = vector.extract_strided_slice %20 {offsets = [8, 0], sizes = [32, 64], strides = [1, 1]} : vector<40x64xbf16> to vector<32x64xbf16>
    %26 = tpu.concatenate %21, %22, %23, %24, %25 in 1 : vector<32x64xbf16>, vector<32x64xbf16>, vector<32x64xbf16>, vector<32x64xbf16>, vector<32x64xbf16> -> vector<32x320xbf16>
    %c0_9 = arith.constant 0 : index
    %c0_10 = arith.constant 0 : index
    %27 = vector.load %arg4[%c0_9, %c0_10] : memref<320x128xbf16, #tpu.memory_space<vmem>>, vector<320x128xbf16>
    %cst_11 = arith.constant dense<0.000000e+00> : vector<32x128xf32>
    %28 = tpu.matmul %26, %27, %cst_11 {dimension_numbers = #tpu.dot_dimension_numbers<[1], [0], [0], [1], [0, 0, 1, 1], [], []>} : vector<32x320xbf16>, vector<320x128xbf16>, vector<32x128xf32> -> vector<32x128xf32>
    %c0_12 = arith.constant 0 : index
    %c0_13 = arith.constant 0 : index
    %29 = vector.load %arg5[%c0_12, %c0_13] : memref<1x128xf32, #tpu.memory_space<vmem>>, vector<1x128xf32>
    %30 = vector.broadcast %29 : vector<1x128xf32> to vector<32x128xf32>
    %31 = arith.addf %28, %30 : vector<32x128xf32>
    %cst_14 = arith.constant 0.000000e+00 : f32
    %32 = vector.broadcast %cst_14 : f32 to vector<32x128xf32>
    %33 = arith.maximumf %31, %32 : vector<32x128xf32>
    %34 = arith.truncf %33 : vector<32x128xf32> to vector<32x128xbf16>
    %cst_15 = arith.constant 0.000000e+00 : bf16
    %35 = vector.broadcast %cst_15 : bf16 to vector<2x128xbf16>
    %36 = tpu.concatenate %35, %34, %35 in 0 : vector<2x128xbf16>, vector<32x128xbf16>, vector<2x128xbf16> -> vector<36x128xbf16>
    %37 = vector.extract_strided_slice %36 {offsets = [0, 0], sizes = [32, 128], strides = [1, 1]} : vector<36x128xbf16> to vector<32x128xbf16>
    %38 = vector.extract_strided_slice %36 {offsets = [2, 0], sizes = [32, 128], strides = [1, 1]} : vector<36x128xbf16> to vector<32x128xbf16>
    %39 = vector.extract_strided_slice %36 {offsets = [4, 0], sizes = [32, 128], strides = [1, 1]} : vector<36x128xbf16> to vector<32x128xbf16>
    %40 = tpu.concatenate %37, %38, %39 in 1 : vector<32x128xbf16>, vector<32x128xbf16>, vector<32x128xbf16> -> vector<32x384xbf16>
    %c0_16 = arith.constant 0 : index
    %c0_17 = arith.constant 0 : index
    %41 = vector.load %arg6[%c0_16, %c0_17] : memref<384x128xbf16, #tpu.memory_space<vmem>>, vector<384x128xbf16>
    %cst_18 = arith.constant dense<0.000000e+00> : vector<32x128xf32>
    %42 = tpu.matmul %40, %41, %cst_18 {dimension_numbers = #tpu.dot_dimension_numbers<[1], [0], [0], [1], [0, 0, 1, 1], [], []>} : vector<32x384xbf16>, vector<384x128xbf16>, vector<32x128xf32> -> vector<32x128xf32>
    %c0_19 = arith.constant 0 : index
    %c0_20 = arith.constant 0 : index
    %43 = vector.load %arg7[%c0_19, %c0_20] : memref<1x128xf32, #tpu.memory_space<vmem>>, vector<1x128xf32>
    %44 = vector.broadcast %43 : vector<1x128xf32> to vector<32x128xf32>
    %45 = arith.addf %42, %44 : vector<32x128xf32>
    %cst_21 = arith.constant 0.000000e+00 : f32
    %46 = vector.broadcast %cst_21 : f32 to vector<32x128xf32>
    %47 = arith.maximumf %45, %46 : vector<32x128xf32>
    %48 = arith.truncf %47 : vector<32x128xf32> to vector<32x128xbf16>
    %c0_22 = arith.constant 0 : index
    %c0_23 = arith.constant 0 : index
    %49 = vector.load %arg8[%c0_22, %c0_23] : memref<128x128xbf16, #tpu.memory_space<vmem>>, vector<128x128xbf16>
    %cst_24 = arith.constant dense<0.000000e+00> : vector<32x128xf32>
    %50 = tpu.matmul %48, %49, %cst_24 {dimension_numbers = #tpu.dot_dimension_numbers<[1], [0], [0], [1], [0, 0, 1, 1], [], []>} : vector<32x128xbf16>, vector<128x128xbf16>, vector<32x128xf32> -> vector<32x128xf32>
    %c0_25 = arith.constant 0 : index
    %c0_26 = arith.constant 0 : index
    %51 = vector.load %arg10[%c0_25, %c0_26] : memref<1x128xf32, #tpu.memory_space<vmem>>, vector<1x128xf32>
    %52 = vector.broadcast %51 : vector<1x128xf32> to vector<32x128xf32>
    %53 = arith.addf %50, %52 : vector<32x128xf32>
    %c0_27 = arith.constant 0 : index
    %c0_28 = arith.constant 0 : index
    %54 = vector.load %arg9[%c0_27, %c0_28] : memref<32x128xbf16, #tpu.memory_space<vmem>>, vector<32x128xbf16>
    %cst_29 = arith.constant 0.000000e+00 : f32
    %55 = vector.broadcast %cst_29 : f32 to vector<2x32xf32>
    %cst_30 = arith.constant 0.000000e+00 : f32
    %56 = vector.broadcast %cst_30 : f32 to vector<2x32xf32>
    %57 = vector.extract_strided_slice %53 {offsets = [0, 0], sizes = [2, 128], strides = [1, 1]} : vector<32x128xf32> to vector<2x128xf32>
    %58 = arith.truncf %55 : vector<2x32xf32> to vector<2x32xbf16>
    %cst_31 = arith.constant dense<0.000000e+00> : vector<2x128xf32>
    %59 = tpu.matmul %58, %54, %cst_31 {dimension_numbers = #tpu.dot_dimension_numbers<[1], [0], [0], [1], [0, 0, 1, 1], [], []>} : vector<2x32xbf16>, vector<32x128xbf16>, vector<2x128xf32> -> vector<2x128xf32>
    %60 = arith.addf %57, %59 : vector<2x128xf32>
    %61 = arith.negf %60 : vector<2x128xf32>
    %62 = math.exp %61 : vector<2x128xf32>
    %cst_32 = arith.constant 1.000000e+00 : f32
    %63 = vector.broadcast %cst_32 : f32 to vector<2x128xf32>
    %64 = arith.addf %63, %62 : vector<2x128xf32>
    %65 = arith.divf %63, %64 : vector<2x128xf32>
    %66 = math.tanh %60 : vector<2x128xf32>
    %67 = vector.extract_strided_slice %65 {offsets = [0, 0], sizes = [2, 32], strides = [1, 1]} : vector<2x128xf32> to vector<2x32xf32>
    %68 = vector.extract_strided_slice %65 {offsets = [0, 32], sizes = [2, 32], strides = [1, 1]} : vector<2x128xf32> to vector<2x32xf32>
    %69 = vector.extract_strided_slice %66 {offsets = [0, 64], sizes = [2, 32], strides = [1, 1]} : vector<2x128xf32> to vector<2x32xf32>
    %70 = vector.extract_strided_slice %65 {offsets = [0, 96], sizes = [2, 32], strides = [1, 1]} : vector<2x128xf32> to vector<2x32xf32>
    %71 = arith.mulf %68, %56 : vector<2x32xf32>
    %72 = arith.mulf %67, %69 : vector<2x32xf32>
    %73 = arith.addf %71, %72 : vector<2x32xf32>
    %74 = math.tanh %73 : vector<2x32xf32>
    %75 = arith.mulf %70, %74 : vector<2x32xf32>
    %76 = vector.extract_strided_slice %53 {offsets = [2, 0], sizes = [2, 128], strides = [1, 1]} : vector<32x128xf32> to vector<2x128xf32>
    %77 = arith.truncf %75 : vector<2x32xf32> to vector<2x32xbf16>
    %cst_33 = arith.constant dense<0.000000e+00> : vector<2x128xf32>
    %78 = tpu.matmul %77, %54, %cst_33 {dimension_numbers = #tpu.dot_dimension_numbers<[1], [0], [0], [1], [0, 0, 1, 1], [], []>} : vector<2x32xbf16>, vector<32x128xbf16>, vector<2x128xf32> -> vector<2x128xf32>
    %79 = arith.addf %76, %78 : vector<2x128xf32>
    %80 = arith.negf %79 : vector<2x128xf32>
    %81 = math.exp %80 : vector<2x128xf32>
    %cst_34 = arith.constant 1.000000e+00 : f32
    %82 = vector.broadcast %cst_34 : f32 to vector<2x128xf32>
    %83 = arith.addf %82, %81 : vector<2x128xf32>
    %84 = arith.divf %82, %83 : vector<2x128xf32>
    %85 = math.tanh %79 : vector<2x128xf32>
    %86 = vector.extract_strided_slice %84 {offsets = [0, 0], sizes = [2, 32], strides = [1, 1]} : vector<2x128xf32> to vector<2x32xf32>
    %87 = vector.extract_strided_slice %84 {offsets = [0, 32], sizes = [2, 32], strides = [1, 1]} : vector<2x128xf32> to vector<2x32xf32>
    %88 = vector.extract_strided_slice %85 {offsets = [0, 64], sizes = [2, 32], strides = [1, 1]} : vector<2x128xf32> to vector<2x32xf32>
    %89 = vector.extract_strided_slice %84 {offsets = [0, 96], sizes = [2, 32], strides = [1, 1]} : vector<2x128xf32> to vector<2x32xf32>
    %90 = arith.mulf %87, %73 : vector<2x32xf32>
    %91 = arith.mulf %86, %88 : vector<2x32xf32>
    %92 = arith.addf %90, %91 : vector<2x32xf32>
    %93 = math.tanh %92 : vector<2x32xf32>
    %94 = arith.mulf %89, %93 : vector<2x32xf32>
    %95 = vector.extract_strided_slice %53 {offsets = [4, 0], sizes = [2, 128], strides = [1, 1]} : vector<32x128xf32> to vector<2x128xf32>
    %96 = arith.truncf %94 : vector<2x32xf32> to vector<2x32xbf16>
    %cst_35 = arith.constant dense<0.000000e+00> : vector<2x128xf32>
    %97 = tpu.matmul %96, %54, %cst_35 {dimension_numbers = #tpu.dot_dimension_numbers<[1], [0], [0], [1], [0, 0, 1, 1], [], []>} : vector<2x32xbf16>, vector<32x128xbf16>, vector<2x128xf32> -> vector<2x128xf32>
    %98 = arith.addf %95, %97 : vector<2x128xf32>
    %99 = arith.negf %98 : vector<2x128xf32>
    %100 = math.exp %99 : vector<2x128xf32>
    %cst_36 = arith.constant 1.000000e+00 : f32
    %101 = vector.broadcast %cst_36 : f32 to vector<2x128xf32>
    %102 = arith.addf %101, %100 : vector<2x128xf32>
    %103 = arith.divf %101, %102 : vector<2x128xf32>
    %104 = math.tanh %98 : vector<2x128xf32>
    %105 = vector.extract_strided_slice %103 {offsets = [0, 0], sizes = [2, 32], strides = [1, 1]} : vector<2x128xf32> to vector<2x32xf32>
    %106 = vector.extract_strided_slice %103 {offsets = [0, 32], sizes = [2, 32], strides = [1, 1]} : vector<2x128xf32> to vector<2x32xf32>
    %107 = vector.extract_strided_slice %104 {offsets = [0, 64], sizes = [2, 32], strides = [1, 1]} : vector<2x128xf32> to vector<2x32xf32>
    %108 = vector.extract_strided_slice %103 {offsets = [0, 96], sizes = [2, 32], strides = [1, 1]} : vector<2x128xf32> to vector<2x32xf32>
    %109 = arith.mulf %106, %92 : vector<2x32xf32>
    %110 = arith.mulf %105, %107 : vector<2x32xf32>
    %111 = arith.addf %109, %110 : vector<2x32xf32>
    %112 = math.tanh %111 : vector<2x32xf32>
    %113 = arith.mulf %108, %112 : vector<2x32xf32>
    %114 = vector.extract_strided_slice %53 {offsets = [6, 0], sizes = [2, 128], strides = [1, 1]} : vector<32x128xf32> to vector<2x128xf32>
    %115 = arith.truncf %113 : vector<2x32xf32> to vector<2x32xbf16>
    %cst_37 = arith.constant dense<0.000000e+00> : vector<2x128xf32>
    %116 = tpu.matmul %115, %54, %cst_37 {dimension_numbers = #tpu.dot_dimension_numbers<[1], [0], [0], [1], [0, 0, 1, 1], [], []>} : vector<2x32xbf16>, vector<32x128xbf16>, vector<2x128xf32> -> vector<2x128xf32>
    %117 = arith.addf %114, %116 : vector<2x128xf32>
    %118 = arith.negf %117 : vector<2x128xf32>
    %119 = math.exp %118 : vector<2x128xf32>
    %cst_38 = arith.constant 1.000000e+00 : f32
    %120 = vector.broadcast %cst_38 : f32 to vector<2x128xf32>
    %121 = arith.addf %120, %119 : vector<2x128xf32>
    %122 = arith.divf %120, %121 : vector<2x128xf32>
    %123 = math.tanh %117 : vector<2x128xf32>
    %124 = vector.extract_strided_slice %122 {offsets = [0, 0], sizes = [2, 32], strides = [1, 1]} : vector<2x128xf32> to vector<2x32xf32>
    %125 = vector.extract_strided_slice %122 {offsets = [0, 32], sizes = [2, 32], strides = [1, 1]} : vector<2x128xf32> to vector<2x32xf32>
    %126 = vector.extract_strided_slice %123 {offsets = [0, 64], sizes = [2, 32], strides = [1, 1]} : vector<2x128xf32> to vector<2x32xf32>
    %127 = vector.extract_strided_slice %122 {offsets = [0, 96], sizes = [2, 32], strides = [1, 1]} : vector<2x128xf32> to vector<2x32xf32>
    %128 = arith.mulf %125, %111 : vector<2x32xf32>
    %129 = arith.mulf %124, %126 : vector<2x32xf32>
    %130 = arith.addf %128, %129 : vector<2x32xf32>
    %131 = math.tanh %130 : vector<2x32xf32>
    %132 = arith.mulf %127, %131 : vector<2x32xf32>
    %133 = vector.extract_strided_slice %53 {offsets = [8, 0], sizes = [2, 128], strides = [1, 1]} : vector<32x128xf32> to vector<2x128xf32>
    %134 = arith.truncf %132 : vector<2x32xf32> to vector<2x32xbf16>
    %cst_39 = arith.constant dense<0.000000e+00> : vector<2x128xf32>
    %135 = tpu.matmul %134, %54, %cst_39 {dimension_numbers = #tpu.dot_dimension_numbers<[1], [0], [0], [1], [0, 0, 1, 1], [], []>} : vector<2x32xbf16>, vector<32x128xbf16>, vector<2x128xf32> -> vector<2x128xf32>
    %136 = arith.addf %133, %135 : vector<2x128xf32>
    %137 = arith.negf %136 : vector<2x128xf32>
    %138 = math.exp %137 : vector<2x128xf32>
    %cst_40 = arith.constant 1.000000e+00 : f32
    %139 = vector.broadcast %cst_40 : f32 to vector<2x128xf32>
    %140 = arith.addf %139, %138 : vector<2x128xf32>
    %141 = arith.divf %139, %140 : vector<2x128xf32>
    %142 = math.tanh %136 : vector<2x128xf32>
    %143 = vector.extract_strided_slice %141 {offsets = [0, 0], sizes = [2, 32], strides = [1, 1]} : vector<2x128xf32> to vector<2x32xf32>
    %144 = vector.extract_strided_slice %141 {offsets = [0, 32], sizes = [2, 32], strides = [1, 1]} : vector<2x128xf32> to vector<2x32xf32>
    %145 = vector.extract_strided_slice %142 {offsets = [0, 64], sizes = [2, 32], strides = [1, 1]} : vector<2x128xf32> to vector<2x32xf32>
    %146 = vector.extract_strided_slice %141 {offsets = [0, 96], sizes = [2, 32], strides = [1, 1]} : vector<2x128xf32> to vector<2x32xf32>
    %147 = arith.mulf %144, %130 : vector<2x32xf32>
    %148 = arith.mulf %143, %145 : vector<2x32xf32>
    %149 = arith.addf %147, %148 : vector<2x32xf32>
    %150 = math.tanh %149 : vector<2x32xf32>
    %151 = arith.mulf %146, %150 : vector<2x32xf32>
    %152 = vector.extract_strided_slice %53 {offsets = [10, 0], sizes = [2, 128], strides = [1, 1]} : vector<32x128xf32> to vector<2x128xf32>
    %153 = arith.truncf %151 : vector<2x32xf32> to vector<2x32xbf16>
    %cst_41 = arith.constant dense<0.000000e+00> : vector<2x128xf32>
    %154 = tpu.matmul %153, %54, %cst_41 {dimension_numbers = #tpu.dot_dimension_numbers<[1], [0], [0], [1], [0, 0, 1, 1], [], []>} : vector<2x32xbf16>, vector<32x128xbf16>, vector<2x128xf32> -> vector<2x128xf32>
    %155 = arith.addf %152, %154 : vector<2x128xf32>
    %156 = arith.negf %155 : vector<2x128xf32>
    %157 = math.exp %156 : vector<2x128xf32>
    %cst_42 = arith.constant 1.000000e+00 : f32
    %158 = vector.broadcast %cst_42 : f32 to vector<2x128xf32>
    %159 = arith.addf %158, %157 : vector<2x128xf32>
    %160 = arith.divf %158, %159 : vector<2x128xf32>
    %161 = math.tanh %155 : vector<2x128xf32>
    %162 = vector.extract_strided_slice %160 {offsets = [0, 0], sizes = [2, 32], strides = [1, 1]} : vector<2x128xf32> to vector<2x32xf32>
    %163 = vector.extract_strided_slice %160 {offsets = [0, 32], sizes = [2, 32], strides = [1, 1]} : vector<2x128xf32> to vector<2x32xf32>
    %164 = vector.extract_strided_slice %161 {offsets = [0, 64], sizes = [2, 32], strides = [1, 1]} : vector<2x128xf32> to vector<2x32xf32>
    %165 = vector.extract_strided_slice %160 {offsets = [0, 96], sizes = [2, 32], strides = [1, 1]} : vector<2x128xf32> to vector<2x32xf32>
    %166 = arith.mulf %163, %149 : vector<2x32xf32>
    %167 = arith.mulf %162, %164 : vector<2x32xf32>
    %168 = arith.addf %166, %167 : vector<2x32xf32>
    %169 = math.tanh %168 : vector<2x32xf32>
    %170 = arith.mulf %165, %169 : vector<2x32xf32>
    %171 = vector.extract_strided_slice %53 {offsets = [12, 0], sizes = [2, 128], strides = [1, 1]} : vector<32x128xf32> to vector<2x128xf32>
    %172 = arith.truncf %170 : vector<2x32xf32> to vector<2x32xbf16>
    %cst_43 = arith.constant dense<0.000000e+00> : vector<2x128xf32>
    %173 = tpu.matmul %172, %54, %cst_43 {dimension_numbers = #tpu.dot_dimension_numbers<[1], [0], [0], [1], [0, 0, 1, 1], [], []>} : vector<2x32xbf16>, vector<32x128xbf16>, vector<2x128xf32> -> vector<2x128xf32>
    %174 = arith.addf %171, %173 : vector<2x128xf32>
    %175 = arith.negf %174 : vector<2x128xf32>
    %176 = math.exp %175 : vector<2x128xf32>
    %cst_44 = arith.constant 1.000000e+00 : f32
    %177 = vector.broadcast %cst_44 : f32 to vector<2x128xf32>
    %178 = arith.addf %177, %176 : vector<2x128xf32>
    %179 = arith.divf %177, %178 : vector<2x128xf32>
    %180 = math.tanh %174 : vector<2x128xf32>
    %181 = vector.extract_strided_slice %179 {offsets = [0, 0], sizes = [2, 32], strides = [1, 1]} : vector<2x128xf32> to vector<2x32xf32>
    %182 = vector.extract_strided_slice %179 {offsets = [0, 32], sizes = [2, 32], strides = [1, 1]} : vector<2x128xf32> to vector<2x32xf32>
    %183 = vector.extract_strided_slice %180 {offsets = [0, 64], sizes = [2, 32], strides = [1, 1]} : vector<2x128xf32> to vector<2x32xf32>
    %184 = vector.extract_strided_slice %179 {offsets = [0, 96], sizes = [2, 32], strides = [1, 1]} : vector<2x128xf32> to vector<2x32xf32>
    %185 = arith.mulf %182, %168 : vector<2x32xf32>
    %186 = arith.mulf %181, %183 : vector<2x32xf32>
    %187 = arith.addf %185, %186 : vector<2x32xf32>
    %188 = math.tanh %187 : vector<2x32xf32>
    %189 = arith.mulf %184, %188 : vector<2x32xf32>
    %190 = vector.extract_strided_slice %53 {offsets = [14, 0], sizes = [2, 128], strides = [1, 1]} : vector<32x128xf32> to vector<2x128xf32>
    %191 = arith.truncf %189 : vector<2x32xf32> to vector<2x32xbf16>
    %cst_45 = arith.constant dense<0.000000e+00> : vector<2x128xf32>
    %192 = tpu.matmul %191, %54, %cst_45 {dimension_numbers = #tpu.dot_dimension_numbers<[1], [0], [0], [1], [0, 0, 1, 1], [], []>} : vector<2x32xbf16>, vector<32x128xbf16>, vector<2x128xf32> -> vector<2x128xf32>
    %193 = arith.addf %190, %192 : vector<2x128xf32>
    %194 = arith.negf %193 : vector<2x128xf32>
    %195 = math.exp %194 : vector<2x128xf32>
    %cst_46 = arith.constant 1.000000e+00 : f32
    %196 = vector.broadcast %cst_46 : f32 to vector<2x128xf32>
    %197 = arith.addf %196, %195 : vector<2x128xf32>
    %198 = arith.divf %196, %197 : vector<2x128xf32>
    %199 = math.tanh %193 : vector<2x128xf32>
    %200 = vector.extract_strided_slice %198 {offsets = [0, 0], sizes = [2, 32], strides = [1, 1]} : vector<2x128xf32> to vector<2x32xf32>
    %201 = vector.extract_strided_slice %198 {offsets = [0, 32], sizes = [2, 32], strides = [1, 1]} : vector<2x128xf32> to vector<2x32xf32>
    %202 = vector.extract_strided_slice %199 {offsets = [0, 64], sizes = [2, 32], strides = [1, 1]} : vector<2x128xf32> to vector<2x32xf32>
    %203 = vector.extract_strided_slice %198 {offsets = [0, 96], sizes = [2, 32], strides = [1, 1]} : vector<2x128xf32> to vector<2x32xf32>
    %204 = arith.mulf %201, %187 : vector<2x32xf32>
    %205 = arith.mulf %200, %202 : vector<2x32xf32>
    %206 = arith.addf %204, %205 : vector<2x32xf32>
    %207 = math.tanh %206 : vector<2x32xf32>
    %208 = arith.mulf %203, %207 : vector<2x32xf32>
    %209 = vector.extract_strided_slice %53 {offsets = [16, 0], sizes = [2, 128], strides = [1, 1]} : vector<32x128xf32> to vector<2x128xf32>
    %210 = arith.truncf %208 : vector<2x32xf32> to vector<2x32xbf16>
    %cst_47 = arith.constant dense<0.000000e+00> : vector<2x128xf32>
    %211 = tpu.matmul %210, %54, %cst_47 {dimension_numbers = #tpu.dot_dimension_numbers<[1], [0], [0], [1], [0, 0, 1, 1], [], []>} : vector<2x32xbf16>, vector<32x128xbf16>, vector<2x128xf32> -> vector<2x128xf32>
    %212 = arith.addf %209, %211 : vector<2x128xf32>
    %213 = arith.negf %212 : vector<2x128xf32>
    %214 = math.exp %213 : vector<2x128xf32>
    %cst_48 = arith.constant 1.000000e+00 : f32
    %215 = vector.broadcast %cst_48 : f32 to vector<2x128xf32>
    %216 = arith.addf %215, %214 : vector<2x128xf32>
    %217 = arith.divf %215, %216 : vector<2x128xf32>
    %218 = math.tanh %212 : vector<2x128xf32>
    %219 = vector.extract_strided_slice %217 {offsets = [0, 0], sizes = [2, 32], strides = [1, 1]} : vector<2x128xf32> to vector<2x32xf32>
    %220 = vector.extract_strided_slice %217 {offsets = [0, 32], sizes = [2, 32], strides = [1, 1]} : vector<2x128xf32> to vector<2x32xf32>
    %221 = vector.extract_strided_slice %218 {offsets = [0, 64], sizes = [2, 32], strides = [1, 1]} : vector<2x128xf32> to vector<2x32xf32>
    %222 = vector.extract_strided_slice %217 {offsets = [0, 96], sizes = [2, 32], strides = [1, 1]} : vector<2x128xf32> to vector<2x32xf32>
    %223 = arith.mulf %220, %206 : vector<2x32xf32>
    %224 = arith.mulf %219, %221 : vector<2x32xf32>
    %225 = arith.addf %223, %224 : vector<2x32xf32>
    %226 = math.tanh %225 : vector<2x32xf32>
    %227 = arith.mulf %222, %226 : vector<2x32xf32>
    %228 = vector.extract_strided_slice %53 {offsets = [18, 0], sizes = [2, 128], strides = [1, 1]} : vector<32x128xf32> to vector<2x128xf32>
    %229 = arith.truncf %227 : vector<2x32xf32> to vector<2x32xbf16>
    %cst_49 = arith.constant dense<0.000000e+00> : vector<2x128xf32>
    %230 = tpu.matmul %229, %54, %cst_49 {dimension_numbers = #tpu.dot_dimension_numbers<[1], [0], [0], [1], [0, 0, 1, 1], [], []>} : vector<2x32xbf16>, vector<32x128xbf16>, vector<2x128xf32> -> vector<2x128xf32>
    %231 = arith.addf %228, %230 : vector<2x128xf32>
    %232 = arith.negf %231 : vector<2x128xf32>
    %233 = math.exp %232 : vector<2x128xf32>
    %cst_50 = arith.constant 1.000000e+00 : f32
    %234 = vector.broadcast %cst_50 : f32 to vector<2x128xf32>
    %235 = arith.addf %234, %233 : vector<2x128xf32>
    %236 = arith.divf %234, %235 : vector<2x128xf32>
    %237 = math.tanh %231 : vector<2x128xf32>
    %238 = vector.extract_strided_slice %236 {offsets = [0, 0], sizes = [2, 32], strides = [1, 1]} : vector<2x128xf32> to vector<2x32xf32>
    %239 = vector.extract_strided_slice %236 {offsets = [0, 32], sizes = [2, 32], strides = [1, 1]} : vector<2x128xf32> to vector<2x32xf32>
    %240 = vector.extract_strided_slice %237 {offsets = [0, 64], sizes = [2, 32], strides = [1, 1]} : vector<2x128xf32> to vector<2x32xf32>
    %241 = vector.extract_strided_slice %236 {offsets = [0, 96], sizes = [2, 32], strides = [1, 1]} : vector<2x128xf32> to vector<2x32xf32>
    %242 = arith.mulf %239, %225 : vector<2x32xf32>
    %243 = arith.mulf %238, %240 : vector<2x32xf32>
    %244 = arith.addf %242, %243 : vector<2x32xf32>
    %245 = math.tanh %244 : vector<2x32xf32>
    %246 = arith.mulf %241, %245 : vector<2x32xf32>
    %247 = vector.extract_strided_slice %53 {offsets = [20, 0], sizes = [2, 128], strides = [1, 1]} : vector<32x128xf32> to vector<2x128xf32>
    %248 = arith.truncf %246 : vector<2x32xf32> to vector<2x32xbf16>
    %cst_51 = arith.constant dense<0.000000e+00> : vector<2x128xf32>
    %249 = tpu.matmul %248, %54, %cst_51 {dimension_numbers = #tpu.dot_dimension_numbers<[1], [0], [0], [1], [0, 0, 1, 1], [], []>} : vector<2x32xbf16>, vector<32x128xbf16>, vector<2x128xf32> -> vector<2x128xf32>
    %250 = arith.addf %247, %249 : vector<2x128xf32>
    %251 = arith.negf %250 : vector<2x128xf32>
    %252 = math.exp %251 : vector<2x128xf32>
    %cst_52 = arith.constant 1.000000e+00 : f32
    %253 = vector.broadcast %cst_52 : f32 to vector<2x128xf32>
    %254 = arith.addf %253, %252 : vector<2x128xf32>
    %255 = arith.divf %253, %254 : vector<2x128xf32>
    %256 = math.tanh %250 : vector<2x128xf32>
    %257 = vector.extract_strided_slice %255 {offsets = [0, 0], sizes = [2, 32], strides = [1, 1]} : vector<2x128xf32> to vector<2x32xf32>
    %258 = vector.extract_strided_slice %255 {offsets = [0, 32], sizes = [2, 32], strides = [1, 1]} : vector<2x128xf32> to vector<2x32xf32>
    %259 = vector.extract_strided_slice %256 {offsets = [0, 64], sizes = [2, 32], strides = [1, 1]} : vector<2x128xf32> to vector<2x32xf32>
    %260 = vector.extract_strided_slice %255 {offsets = [0, 96], sizes = [2, 32], strides = [1, 1]} : vector<2x128xf32> to vector<2x32xf32>
    %261 = arith.mulf %258, %244 : vector<2x32xf32>
    %262 = arith.mulf %257, %259 : vector<2x32xf32>
    %263 = arith.addf %261, %262 : vector<2x32xf32>
    %264 = math.tanh %263 : vector<2x32xf32>
    %265 = arith.mulf %260, %264 : vector<2x32xf32>
    %266 = vector.extract_strided_slice %53 {offsets = [22, 0], sizes = [2, 128], strides = [1, 1]} : vector<32x128xf32> to vector<2x128xf32>
    %267 = arith.truncf %265 : vector<2x32xf32> to vector<2x32xbf16>
    %cst_53 = arith.constant dense<0.000000e+00> : vector<2x128xf32>
    %268 = tpu.matmul %267, %54, %cst_53 {dimension_numbers = #tpu.dot_dimension_numbers<[1], [0], [0], [1], [0, 0, 1, 1], [], []>} : vector<2x32xbf16>, vector<32x128xbf16>, vector<2x128xf32> -> vector<2x128xf32>
    %269 = arith.addf %266, %268 : vector<2x128xf32>
    %270 = arith.negf %269 : vector<2x128xf32>
    %271 = math.exp %270 : vector<2x128xf32>
    %cst_54 = arith.constant 1.000000e+00 : f32
    %272 = vector.broadcast %cst_54 : f32 to vector<2x128xf32>
    %273 = arith.addf %272, %271 : vector<2x128xf32>
    %274 = arith.divf %272, %273 : vector<2x128xf32>
    %275 = math.tanh %269 : vector<2x128xf32>
    %276 = vector.extract_strided_slice %274 {offsets = [0, 0], sizes = [2, 32], strides = [1, 1]} : vector<2x128xf32> to vector<2x32xf32>
    %277 = vector.extract_strided_slice %274 {offsets = [0, 32], sizes = [2, 32], strides = [1, 1]} : vector<2x128xf32> to vector<2x32xf32>
    %278 = vector.extract_strided_slice %275 {offsets = [0, 64], sizes = [2, 32], strides = [1, 1]} : vector<2x128xf32> to vector<2x32xf32>
    %279 = vector.extract_strided_slice %274 {offsets = [0, 96], sizes = [2, 32], strides = [1, 1]} : vector<2x128xf32> to vector<2x32xf32>
    %280 = arith.mulf %277, %263 : vector<2x32xf32>
    %281 = arith.mulf %276, %278 : vector<2x32xf32>
    %282 = arith.addf %280, %281 : vector<2x32xf32>
    %283 = math.tanh %282 : vector<2x32xf32>
    %284 = arith.mulf %279, %283 : vector<2x32xf32>
    %285 = vector.extract_strided_slice %53 {offsets = [24, 0], sizes = [2, 128], strides = [1, 1]} : vector<32x128xf32> to vector<2x128xf32>
    %286 = arith.truncf %284 : vector<2x32xf32> to vector<2x32xbf16>
    %cst_55 = arith.constant dense<0.000000e+00> : vector<2x128xf32>
    %287 = tpu.matmul %286, %54, %cst_55 {dimension_numbers = #tpu.dot_dimension_numbers<[1], [0], [0], [1], [0, 0, 1, 1], [], []>} : vector<2x32xbf16>, vector<32x128xbf16>, vector<2x128xf32> -> vector<2x128xf32>
    %288 = arith.addf %285, %287 : vector<2x128xf32>
    %289 = arith.negf %288 : vector<2x128xf32>
    %290 = math.exp %289 : vector<2x128xf32>
    %cst_56 = arith.constant 1.000000e+00 : f32
    %291 = vector.broadcast %cst_56 : f32 to vector<2x128xf32>
    %292 = arith.addf %291, %290 : vector<2x128xf32>
    %293 = arith.divf %291, %292 : vector<2x128xf32>
    %294 = math.tanh %288 : vector<2x128xf32>
    %295 = vector.extract_strided_slice %293 {offsets = [0, 0], sizes = [2, 32], strides = [1, 1]} : vector<2x128xf32> to vector<2x32xf32>
    %296 = vector.extract_strided_slice %293 {offsets = [0, 32], sizes = [2, 32], strides = [1, 1]} : vector<2x128xf32> to vector<2x32xf32>
    %297 = vector.extract_strided_slice %294 {offsets = [0, 64], sizes = [2, 32], strides = [1, 1]} : vector<2x128xf32> to vector<2x32xf32>
    %298 = vector.extract_strided_slice %293 {offsets = [0, 96], sizes = [2, 32], strides = [1, 1]} : vector<2x128xf32> to vector<2x32xf32>
    %299 = arith.mulf %296, %282 : vector<2x32xf32>
    %300 = arith.mulf %295, %297 : vector<2x32xf32>
    %301 = arith.addf %299, %300 : vector<2x32xf32>
    %302 = math.tanh %301 : vector<2x32xf32>
    %303 = arith.mulf %298, %302 : vector<2x32xf32>
    %304 = vector.extract_strided_slice %53 {offsets = [26, 0], sizes = [2, 128], strides = [1, 1]} : vector<32x128xf32> to vector<2x128xf32>
    %305 = arith.truncf %303 : vector<2x32xf32> to vector<2x32xbf16>
    %cst_57 = arith.constant dense<0.000000e+00> : vector<2x128xf32>
    %306 = tpu.matmul %305, %54, %cst_57 {dimension_numbers = #tpu.dot_dimension_numbers<[1], [0], [0], [1], [0, 0, 1, 1], [], []>} : vector<2x32xbf16>, vector<32x128xbf16>, vector<2x128xf32> -> vector<2x128xf32>
    %307 = arith.addf %304, %306 : vector<2x128xf32>
    %308 = arith.negf %307 : vector<2x128xf32>
    %309 = math.exp %308 : vector<2x128xf32>
    %cst_58 = arith.constant 1.000000e+00 : f32
    %310 = vector.broadcast %cst_58 : f32 to vector<2x128xf32>
    %311 = arith.addf %310, %309 : vector<2x128xf32>
    %312 = arith.divf %310, %311 : vector<2x128xf32>
    %313 = math.tanh %307 : vector<2x128xf32>
    %314 = vector.extract_strided_slice %312 {offsets = [0, 0], sizes = [2, 32], strides = [1, 1]} : vector<2x128xf32> to vector<2x32xf32>
    %315 = vector.extract_strided_slice %312 {offsets = [0, 32], sizes = [2, 32], strides = [1, 1]} : vector<2x128xf32> to vector<2x32xf32>
    %316 = vector.extract_strided_slice %313 {offsets = [0, 64], sizes = [2, 32], strides = [1, 1]} : vector<2x128xf32> to vector<2x32xf32>
    %317 = vector.extract_strided_slice %312 {offsets = [0, 96], sizes = [2, 32], strides = [1, 1]} : vector<2x128xf32> to vector<2x32xf32>
    %318 = arith.mulf %315, %301 : vector<2x32xf32>
    %319 = arith.mulf %314, %316 : vector<2x32xf32>
    %320 = arith.addf %318, %319 : vector<2x32xf32>
    %321 = math.tanh %320 : vector<2x32xf32>
    %322 = arith.mulf %317, %321 : vector<2x32xf32>
    %323 = vector.extract_strided_slice %53 {offsets = [28, 0], sizes = [2, 128], strides = [1, 1]} : vector<32x128xf32> to vector<2x128xf32>
    %324 = arith.truncf %322 : vector<2x32xf32> to vector<2x32xbf16>
    %cst_59 = arith.constant dense<0.000000e+00> : vector<2x128xf32>
    %325 = tpu.matmul %324, %54, %cst_59 {dimension_numbers = #tpu.dot_dimension_numbers<[1], [0], [0], [1], [0, 0, 1, 1], [], []>} : vector<2x32xbf16>, vector<32x128xbf16>, vector<2x128xf32> -> vector<2x128xf32>
    %326 = arith.addf %323, %325 : vector<2x128xf32>
    %327 = arith.negf %326 : vector<2x128xf32>
    %328 = math.exp %327 : vector<2x128xf32>
    %cst_60 = arith.constant 1.000000e+00 : f32
    %329 = vector.broadcast %cst_60 : f32 to vector<2x128xf32>
    %330 = arith.addf %329, %328 : vector<2x128xf32>
    %331 = arith.divf %329, %330 : vector<2x128xf32>
    %332 = math.tanh %326 : vector<2x128xf32>
    %333 = vector.extract_strided_slice %331 {offsets = [0, 0], sizes = [2, 32], strides = [1, 1]} : vector<2x128xf32> to vector<2x32xf32>
    %334 = vector.extract_strided_slice %331 {offsets = [0, 32], sizes = [2, 32], strides = [1, 1]} : vector<2x128xf32> to vector<2x32xf32>
    %335 = vector.extract_strided_slice %332 {offsets = [0, 64], sizes = [2, 32], strides = [1, 1]} : vector<2x128xf32> to vector<2x32xf32>
    %336 = vector.extract_strided_slice %331 {offsets = [0, 96], sizes = [2, 32], strides = [1, 1]} : vector<2x128xf32> to vector<2x32xf32>
    %337 = arith.mulf %334, %320 : vector<2x32xf32>
    %338 = arith.mulf %333, %335 : vector<2x32xf32>
    %339 = arith.addf %337, %338 : vector<2x32xf32>
    %340 = math.tanh %339 : vector<2x32xf32>
    %341 = arith.mulf %336, %340 : vector<2x32xf32>
    %342 = vector.extract_strided_slice %53 {offsets = [30, 0], sizes = [2, 128], strides = [1, 1]} : vector<32x128xf32> to vector<2x128xf32>
    %343 = arith.truncf %341 : vector<2x32xf32> to vector<2x32xbf16>
    %cst_61 = arith.constant dense<0.000000e+00> : vector<2x128xf32>
    %344 = tpu.matmul %343, %54, %cst_61 {dimension_numbers = #tpu.dot_dimension_numbers<[1], [0], [0], [1], [0, 0, 1, 1], [], []>} : vector<2x32xbf16>, vector<32x128xbf16>, vector<2x128xf32> -> vector<2x128xf32>
    %345 = arith.addf %342, %344 : vector<2x128xf32>
    %346 = arith.negf %345 : vector<2x128xf32>
    %347 = math.exp %346 : vector<2x128xf32>
    %cst_62 = arith.constant 1.000000e+00 : f32
    %348 = vector.broadcast %cst_62 : f32 to vector<2x128xf32>
    %349 = arith.addf %348, %347 : vector<2x128xf32>
    %350 = arith.divf %348, %349 : vector<2x128xf32>
    %351 = math.tanh %345 : vector<2x128xf32>
    %352 = vector.extract_strided_slice %350 {offsets = [0, 0], sizes = [2, 32], strides = [1, 1]} : vector<2x128xf32> to vector<2x32xf32>
    %353 = vector.extract_strided_slice %350 {offsets = [0, 32], sizes = [2, 32], strides = [1, 1]} : vector<2x128xf32> to vector<2x32xf32>
    %354 = vector.extract_strided_slice %351 {offsets = [0, 64], sizes = [2, 32], strides = [1, 1]} : vector<2x128xf32> to vector<2x32xf32>
    %355 = vector.extract_strided_slice %350 {offsets = [0, 96], sizes = [2, 32], strides = [1, 1]} : vector<2x128xf32> to vector<2x32xf32>
    %356 = arith.mulf %353, %339 : vector<2x32xf32>
    %357 = arith.mulf %352, %354 : vector<2x32xf32>
    %358 = arith.addf %356, %357 : vector<2x32xf32>
    %359 = math.tanh %358 : vector<2x32xf32>
    %360 = arith.mulf %355, %359 : vector<2x32xf32>
    %361 = tpu.concatenate %75, %94, %113, %132, %151, %170, %189, %208, %227, %246, %265, %284, %303, %322, %341, %360 in 0 : vector<2x32xf32>, vector<2x32xf32>, vector<2x32xf32>, vector<2x32xf32>, vector<2x32xf32>, vector<2x32xf32>, vector<2x32xf32>, vector<2x32xf32>, vector<2x32xf32>, vector<2x32xf32>, vector<2x32xf32>, vector<2x32xf32>, vector<2x32xf32>, vector<2x32xf32>, vector<2x32xf32>, vector<2x32xf32> -> vector<32x32xf32>
    %362 = arith.truncf %361 : vector<32x32xf32> to vector<32x32xbf16>
    %c0_63 = arith.constant 0 : index
    %c0_64 = arith.constant 0 : index
    %363 = vector.load %arg11[%c0_63, %c0_64] : memref<32x128xbf16, #tpu.memory_space<vmem>>, vector<32x128xbf16>
    %cst_65 = arith.constant dense<0.000000e+00> : vector<32x128xf32>
    %364 = tpu.matmul %362, %363, %cst_65 {dimension_numbers = #tpu.dot_dimension_numbers<[1], [0], [0], [1], [0, 0, 1, 1], [], []>} : vector<32x32xbf16>, vector<32x128xbf16>, vector<32x128xf32> -> vector<32x128xf32>
    %c0_66 = arith.constant 0 : index
    %c0_67 = arith.constant 0 : index
    %365 = vector.load %arg13[%c0_66, %c0_67] : memref<1x128xf32, #tpu.memory_space<vmem>>, vector<1x128xf32>
    %366 = vector.broadcast %365 : vector<1x128xf32> to vector<32x128xf32>
    %367 = arith.addf %364, %366 : vector<32x128xf32>
    %c0_68 = arith.constant 0 : index
    %c0_69 = arith.constant 0 : index
    %368 = vector.load %arg12[%c0_68, %c0_69] : memref<32x128xbf16, #tpu.memory_space<vmem>>, vector<32x128xbf16>
    %cst_70 = arith.constant 0.000000e+00 : f32
    %369 = vector.broadcast %cst_70 : f32 to vector<2x32xf32>
    %cst_71 = arith.constant 0.000000e+00 : f32
    %370 = vector.broadcast %cst_71 : f32 to vector<2x32xf32>
    %371 = vector.extract_strided_slice %367 {offsets = [0, 0], sizes = [2, 128], strides = [1, 1]} : vector<32x128xf32> to vector<2x128xf32>
    %372 = arith.truncf %369 : vector<2x32xf32> to vector<2x32xbf16>
    %cst_72 = arith.constant dense<0.000000e+00> : vector<2x128xf32>
    %373 = tpu.matmul %372, %368, %cst_72 {dimension_numbers = #tpu.dot_dimension_numbers<[1], [0], [0], [1], [0, 0, 1, 1], [], []>} : vector<2x32xbf16>, vector<32x128xbf16>, vector<2x128xf32> -> vector<2x128xf32>
    %374 = arith.addf %371, %373 : vector<2x128xf32>
    %375 = arith.negf %374 : vector<2x128xf32>
    %376 = math.exp %375 : vector<2x128xf32>
    %cst_73 = arith.constant 1.000000e+00 : f32
    %377 = vector.broadcast %cst_73 : f32 to vector<2x128xf32>
    %378 = arith.addf %377, %376 : vector<2x128xf32>
    %379 = arith.divf %377, %378 : vector<2x128xf32>
    %380 = math.tanh %374 : vector<2x128xf32>
    %381 = vector.extract_strided_slice %379 {offsets = [0, 0], sizes = [2, 32], strides = [1, 1]} : vector<2x128xf32> to vector<2x32xf32>
    %382 = vector.extract_strided_slice %379 {offsets = [0, 32], sizes = [2, 32], strides = [1, 1]} : vector<2x128xf32> to vector<2x32xf32>
    %383 = vector.extract_strided_slice %380 {offsets = [0, 64], sizes = [2, 32], strides = [1, 1]} : vector<2x128xf32> to vector<2x32xf32>
    %384 = vector.extract_strided_slice %379 {offsets = [0, 96], sizes = [2, 32], strides = [1, 1]} : vector<2x128xf32> to vector<2x32xf32>
    %385 = arith.mulf %382, %370 : vector<2x32xf32>
    %386 = arith.mulf %381, %383 : vector<2x32xf32>
    %387 = arith.addf %385, %386 : vector<2x32xf32>
    %388 = math.tanh %387 : vector<2x32xf32>
    %389 = arith.mulf %384, %388 : vector<2x32xf32>
    %390 = vector.extract_strided_slice %367 {offsets = [2, 0], sizes = [2, 128], strides = [1, 1]} : vector<32x128xf32> to vector<2x128xf32>
    %391 = arith.truncf %389 : vector<2x32xf32> to vector<2x32xbf16>
    %cst_74 = arith.constant dense<0.000000e+00> : vector<2x128xf32>
    %392 = tpu.matmul %391, %368, %cst_74 {dimension_numbers = #tpu.dot_dimension_numbers<[1], [0], [0], [1], [0, 0, 1, 1], [], []>} : vector<2x32xbf16>, vector<32x128xbf16>, vector<2x128xf32> -> vector<2x128xf32>
    %393 = arith.addf %390, %392 : vector<2x128xf32>
    %394 = arith.negf %393 : vector<2x128xf32>
    %395 = math.exp %394 : vector<2x128xf32>
    %cst_75 = arith.constant 1.000000e+00 : f32
    %396 = vector.broadcast %cst_75 : f32 to vector<2x128xf32>
    %397 = arith.addf %396, %395 : vector<2x128xf32>
    %398 = arith.divf %396, %397 : vector<2x128xf32>
    %399 = math.tanh %393 : vector<2x128xf32>
    %400 = vector.extract_strided_slice %398 {offsets = [0, 0], sizes = [2, 32], strides = [1, 1]} : vector<2x128xf32> to vector<2x32xf32>
    %401 = vector.extract_strided_slice %398 {offsets = [0, 32], sizes = [2, 32], strides = [1, 1]} : vector<2x128xf32> to vector<2x32xf32>
    %402 = vector.extract_strided_slice %399 {offsets = [0, 64], sizes = [2, 32], strides = [1, 1]} : vector<2x128xf32> to vector<2x32xf32>
    %403 = vector.extract_strided_slice %398 {offsets = [0, 96], sizes = [2, 32], strides = [1, 1]} : vector<2x128xf32> to vector<2x32xf32>
    %404 = arith.mulf %401, %387 : vector<2x32xf32>
    %405 = arith.mulf %400, %402 : vector<2x32xf32>
    %406 = arith.addf %404, %405 : vector<2x32xf32>
    %407 = math.tanh %406 : vector<2x32xf32>
    %408 = arith.mulf %403, %407 : vector<2x32xf32>
    %409 = vector.extract_strided_slice %367 {offsets = [4, 0], sizes = [2, 128], strides = [1, 1]} : vector<32x128xf32> to vector<2x128xf32>
    %410 = arith.truncf %408 : vector<2x32xf32> to vector<2x32xbf16>
    %cst_76 = arith.constant dense<0.000000e+00> : vector<2x128xf32>
    %411 = tpu.matmul %410, %368, %cst_76 {dimension_numbers = #tpu.dot_dimension_numbers<[1], [0], [0], [1], [0, 0, 1, 1], [], []>} : vector<2x32xbf16>, vector<32x128xbf16>, vector<2x128xf32> -> vector<2x128xf32>
    %412 = arith.addf %409, %411 : vector<2x128xf32>
    %413 = arith.negf %412 : vector<2x128xf32>
    %414 = math.exp %413 : vector<2x128xf32>
    %cst_77 = arith.constant 1.000000e+00 : f32
    %415 = vector.broadcast %cst_77 : f32 to vector<2x128xf32>
    %416 = arith.addf %415, %414 : vector<2x128xf32>
    %417 = arith.divf %415, %416 : vector<2x128xf32>
    %418 = math.tanh %412 : vector<2x128xf32>
    %419 = vector.extract_strided_slice %417 {offsets = [0, 0], sizes = [2, 32], strides = [1, 1]} : vector<2x128xf32> to vector<2x32xf32>
    %420 = vector.extract_strided_slice %417 {offsets = [0, 32], sizes = [2, 32], strides = [1, 1]} : vector<2x128xf32> to vector<2x32xf32>
    %421 = vector.extract_strided_slice %418 {offsets = [0, 64], sizes = [2, 32], strides = [1, 1]} : vector<2x128xf32> to vector<2x32xf32>
    %422 = vector.extract_strided_slice %417 {offsets = [0, 96], sizes = [2, 32], strides = [1, 1]} : vector<2x128xf32> to vector<2x32xf32>
    %423 = arith.mulf %420, %406 : vector<2x32xf32>
    %424 = arith.mulf %419, %421 : vector<2x32xf32>
    %425 = arith.addf %423, %424 : vector<2x32xf32>
    %426 = math.tanh %425 : vector<2x32xf32>
    %427 = arith.mulf %422, %426 : vector<2x32xf32>
    %428 = vector.extract_strided_slice %367 {offsets = [6, 0], sizes = [2, 128], strides = [1, 1]} : vector<32x128xf32> to vector<2x128xf32>
    %429 = arith.truncf %427 : vector<2x32xf32> to vector<2x32xbf16>
    %cst_78 = arith.constant dense<0.000000e+00> : vector<2x128xf32>
    %430 = tpu.matmul %429, %368, %cst_78 {dimension_numbers = #tpu.dot_dimension_numbers<[1], [0], [0], [1], [0, 0, 1, 1], [], []>} : vector<2x32xbf16>, vector<32x128xbf16>, vector<2x128xf32> -> vector<2x128xf32>
    %431 = arith.addf %428, %430 : vector<2x128xf32>
    %432 = arith.negf %431 : vector<2x128xf32>
    %433 = math.exp %432 : vector<2x128xf32>
    %cst_79 = arith.constant 1.000000e+00 : f32
    %434 = vector.broadcast %cst_79 : f32 to vector<2x128xf32>
    %435 = arith.addf %434, %433 : vector<2x128xf32>
    %436 = arith.divf %434, %435 : vector<2x128xf32>
    %437 = math.tanh %431 : vector<2x128xf32>
    %438 = vector.extract_strided_slice %436 {offsets = [0, 0], sizes = [2, 32], strides = [1, 1]} : vector<2x128xf32> to vector<2x32xf32>
    %439 = vector.extract_strided_slice %436 {offsets = [0, 32], sizes = [2, 32], strides = [1, 1]} : vector<2x128xf32> to vector<2x32xf32>
    %440 = vector.extract_strided_slice %437 {offsets = [0, 64], sizes = [2, 32], strides = [1, 1]} : vector<2x128xf32> to vector<2x32xf32>
    %441 = vector.extract_strided_slice %436 {offsets = [0, 96], sizes = [2, 32], strides = [1, 1]} : vector<2x128xf32> to vector<2x32xf32>
    %442 = arith.mulf %439, %425 : vector<2x32xf32>
    %443 = arith.mulf %438, %440 : vector<2x32xf32>
    %444 = arith.addf %442, %443 : vector<2x32xf32>
    %445 = math.tanh %444 : vector<2x32xf32>
    %446 = arith.mulf %441, %445 : vector<2x32xf32>
    %447 = vector.extract_strided_slice %367 {offsets = [8, 0], sizes = [2, 128], strides = [1, 1]} : vector<32x128xf32> to vector<2x128xf32>
    %448 = arith.truncf %446 : vector<2x32xf32> to vector<2x32xbf16>
    %cst_80 = arith.constant dense<0.000000e+00> : vector<2x128xf32>
    %449 = tpu.matmul %448, %368, %cst_80 {dimension_numbers = #tpu.dot_dimension_numbers<[1], [0], [0], [1], [0, 0, 1, 1], [], []>} : vector<2x32xbf16>, vector<32x128xbf16>, vector<2x128xf32> -> vector<2x128xf32>
    %450 = arith.addf %447, %449 : vector<2x128xf32>
    %451 = arith.negf %450 : vector<2x128xf32>
    %452 = math.exp %451 : vector<2x128xf32>
    %cst_81 = arith.constant 1.000000e+00 : f32
    %453 = vector.broadcast %cst_81 : f32 to vector<2x128xf32>
    %454 = arith.addf %453, %452 : vector<2x128xf32>
    %455 = arith.divf %453, %454 : vector<2x128xf32>
    %456 = math.tanh %450 : vector<2x128xf32>
    %457 = vector.extract_strided_slice %455 {offsets = [0, 0], sizes = [2, 32], strides = [1, 1]} : vector<2x128xf32> to vector<2x32xf32>
    %458 = vector.extract_strided_slice %455 {offsets = [0, 32], sizes = [2, 32], strides = [1, 1]} : vector<2x128xf32> to vector<2x32xf32>
    %459 = vector.extract_strided_slice %456 {offsets = [0, 64], sizes = [2, 32], strides = [1, 1]} : vector<2x128xf32> to vector<2x32xf32>
    %460 = vector.extract_strided_slice %455 {offsets = [0, 96], sizes = [2, 32], strides = [1, 1]} : vector<2x128xf32> to vector<2x32xf32>
    %461 = arith.mulf %458, %444 : vector<2x32xf32>
    %462 = arith.mulf %457, %459 : vector<2x32xf32>
    %463 = arith.addf %461, %462 : vector<2x32xf32>
    %464 = math.tanh %463 : vector<2x32xf32>
    %465 = arith.mulf %460, %464 : vector<2x32xf32>
    %466 = vector.extract_strided_slice %367 {offsets = [10, 0], sizes = [2, 128], strides = [1, 1]} : vector<32x128xf32> to vector<2x128xf32>
    %467 = arith.truncf %465 : vector<2x32xf32> to vector<2x32xbf16>
    %cst_82 = arith.constant dense<0.000000e+00> : vector<2x128xf32>
    %468 = tpu.matmul %467, %368, %cst_82 {dimension_numbers = #tpu.dot_dimension_numbers<[1], [0], [0], [1], [0, 0, 1, 1], [], []>} : vector<2x32xbf16>, vector<32x128xbf16>, vector<2x128xf32> -> vector<2x128xf32>
    %469 = arith.addf %466, %468 : vector<2x128xf32>
    %470 = arith.negf %469 : vector<2x128xf32>
    %471 = math.exp %470 : vector<2x128xf32>
    %cst_83 = arith.constant 1.000000e+00 : f32
    %472 = vector.broadcast %cst_83 : f32 to vector<2x128xf32>
    %473 = arith.addf %472, %471 : vector<2x128xf32>
    %474 = arith.divf %472, %473 : vector<2x128xf32>
    %475 = math.tanh %469 : vector<2x128xf32>
    %476 = vector.extract_strided_slice %474 {offsets = [0, 0], sizes = [2, 32], strides = [1, 1]} : vector<2x128xf32> to vector<2x32xf32>
    %477 = vector.extract_strided_slice %474 {offsets = [0, 32], sizes = [2, 32], strides = [1, 1]} : vector<2x128xf32> to vector<2x32xf32>
    %478 = vector.extract_strided_slice %475 {offsets = [0, 64], sizes = [2, 32], strides = [1, 1]} : vector<2x128xf32> to vector<2x32xf32>
    %479 = vector.extract_strided_slice %474 {offsets = [0, 96], sizes = [2, 32], strides = [1, 1]} : vector<2x128xf32> to vector<2x32xf32>
    %480 = arith.mulf %477, %463 : vector<2x32xf32>
    %481 = arith.mulf %476, %478 : vector<2x32xf32>
    %482 = arith.addf %480, %481 : vector<2x32xf32>
    %483 = math.tanh %482 : vector<2x32xf32>
    %484 = arith.mulf %479, %483 : vector<2x32xf32>
    %485 = vector.extract_strided_slice %367 {offsets = [12, 0], sizes = [2, 128], strides = [1, 1]} : vector<32x128xf32> to vector<2x128xf32>
    %486 = arith.truncf %484 : vector<2x32xf32> to vector<2x32xbf16>
    %cst_84 = arith.constant dense<0.000000e+00> : vector<2x128xf32>
    %487 = tpu.matmul %486, %368, %cst_84 {dimension_numbers = #tpu.dot_dimension_numbers<[1], [0], [0], [1], [0, 0, 1, 1], [], []>} : vector<2x32xbf16>, vector<32x128xbf16>, vector<2x128xf32> -> vector<2x128xf32>
    %488 = arith.addf %485, %487 : vector<2x128xf32>
    %489 = arith.negf %488 : vector<2x128xf32>
    %490 = math.exp %489 : vector<2x128xf32>
    %cst_85 = arith.constant 1.000000e+00 : f32
    %491 = vector.broadcast %cst_85 : f32 to vector<2x128xf32>
    %492 = arith.addf %491, %490 : vector<2x128xf32>
    %493 = arith.divf %491, %492 : vector<2x128xf32>
    %494 = math.tanh %488 : vector<2x128xf32>
    %495 = vector.extract_strided_slice %493 {offsets = [0, 0], sizes = [2, 32], strides = [1, 1]} : vector<2x128xf32> to vector<2x32xf32>
    %496 = vector.extract_strided_slice %493 {offsets = [0, 32], sizes = [2, 32], strides = [1, 1]} : vector<2x128xf32> to vector<2x32xf32>
    %497 = vector.extract_strided_slice %494 {offsets = [0, 64], sizes = [2, 32], strides = [1, 1]} : vector<2x128xf32> to vector<2x32xf32>
    %498 = vector.extract_strided_slice %493 {offsets = [0, 96], sizes = [2, 32], strides = [1, 1]} : vector<2x128xf32> to vector<2x32xf32>
    %499 = arith.mulf %496, %482 : vector<2x32xf32>
    %500 = arith.mulf %495, %497 : vector<2x32xf32>
    %501 = arith.addf %499, %500 : vector<2x32xf32>
    %502 = math.tanh %501 : vector<2x32xf32>
    %503 = arith.mulf %498, %502 : vector<2x32xf32>
    %504 = vector.extract_strided_slice %367 {offsets = [14, 0], sizes = [2, 128], strides = [1, 1]} : vector<32x128xf32> to vector<2x128xf32>
    %505 = arith.truncf %503 : vector<2x32xf32> to vector<2x32xbf16>
    %cst_86 = arith.constant dense<0.000000e+00> : vector<2x128xf32>
    %506 = tpu.matmul %505, %368, %cst_86 {dimension_numbers = #tpu.dot_dimension_numbers<[1], [0], [0], [1], [0, 0, 1, 1], [], []>} : vector<2x32xbf16>, vector<32x128xbf16>, vector<2x128xf32> -> vector<2x128xf32>
    %507 = arith.addf %504, %506 : vector<2x128xf32>
    %508 = arith.negf %507 : vector<2x128xf32>
    %509 = math.exp %508 : vector<2x128xf32>
    %cst_87 = arith.constant 1.000000e+00 : f32
    %510 = vector.broadcast %cst_87 : f32 to vector<2x128xf32>
    %511 = arith.addf %510, %509 : vector<2x128xf32>
    %512 = arith.divf %510, %511 : vector<2x128xf32>
    %513 = math.tanh %507 : vector<2x128xf32>
    %514 = vector.extract_strided_slice %512 {offsets = [0, 0], sizes = [2, 32], strides = [1, 1]} : vector<2x128xf32> to vector<2x32xf32>
    %515 = vector.extract_strided_slice %512 {offsets = [0, 32], sizes = [2, 32], strides = [1, 1]} : vector<2x128xf32> to vector<2x32xf32>
    %516 = vector.extract_strided_slice %513 {offsets = [0, 64], sizes = [2, 32], strides = [1, 1]} : vector<2x128xf32> to vector<2x32xf32>
    %517 = vector.extract_strided_slice %512 {offsets = [0, 96], sizes = [2, 32], strides = [1, 1]} : vector<2x128xf32> to vector<2x32xf32>
    %518 = arith.mulf %515, %501 : vector<2x32xf32>
    %519 = arith.mulf %514, %516 : vector<2x32xf32>
    %520 = arith.addf %518, %519 : vector<2x32xf32>
    %521 = math.tanh %520 : vector<2x32xf32>
    %522 = arith.mulf %517, %521 : vector<2x32xf32>
    %523 = vector.extract_strided_slice %367 {offsets = [16, 0], sizes = [2, 128], strides = [1, 1]} : vector<32x128xf32> to vector<2x128xf32>
    %524 = arith.truncf %522 : vector<2x32xf32> to vector<2x32xbf16>
    %cst_88 = arith.constant dense<0.000000e+00> : vector<2x128xf32>
    %525 = tpu.matmul %524, %368, %cst_88 {dimension_numbers = #tpu.dot_dimension_numbers<[1], [0], [0], [1], [0, 0, 1, 1], [], []>} : vector<2x32xbf16>, vector<32x128xbf16>, vector<2x128xf32> -> vector<2x128xf32>
    %526 = arith.addf %523, %525 : vector<2x128xf32>
    %527 = arith.negf %526 : vector<2x128xf32>
    %528 = math.exp %527 : vector<2x128xf32>
    %cst_89 = arith.constant 1.000000e+00 : f32
    %529 = vector.broadcast %cst_89 : f32 to vector<2x128xf32>
    %530 = arith.addf %529, %528 : vector<2x128xf32>
    %531 = arith.divf %529, %530 : vector<2x128xf32>
    %532 = math.tanh %526 : vector<2x128xf32>
    %533 = vector.extract_strided_slice %531 {offsets = [0, 0], sizes = [2, 32], strides = [1, 1]} : vector<2x128xf32> to vector<2x32xf32>
    %534 = vector.extract_strided_slice %531 {offsets = [0, 32], sizes = [2, 32], strides = [1, 1]} : vector<2x128xf32> to vector<2x32xf32>
    %535 = vector.extract_strided_slice %532 {offsets = [0, 64], sizes = [2, 32], strides = [1, 1]} : vector<2x128xf32> to vector<2x32xf32>
    %536 = vector.extract_strided_slice %531 {offsets = [0, 96], sizes = [2, 32], strides = [1, 1]} : vector<2x128xf32> to vector<2x32xf32>
    %537 = arith.mulf %534, %520 : vector<2x32xf32>
    %538 = arith.mulf %533, %535 : vector<2x32xf32>
    %539 = arith.addf %537, %538 : vector<2x32xf32>
    %540 = math.tanh %539 : vector<2x32xf32>
    %541 = arith.mulf %536, %540 : vector<2x32xf32>
    %542 = vector.extract_strided_slice %367 {offsets = [18, 0], sizes = [2, 128], strides = [1, 1]} : vector<32x128xf32> to vector<2x128xf32>
    %543 = arith.truncf %541 : vector<2x32xf32> to vector<2x32xbf16>
    %cst_90 = arith.constant dense<0.000000e+00> : vector<2x128xf32>
    %544 = tpu.matmul %543, %368, %cst_90 {dimension_numbers = #tpu.dot_dimension_numbers<[1], [0], [0], [1], [0, 0, 1, 1], [], []>} : vector<2x32xbf16>, vector<32x128xbf16>, vector<2x128xf32> -> vector<2x128xf32>
    %545 = arith.addf %542, %544 : vector<2x128xf32>
    %546 = arith.negf %545 : vector<2x128xf32>
    %547 = math.exp %546 : vector<2x128xf32>
    %cst_91 = arith.constant 1.000000e+00 : f32
    %548 = vector.broadcast %cst_91 : f32 to vector<2x128xf32>
    %549 = arith.addf %548, %547 : vector<2x128xf32>
    %550 = arith.divf %548, %549 : vector<2x128xf32>
    %551 = math.tanh %545 : vector<2x128xf32>
    %552 = vector.extract_strided_slice %550 {offsets = [0, 0], sizes = [2, 32], strides = [1, 1]} : vector<2x128xf32> to vector<2x32xf32>
    %553 = vector.extract_strided_slice %550 {offsets = [0, 32], sizes = [2, 32], strides = [1, 1]} : vector<2x128xf32> to vector<2x32xf32>
    %554 = vector.extract_strided_slice %551 {offsets = [0, 64], sizes = [2, 32], strides = [1, 1]} : vector<2x128xf32> to vector<2x32xf32>
    %555 = vector.extract_strided_slice %550 {offsets = [0, 96], sizes = [2, 32], strides = [1, 1]} : vector<2x128xf32> to vector<2x32xf32>
    %556 = arith.mulf %553, %539 : vector<2x32xf32>
    %557 = arith.mulf %552, %554 : vector<2x32xf32>
    %558 = arith.addf %556, %557 : vector<2x32xf32>
    %559 = math.tanh %558 : vector<2x32xf32>
    %560 = arith.mulf %555, %559 : vector<2x32xf32>
    %561 = vector.extract_strided_slice %367 {offsets = [20, 0], sizes = [2, 128], strides = [1, 1]} : vector<32x128xf32> to vector<2x128xf32>
    %562 = arith.truncf %560 : vector<2x32xf32> to vector<2x32xbf16>
    %cst_92 = arith.constant dense<0.000000e+00> : vector<2x128xf32>
    %563 = tpu.matmul %562, %368, %cst_92 {dimension_numbers = #tpu.dot_dimension_numbers<[1], [0], [0], [1], [0, 0, 1, 1], [], []>} : vector<2x32xbf16>, vector<32x128xbf16>, vector<2x128xf32> -> vector<2x128xf32>
    %564 = arith.addf %561, %563 : vector<2x128xf32>
    %565 = arith.negf %564 : vector<2x128xf32>
    %566 = math.exp %565 : vector<2x128xf32>
    %cst_93 = arith.constant 1.000000e+00 : f32
    %567 = vector.broadcast %cst_93 : f32 to vector<2x128xf32>
    %568 = arith.addf %567, %566 : vector<2x128xf32>
    %569 = arith.divf %567, %568 : vector<2x128xf32>
    %570 = math.tanh %564 : vector<2x128xf32>
    %571 = vector.extract_strided_slice %569 {offsets = [0, 0], sizes = [2, 32], strides = [1, 1]} : vector<2x128xf32> to vector<2x32xf32>
    %572 = vector.extract_strided_slice %569 {offsets = [0, 32], sizes = [2, 32], strides = [1, 1]} : vector<2x128xf32> to vector<2x32xf32>
    %573 = vector.extract_strided_slice %570 {offsets = [0, 64], sizes = [2, 32], strides = [1, 1]} : vector<2x128xf32> to vector<2x32xf32>
    %574 = vector.extract_strided_slice %569 {offsets = [0, 96], sizes = [2, 32], strides = [1, 1]} : vector<2x128xf32> to vector<2x32xf32>
    %575 = arith.mulf %572, %558 : vector<2x32xf32>
    %576 = arith.mulf %571, %573 : vector<2x32xf32>
    %577 = arith.addf %575, %576 : vector<2x32xf32>
    %578 = math.tanh %577 : vector<2x32xf32>
    %579 = arith.mulf %574, %578 : vector<2x32xf32>
    %580 = vector.extract_strided_slice %367 {offsets = [22, 0], sizes = [2, 128], strides = [1, 1]} : vector<32x128xf32> to vector<2x128xf32>
    %581 = arith.truncf %579 : vector<2x32xf32> to vector<2x32xbf16>
    %cst_94 = arith.constant dense<0.000000e+00> : vector<2x128xf32>
    %582 = tpu.matmul %581, %368, %cst_94 {dimension_numbers = #tpu.dot_dimension_numbers<[1], [0], [0], [1], [0, 0, 1, 1], [], []>} : vector<2x32xbf16>, vector<32x128xbf16>, vector<2x128xf32> -> vector<2x128xf32>
    %583 = arith.addf %580, %582 : vector<2x128xf32>
    %584 = arith.negf %583 : vector<2x128xf32>
    %585 = math.exp %584 : vector<2x128xf32>
    %cst_95 = arith.constant 1.000000e+00 : f32
    %586 = vector.broadcast %cst_95 : f32 to vector<2x128xf32>
    %587 = arith.addf %586, %585 : vector<2x128xf32>
    %588 = arith.divf %586, %587 : vector<2x128xf32>
    %589 = math.tanh %583 : vector<2x128xf32>
    %590 = vector.extract_strided_slice %588 {offsets = [0, 0], sizes = [2, 32], strides = [1, 1]} : vector<2x128xf32> to vector<2x32xf32>
    %591 = vector.extract_strided_slice %588 {offsets = [0, 32], sizes = [2, 32], strides = [1, 1]} : vector<2x128xf32> to vector<2x32xf32>
    %592 = vector.extract_strided_slice %589 {offsets = [0, 64], sizes = [2, 32], strides = [1, 1]} : vector<2x128xf32> to vector<2x32xf32>
    %593 = vector.extract_strided_slice %588 {offsets = [0, 96], sizes = [2, 32], strides = [1, 1]} : vector<2x128xf32> to vector<2x32xf32>
    %594 = arith.mulf %591, %577 : vector<2x32xf32>
    %595 = arith.mulf %590, %592 : vector<2x32xf32>
    %596 = arith.addf %594, %595 : vector<2x32xf32>
    %597 = math.tanh %596 : vector<2x32xf32>
    %598 = arith.mulf %593, %597 : vector<2x32xf32>
    %599 = vector.extract_strided_slice %367 {offsets = [24, 0], sizes = [2, 128], strides = [1, 1]} : vector<32x128xf32> to vector<2x128xf32>
    %600 = arith.truncf %598 : vector<2x32xf32> to vector<2x32xbf16>
    %cst_96 = arith.constant dense<0.000000e+00> : vector<2x128xf32>
    %601 = tpu.matmul %600, %368, %cst_96 {dimension_numbers = #tpu.dot_dimension_numbers<[1], [0], [0], [1], [0, 0, 1, 1], [], []>} : vector<2x32xbf16>, vector<32x128xbf16>, vector<2x128xf32> -> vector<2x128xf32>
    %602 = arith.addf %599, %601 : vector<2x128xf32>
    %603 = arith.negf %602 : vector<2x128xf32>
    %604 = math.exp %603 : vector<2x128xf32>
    %cst_97 = arith.constant 1.000000e+00 : f32
    %605 = vector.broadcast %cst_97 : f32 to vector<2x128xf32>
    %606 = arith.addf %605, %604 : vector<2x128xf32>
    %607 = arith.divf %605, %606 : vector<2x128xf32>
    %608 = math.tanh %602 : vector<2x128xf32>
    %609 = vector.extract_strided_slice %607 {offsets = [0, 0], sizes = [2, 32], strides = [1, 1]} : vector<2x128xf32> to vector<2x32xf32>
    %610 = vector.extract_strided_slice %607 {offsets = [0, 32], sizes = [2, 32], strides = [1, 1]} : vector<2x128xf32> to vector<2x32xf32>
    %611 = vector.extract_strided_slice %608 {offsets = [0, 64], sizes = [2, 32], strides = [1, 1]} : vector<2x128xf32> to vector<2x32xf32>
    %612 = vector.extract_strided_slice %607 {offsets = [0, 96], sizes = [2, 32], strides = [1, 1]} : vector<2x128xf32> to vector<2x32xf32>
    %613 = arith.mulf %610, %596 : vector<2x32xf32>
    %614 = arith.mulf %609, %611 : vector<2x32xf32>
    %615 = arith.addf %613, %614 : vector<2x32xf32>
    %616 = math.tanh %615 : vector<2x32xf32>
    %617 = arith.mulf %612, %616 : vector<2x32xf32>
    %618 = vector.extract_strided_slice %367 {offsets = [26, 0], sizes = [2, 128], strides = [1, 1]} : vector<32x128xf32> to vector<2x128xf32>
    %619 = arith.truncf %617 : vector<2x32xf32> to vector<2x32xbf16>
    %cst_98 = arith.constant dense<0.000000e+00> : vector<2x128xf32>
    %620 = tpu.matmul %619, %368, %cst_98 {dimension_numbers = #tpu.dot_dimension_numbers<[1], [0], [0], [1], [0, 0, 1, 1], [], []>} : vector<2x32xbf16>, vector<32x128xbf16>, vector<2x128xf32> -> vector<2x128xf32>
    %621 = arith.addf %618, %620 : vector<2x128xf32>
    %622 = arith.negf %621 : vector<2x128xf32>
    %623 = math.exp %622 : vector<2x128xf32>
    %cst_99 = arith.constant 1.000000e+00 : f32
    %624 = vector.broadcast %cst_99 : f32 to vector<2x128xf32>
    %625 = arith.addf %624, %623 : vector<2x128xf32>
    %626 = arith.divf %624, %625 : vector<2x128xf32>
    %627 = math.tanh %621 : vector<2x128xf32>
    %628 = vector.extract_strided_slice %626 {offsets = [0, 0], sizes = [2, 32], strides = [1, 1]} : vector<2x128xf32> to vector<2x32xf32>
    %629 = vector.extract_strided_slice %626 {offsets = [0, 32], sizes = [2, 32], strides = [1, 1]} : vector<2x128xf32> to vector<2x32xf32>
    %630 = vector.extract_strided_slice %627 {offsets = [0, 64], sizes = [2, 32], strides = [1, 1]} : vector<2x128xf32> to vector<2x32xf32>
    %631 = vector.extract_strided_slice %626 {offsets = [0, 96], sizes = [2, 32], strides = [1, 1]} : vector<2x128xf32> to vector<2x32xf32>
    %632 = arith.mulf %629, %615 : vector<2x32xf32>
    %633 = arith.mulf %628, %630 : vector<2x32xf32>
    %634 = arith.addf %632, %633 : vector<2x32xf32>
    %635 = math.tanh %634 : vector<2x32xf32>
    %636 = arith.mulf %631, %635 : vector<2x32xf32>
    %637 = vector.extract_strided_slice %367 {offsets = [28, 0], sizes = [2, 128], strides = [1, 1]} : vector<32x128xf32> to vector<2x128xf32>
    %638 = arith.truncf %636 : vector<2x32xf32> to vector<2x32xbf16>
    %cst_100 = arith.constant dense<0.000000e+00> : vector<2x128xf32>
    %639 = tpu.matmul %638, %368, %cst_100 {dimension_numbers = #tpu.dot_dimension_numbers<[1], [0], [0], [1], [0, 0, 1, 1], [], []>} : vector<2x32xbf16>, vector<32x128xbf16>, vector<2x128xf32> -> vector<2x128xf32>
    %640 = arith.addf %637, %639 : vector<2x128xf32>
    %641 = arith.negf %640 : vector<2x128xf32>
    %642 = math.exp %641 : vector<2x128xf32>
    %cst_101 = arith.constant 1.000000e+00 : f32
    %643 = vector.broadcast %cst_101 : f32 to vector<2x128xf32>
    %644 = arith.addf %643, %642 : vector<2x128xf32>
    %645 = arith.divf %643, %644 : vector<2x128xf32>
    %646 = math.tanh %640 : vector<2x128xf32>
    %647 = vector.extract_strided_slice %645 {offsets = [0, 0], sizes = [2, 32], strides = [1, 1]} : vector<2x128xf32> to vector<2x32xf32>
    %648 = vector.extract_strided_slice %645 {offsets = [0, 32], sizes = [2, 32], strides = [1, 1]} : vector<2x128xf32> to vector<2x32xf32>
    %649 = vector.extract_strided_slice %646 {offsets = [0, 64], sizes = [2, 32], strides = [1, 1]} : vector<2x128xf32> to vector<2x32xf32>
    %650 = vector.extract_strided_slice %645 {offsets = [0, 96], sizes = [2, 32], strides = [1, 1]} : vector<2x128xf32> to vector<2x32xf32>
    %651 = arith.mulf %648, %634 : vector<2x32xf32>
    %652 = arith.mulf %647, %649 : vector<2x32xf32>
    %653 = arith.addf %651, %652 : vector<2x32xf32>
    %654 = math.tanh %653 : vector<2x32xf32>
    %655 = arith.mulf %650, %654 : vector<2x32xf32>
    %656 = vector.extract_strided_slice %367 {offsets = [30, 0], sizes = [2, 128], strides = [1, 1]} : vector<32x128xf32> to vector<2x128xf32>
    %657 = arith.truncf %655 : vector<2x32xf32> to vector<2x32xbf16>
    %cst_102 = arith.constant dense<0.000000e+00> : vector<2x128xf32>
    %658 = tpu.matmul %657, %368, %cst_102 {dimension_numbers = #tpu.dot_dimension_numbers<[1], [0], [0], [1], [0, 0, 1, 1], [], []>} : vector<2x32xbf16>, vector<32x128xbf16>, vector<2x128xf32> -> vector<2x128xf32>
    %659 = arith.addf %656, %658 : vector<2x128xf32>
    %660 = arith.negf %659 : vector<2x128xf32>
    %661 = math.exp %660 : vector<2x128xf32>
    %cst_103 = arith.constant 1.000000e+00 : f32
    %662 = vector.broadcast %cst_103 : f32 to vector<2x128xf32>
    %663 = arith.addf %662, %661 : vector<2x128xf32>
    %664 = arith.divf %662, %663 : vector<2x128xf32>
    %665 = math.tanh %659 : vector<2x128xf32>
    %666 = vector.extract_strided_slice %664 {offsets = [0, 0], sizes = [2, 32], strides = [1, 1]} : vector<2x128xf32> to vector<2x32xf32>
    %667 = vector.extract_strided_slice %664 {offsets = [0, 32], sizes = [2, 32], strides = [1, 1]} : vector<2x128xf32> to vector<2x32xf32>
    %668 = vector.extract_strided_slice %665 {offsets = [0, 64], sizes = [2, 32], strides = [1, 1]} : vector<2x128xf32> to vector<2x32xf32>
    %669 = vector.extract_strided_slice %664 {offsets = [0, 96], sizes = [2, 32], strides = [1, 1]} : vector<2x128xf32> to vector<2x32xf32>
    %670 = arith.mulf %667, %653 : vector<2x32xf32>
    %671 = arith.mulf %666, %668 : vector<2x32xf32>
    %672 = arith.addf %670, %671 : vector<2x32xf32>
    %673 = math.tanh %672 : vector<2x32xf32>
    %674 = arith.mulf %669, %673 : vector<2x32xf32>
    %675 = tpu.concatenate %389, %408, %427, %446, %465, %484, %503, %522, %541, %560, %579, %598, %617, %636, %655, %674 in 0 : vector<2x32xf32>, vector<2x32xf32>, vector<2x32xf32>, vector<2x32xf32>, vector<2x32xf32>, vector<2x32xf32>, vector<2x32xf32>, vector<2x32xf32>, vector<2x32xf32>, vector<2x32xf32>, vector<2x32xf32>, vector<2x32xf32>, vector<2x32xf32>, vector<2x32xf32>, vector<2x32xf32>, vector<2x32xf32> -> vector<32x32xf32>
    %676 = arith.truncf %675 : vector<32x32xf32> to vector<32x32xbf16>
    %c0_104 = arith.constant 0 : index
    %c0_105 = arith.constant 0 : index
    %677 = vector.load %arg14[%c0_104, %c0_105] : memref<32x128xbf16, #tpu.memory_space<vmem>>, vector<32x128xbf16>
    %cst_106 = arith.constant dense<0.000000e+00> : vector<32x128xf32>
    %678 = tpu.matmul %676, %677, %cst_106 {dimension_numbers = #tpu.dot_dimension_numbers<[1], [0], [0], [1], [0, 0, 1, 1], [], []>} : vector<32x32xbf16>, vector<32x128xbf16>, vector<32x128xf32> -> vector<32x128xf32>
    %c0_107 = arith.constant 0 : index
    %c0_108 = arith.constant 0 : index
    %679 = vector.load %arg16[%c0_107, %c0_108] : memref<1x128xf32, #tpu.memory_space<vmem>>, vector<1x128xf32>
    %680 = vector.broadcast %679 : vector<1x128xf32> to vector<32x128xf32>
    %681 = arith.addf %678, %680 : vector<32x128xf32>
    %c0_109 = arith.constant 0 : index
    %c0_110 = arith.constant 0 : index
    %682 = vector.load %arg15[%c0_109, %c0_110] : memref<32x128xbf16, #tpu.memory_space<vmem>>, vector<32x128xbf16>
    %cst_111 = arith.constant 0.000000e+00 : f32
    %683 = vector.broadcast %cst_111 : f32 to vector<2x32xf32>
    %cst_112 = arith.constant 0.000000e+00 : f32
    %684 = vector.broadcast %cst_112 : f32 to vector<2x32xf32>
    %685 = vector.extract_strided_slice %681 {offsets = [0, 0], sizes = [2, 128], strides = [1, 1]} : vector<32x128xf32> to vector<2x128xf32>
    %686 = arith.truncf %683 : vector<2x32xf32> to vector<2x32xbf16>
    %cst_113 = arith.constant dense<0.000000e+00> : vector<2x128xf32>
    %687 = tpu.matmul %686, %682, %cst_113 {dimension_numbers = #tpu.dot_dimension_numbers<[1], [0], [0], [1], [0, 0, 1, 1], [], []>} : vector<2x32xbf16>, vector<32x128xbf16>, vector<2x128xf32> -> vector<2x128xf32>
    %688 = arith.addf %685, %687 : vector<2x128xf32>
    %689 = arith.negf %688 : vector<2x128xf32>
    %690 = math.exp %689 : vector<2x128xf32>
    %cst_114 = arith.constant 1.000000e+00 : f32
    %691 = vector.broadcast %cst_114 : f32 to vector<2x128xf32>
    %692 = arith.addf %691, %690 : vector<2x128xf32>
    %693 = arith.divf %691, %692 : vector<2x128xf32>
    %694 = math.tanh %688 : vector<2x128xf32>
    %695 = vector.extract_strided_slice %693 {offsets = [0, 0], sizes = [2, 32], strides = [1, 1]} : vector<2x128xf32> to vector<2x32xf32>
    %696 = vector.extract_strided_slice %693 {offsets = [0, 32], sizes = [2, 32], strides = [1, 1]} : vector<2x128xf32> to vector<2x32xf32>
    %697 = vector.extract_strided_slice %694 {offsets = [0, 64], sizes = [2, 32], strides = [1, 1]} : vector<2x128xf32> to vector<2x32xf32>
    %698 = vector.extract_strided_slice %693 {offsets = [0, 96], sizes = [2, 32], strides = [1, 1]} : vector<2x128xf32> to vector<2x32xf32>
    %699 = arith.mulf %696, %684 : vector<2x32xf32>
    %700 = arith.mulf %695, %697 : vector<2x32xf32>
    %701 = arith.addf %699, %700 : vector<2x32xf32>
    %702 = math.tanh %701 : vector<2x32xf32>
    %703 = arith.mulf %698, %702 : vector<2x32xf32>
    %704 = vector.extract_strided_slice %681 {offsets = [2, 0], sizes = [2, 128], strides = [1, 1]} : vector<32x128xf32> to vector<2x128xf32>
    %705 = arith.truncf %703 : vector<2x32xf32> to vector<2x32xbf16>
    %cst_115 = arith.constant dense<0.000000e+00> : vector<2x128xf32>
    %706 = tpu.matmul %705, %682, %cst_115 {dimension_numbers = #tpu.dot_dimension_numbers<[1], [0], [0], [1], [0, 0, 1, 1], [], []>} : vector<2x32xbf16>, vector<32x128xbf16>, vector<2x128xf32> -> vector<2x128xf32>
    %707 = arith.addf %704, %706 : vector<2x128xf32>
    %708 = arith.negf %707 : vector<2x128xf32>
    %709 = math.exp %708 : vector<2x128xf32>
    %cst_116 = arith.constant 1.000000e+00 : f32
    %710 = vector.broadcast %cst_116 : f32 to vector<2x128xf32>
    %711 = arith.addf %710, %709 : vector<2x128xf32>
    %712 = arith.divf %710, %711 : vector<2x128xf32>
    %713 = math.tanh %707 : vector<2x128xf32>
    %714 = vector.extract_strided_slice %712 {offsets = [0, 0], sizes = [2, 32], strides = [1, 1]} : vector<2x128xf32> to vector<2x32xf32>
    %715 = vector.extract_strided_slice %712 {offsets = [0, 32], sizes = [2, 32], strides = [1, 1]} : vector<2x128xf32> to vector<2x32xf32>
    %716 = vector.extract_strided_slice %713 {offsets = [0, 64], sizes = [2, 32], strides = [1, 1]} : vector<2x128xf32> to vector<2x32xf32>
    %717 = vector.extract_strided_slice %712 {offsets = [0, 96], sizes = [2, 32], strides = [1, 1]} : vector<2x128xf32> to vector<2x32xf32>
    %718 = arith.mulf %715, %701 : vector<2x32xf32>
    %719 = arith.mulf %714, %716 : vector<2x32xf32>
    %720 = arith.addf %718, %719 : vector<2x32xf32>
    %721 = math.tanh %720 : vector<2x32xf32>
    %722 = arith.mulf %717, %721 : vector<2x32xf32>
    %723 = vector.extract_strided_slice %681 {offsets = [4, 0], sizes = [2, 128], strides = [1, 1]} : vector<32x128xf32> to vector<2x128xf32>
    %724 = arith.truncf %722 : vector<2x32xf32> to vector<2x32xbf16>
    %cst_117 = arith.constant dense<0.000000e+00> : vector<2x128xf32>
    %725 = tpu.matmul %724, %682, %cst_117 {dimension_numbers = #tpu.dot_dimension_numbers<[1], [0], [0], [1], [0, 0, 1, 1], [], []>} : vector<2x32xbf16>, vector<32x128xbf16>, vector<2x128xf32> -> vector<2x128xf32>
    %726 = arith.addf %723, %725 : vector<2x128xf32>
    %727 = arith.negf %726 : vector<2x128xf32>
    %728 = math.exp %727 : vector<2x128xf32>
    %cst_118 = arith.constant 1.000000e+00 : f32
    %729 = vector.broadcast %cst_118 : f32 to vector<2x128xf32>
    %730 = arith.addf %729, %728 : vector<2x128xf32>
    %731 = arith.divf %729, %730 : vector<2x128xf32>
    %732 = math.tanh %726 : vector<2x128xf32>
    %733 = vector.extract_strided_slice %731 {offsets = [0, 0], sizes = [2, 32], strides = [1, 1]} : vector<2x128xf32> to vector<2x32xf32>
    %734 = vector.extract_strided_slice %731 {offsets = [0, 32], sizes = [2, 32], strides = [1, 1]} : vector<2x128xf32> to vector<2x32xf32>
    %735 = vector.extract_strided_slice %732 {offsets = [0, 64], sizes = [2, 32], strides = [1, 1]} : vector<2x128xf32> to vector<2x32xf32>
    %736 = vector.extract_strided_slice %731 {offsets = [0, 96], sizes = [2, 32], strides = [1, 1]} : vector<2x128xf32> to vector<2x32xf32>
    %737 = arith.mulf %734, %720 : vector<2x32xf32>
    %738 = arith.mulf %733, %735 : vector<2x32xf32>
    %739 = arith.addf %737, %738 : vector<2x32xf32>
    %740 = math.tanh %739 : vector<2x32xf32>
    %741 = arith.mulf %736, %740 : vector<2x32xf32>
    %742 = vector.extract_strided_slice %681 {offsets = [6, 0], sizes = [2, 128], strides = [1, 1]} : vector<32x128xf32> to vector<2x128xf32>
    %743 = arith.truncf %741 : vector<2x32xf32> to vector<2x32xbf16>
    %cst_119 = arith.constant dense<0.000000e+00> : vector<2x128xf32>
    %744 = tpu.matmul %743, %682, %cst_119 {dimension_numbers = #tpu.dot_dimension_numbers<[1], [0], [0], [1], [0, 0, 1, 1], [], []>} : vector<2x32xbf16>, vector<32x128xbf16>, vector<2x128xf32> -> vector<2x128xf32>
    %745 = arith.addf %742, %744 : vector<2x128xf32>
    %746 = arith.negf %745 : vector<2x128xf32>
    %747 = math.exp %746 : vector<2x128xf32>
    %cst_120 = arith.constant 1.000000e+00 : f32
    %748 = vector.broadcast %cst_120 : f32 to vector<2x128xf32>
    %749 = arith.addf %748, %747 : vector<2x128xf32>
    %750 = arith.divf %748, %749 : vector<2x128xf32>
    %751 = math.tanh %745 : vector<2x128xf32>
    %752 = vector.extract_strided_slice %750 {offsets = [0, 0], sizes = [2, 32], strides = [1, 1]} : vector<2x128xf32> to vector<2x32xf32>
    %753 = vector.extract_strided_slice %750 {offsets = [0, 32], sizes = [2, 32], strides = [1, 1]} : vector<2x128xf32> to vector<2x32xf32>
    %754 = vector.extract_strided_slice %751 {offsets = [0, 64], sizes = [2, 32], strides = [1, 1]} : vector<2x128xf32> to vector<2x32xf32>
    %755 = vector.extract_strided_slice %750 {offsets = [0, 96], sizes = [2, 32], strides = [1, 1]} : vector<2x128xf32> to vector<2x32xf32>
    %756 = arith.mulf %753, %739 : vector<2x32xf32>
    %757 = arith.mulf %752, %754 : vector<2x32xf32>
    %758 = arith.addf %756, %757 : vector<2x32xf32>
    %759 = math.tanh %758 : vector<2x32xf32>
    %760 = arith.mulf %755, %759 : vector<2x32xf32>
    %761 = vector.extract_strided_slice %681 {offsets = [8, 0], sizes = [2, 128], strides = [1, 1]} : vector<32x128xf32> to vector<2x128xf32>
    %762 = arith.truncf %760 : vector<2x32xf32> to vector<2x32xbf16>
    %cst_121 = arith.constant dense<0.000000e+00> : vector<2x128xf32>
    %763 = tpu.matmul %762, %682, %cst_121 {dimension_numbers = #tpu.dot_dimension_numbers<[1], [0], [0], [1], [0, 0, 1, 1], [], []>} : vector<2x32xbf16>, vector<32x128xbf16>, vector<2x128xf32> -> vector<2x128xf32>
    %764 = arith.addf %761, %763 : vector<2x128xf32>
    %765 = arith.negf %764 : vector<2x128xf32>
    %766 = math.exp %765 : vector<2x128xf32>
    %cst_122 = arith.constant 1.000000e+00 : f32
    %767 = vector.broadcast %cst_122 : f32 to vector<2x128xf32>
    %768 = arith.addf %767, %766 : vector<2x128xf32>
    %769 = arith.divf %767, %768 : vector<2x128xf32>
    %770 = math.tanh %764 : vector<2x128xf32>
    %771 = vector.extract_strided_slice %769 {offsets = [0, 0], sizes = [2, 32], strides = [1, 1]} : vector<2x128xf32> to vector<2x32xf32>
    %772 = vector.extract_strided_slice %769 {offsets = [0, 32], sizes = [2, 32], strides = [1, 1]} : vector<2x128xf32> to vector<2x32xf32>
    %773 = vector.extract_strided_slice %770 {offsets = [0, 64], sizes = [2, 32], strides = [1, 1]} : vector<2x128xf32> to vector<2x32xf32>
    %774 = vector.extract_strided_slice %769 {offsets = [0, 96], sizes = [2, 32], strides = [1, 1]} : vector<2x128xf32> to vector<2x32xf32>
    %775 = arith.mulf %772, %758 : vector<2x32xf32>
    %776 = arith.mulf %771, %773 : vector<2x32xf32>
    %777 = arith.addf %775, %776 : vector<2x32xf32>
    %778 = math.tanh %777 : vector<2x32xf32>
    %779 = arith.mulf %774, %778 : vector<2x32xf32>
    %780 = vector.extract_strided_slice %681 {offsets = [10, 0], sizes = [2, 128], strides = [1, 1]} : vector<32x128xf32> to vector<2x128xf32>
    %781 = arith.truncf %779 : vector<2x32xf32> to vector<2x32xbf16>
    %cst_123 = arith.constant dense<0.000000e+00> : vector<2x128xf32>
    %782 = tpu.matmul %781, %682, %cst_123 {dimension_numbers = #tpu.dot_dimension_numbers<[1], [0], [0], [1], [0, 0, 1, 1], [], []>} : vector<2x32xbf16>, vector<32x128xbf16>, vector<2x128xf32> -> vector<2x128xf32>
    %783 = arith.addf %780, %782 : vector<2x128xf32>
    %784 = arith.negf %783 : vector<2x128xf32>
    %785 = math.exp %784 : vector<2x128xf32>
    %cst_124 = arith.constant 1.000000e+00 : f32
    %786 = vector.broadcast %cst_124 : f32 to vector<2x128xf32>
    %787 = arith.addf %786, %785 : vector<2x128xf32>
    %788 = arith.divf %786, %787 : vector<2x128xf32>
    %789 = math.tanh %783 : vector<2x128xf32>
    %790 = vector.extract_strided_slice %788 {offsets = [0, 0], sizes = [2, 32], strides = [1, 1]} : vector<2x128xf32> to vector<2x32xf32>
    %791 = vector.extract_strided_slice %788 {offsets = [0, 32], sizes = [2, 32], strides = [1, 1]} : vector<2x128xf32> to vector<2x32xf32>
    %792 = vector.extract_strided_slice %789 {offsets = [0, 64], sizes = [2, 32], strides = [1, 1]} : vector<2x128xf32> to vector<2x32xf32>
    %793 = vector.extract_strided_slice %788 {offsets = [0, 96], sizes = [2, 32], strides = [1, 1]} : vector<2x128xf32> to vector<2x32xf32>
    %794 = arith.mulf %791, %777 : vector<2x32xf32>
    %795 = arith.mulf %790, %792 : vector<2x32xf32>
    %796 = arith.addf %794, %795 : vector<2x32xf32>
    %797 = math.tanh %796 : vector<2x32xf32>
    %798 = arith.mulf %793, %797 : vector<2x32xf32>
    %799 = vector.extract_strided_slice %681 {offsets = [12, 0], sizes = [2, 128], strides = [1, 1]} : vector<32x128xf32> to vector<2x128xf32>
    %800 = arith.truncf %798 : vector<2x32xf32> to vector<2x32xbf16>
    %cst_125 = arith.constant dense<0.000000e+00> : vector<2x128xf32>
    %801 = tpu.matmul %800, %682, %cst_125 {dimension_numbers = #tpu.dot_dimension_numbers<[1], [0], [0], [1], [0, 0, 1, 1], [], []>} : vector<2x32xbf16>, vector<32x128xbf16>, vector<2x128xf32> -> vector<2x128xf32>
    %802 = arith.addf %799, %801 : vector<2x128xf32>
    %803 = arith.negf %802 : vector<2x128xf32>
    %804 = math.exp %803 : vector<2x128xf32>
    %cst_126 = arith.constant 1.000000e+00 : f32
    %805 = vector.broadcast %cst_126 : f32 to vector<2x128xf32>
    %806 = arith.addf %805, %804 : vector<2x128xf32>
    %807 = arith.divf %805, %806 : vector<2x128xf32>
    %808 = math.tanh %802 : vector<2x128xf32>
    %809 = vector.extract_strided_slice %807 {offsets = [0, 0], sizes = [2, 32], strides = [1, 1]} : vector<2x128xf32> to vector<2x32xf32>
    %810 = vector.extract_strided_slice %807 {offsets = [0, 32], sizes = [2, 32], strides = [1, 1]} : vector<2x128xf32> to vector<2x32xf32>
    %811 = vector.extract_strided_slice %808 {offsets = [0, 64], sizes = [2, 32], strides = [1, 1]} : vector<2x128xf32> to vector<2x32xf32>
    %812 = vector.extract_strided_slice %807 {offsets = [0, 96], sizes = [2, 32], strides = [1, 1]} : vector<2x128xf32> to vector<2x32xf32>
    %813 = arith.mulf %810, %796 : vector<2x32xf32>
    %814 = arith.mulf %809, %811 : vector<2x32xf32>
    %815 = arith.addf %813, %814 : vector<2x32xf32>
    %816 = math.tanh %815 : vector<2x32xf32>
    %817 = arith.mulf %812, %816 : vector<2x32xf32>
    %818 = vector.extract_strided_slice %681 {offsets = [14, 0], sizes = [2, 128], strides = [1, 1]} : vector<32x128xf32> to vector<2x128xf32>
    %819 = arith.truncf %817 : vector<2x32xf32> to vector<2x32xbf16>
    %cst_127 = arith.constant dense<0.000000e+00> : vector<2x128xf32>
    %820 = tpu.matmul %819, %682, %cst_127 {dimension_numbers = #tpu.dot_dimension_numbers<[1], [0], [0], [1], [0, 0, 1, 1], [], []>} : vector<2x32xbf16>, vector<32x128xbf16>, vector<2x128xf32> -> vector<2x128xf32>
    %821 = arith.addf %818, %820 : vector<2x128xf32>
    %822 = arith.negf %821 : vector<2x128xf32>
    %823 = math.exp %822 : vector<2x128xf32>
    %cst_128 = arith.constant 1.000000e+00 : f32
    %824 = vector.broadcast %cst_128 : f32 to vector<2x128xf32>
    %825 = arith.addf %824, %823 : vector<2x128xf32>
    %826 = arith.divf %824, %825 : vector<2x128xf32>
    %827 = math.tanh %821 : vector<2x128xf32>
    %828 = vector.extract_strided_slice %826 {offsets = [0, 0], sizes = [2, 32], strides = [1, 1]} : vector<2x128xf32> to vector<2x32xf32>
    %829 = vector.extract_strided_slice %826 {offsets = [0, 32], sizes = [2, 32], strides = [1, 1]} : vector<2x128xf32> to vector<2x32xf32>
    %830 = vector.extract_strided_slice %827 {offsets = [0, 64], sizes = [2, 32], strides = [1, 1]} : vector<2x128xf32> to vector<2x32xf32>
    %831 = vector.extract_strided_slice %826 {offsets = [0, 96], sizes = [2, 32], strides = [1, 1]} : vector<2x128xf32> to vector<2x32xf32>
    %832 = arith.mulf %829, %815 : vector<2x32xf32>
    %833 = arith.mulf %828, %830 : vector<2x32xf32>
    %834 = arith.addf %832, %833 : vector<2x32xf32>
    %835 = math.tanh %834 : vector<2x32xf32>
    %836 = arith.mulf %831, %835 : vector<2x32xf32>
    %837 = vector.extract_strided_slice %681 {offsets = [16, 0], sizes = [2, 128], strides = [1, 1]} : vector<32x128xf32> to vector<2x128xf32>
    %838 = arith.truncf %836 : vector<2x32xf32> to vector<2x32xbf16>
    %cst_129 = arith.constant dense<0.000000e+00> : vector<2x128xf32>
    %839 = tpu.matmul %838, %682, %cst_129 {dimension_numbers = #tpu.dot_dimension_numbers<[1], [0], [0], [1], [0, 0, 1, 1], [], []>} : vector<2x32xbf16>, vector<32x128xbf16>, vector<2x128xf32> -> vector<2x128xf32>
    %840 = arith.addf %837, %839 : vector<2x128xf32>
    %841 = arith.negf %840 : vector<2x128xf32>
    %842 = math.exp %841 : vector<2x128xf32>
    %cst_130 = arith.constant 1.000000e+00 : f32
    %843 = vector.broadcast %cst_130 : f32 to vector<2x128xf32>
    %844 = arith.addf %843, %842 : vector<2x128xf32>
    %845 = arith.divf %843, %844 : vector<2x128xf32>
    %846 = math.tanh %840 : vector<2x128xf32>
    %847 = vector.extract_strided_slice %845 {offsets = [0, 0], sizes = [2, 32], strides = [1, 1]} : vector<2x128xf32> to vector<2x32xf32>
    %848 = vector.extract_strided_slice %845 {offsets = [0, 32], sizes = [2, 32], strides = [1, 1]} : vector<2x128xf32> to vector<2x32xf32>
    %849 = vector.extract_strided_slice %846 {offsets = [0, 64], sizes = [2, 32], strides = [1, 1]} : vector<2x128xf32> to vector<2x32xf32>
    %850 = vector.extract_strided_slice %845 {offsets = [0, 96], sizes = [2, 32], strides = [1, 1]} : vector<2x128xf32> to vector<2x32xf32>
    %851 = arith.mulf %848, %834 : vector<2x32xf32>
    %852 = arith.mulf %847, %849 : vector<2x32xf32>
    %853 = arith.addf %851, %852 : vector<2x32xf32>
    %854 = math.tanh %853 : vector<2x32xf32>
    %855 = arith.mulf %850, %854 : vector<2x32xf32>
    %856 = vector.extract_strided_slice %681 {offsets = [18, 0], sizes = [2, 128], strides = [1, 1]} : vector<32x128xf32> to vector<2x128xf32>
    %857 = arith.truncf %855 : vector<2x32xf32> to vector<2x32xbf16>
    %cst_131 = arith.constant dense<0.000000e+00> : vector<2x128xf32>
    %858 = tpu.matmul %857, %682, %cst_131 {dimension_numbers = #tpu.dot_dimension_numbers<[1], [0], [0], [1], [0, 0, 1, 1], [], []>} : vector<2x32xbf16>, vector<32x128xbf16>, vector<2x128xf32> -> vector<2x128xf32>
    %859 = arith.addf %856, %858 : vector<2x128xf32>
    %860 = arith.negf %859 : vector<2x128xf32>
    %861 = math.exp %860 : vector<2x128xf32>
    %cst_132 = arith.constant 1.000000e+00 : f32
    %862 = vector.broadcast %cst_132 : f32 to vector<2x128xf32>
    %863 = arith.addf %862, %861 : vector<2x128xf32>
    %864 = arith.divf %862, %863 : vector<2x128xf32>
    %865 = math.tanh %859 : vector<2x128xf32>
    %866 = vector.extract_strided_slice %864 {offsets = [0, 0], sizes = [2, 32], strides = [1, 1]} : vector<2x128xf32> to vector<2x32xf32>
    %867 = vector.extract_strided_slice %864 {offsets = [0, 32], sizes = [2, 32], strides = [1, 1]} : vector<2x128xf32> to vector<2x32xf32>
    %868 = vector.extract_strided_slice %865 {offsets = [0, 64], sizes = [2, 32], strides = [1, 1]} : vector<2x128xf32> to vector<2x32xf32>
    %869 = vector.extract_strided_slice %864 {offsets = [0, 96], sizes = [2, 32], strides = [1, 1]} : vector<2x128xf32> to vector<2x32xf32>
    %870 = arith.mulf %867, %853 : vector<2x32xf32>
    %871 = arith.mulf %866, %868 : vector<2x32xf32>
    %872 = arith.addf %870, %871 : vector<2x32xf32>
    %873 = math.tanh %872 : vector<2x32xf32>
    %874 = arith.mulf %869, %873 : vector<2x32xf32>
    %875 = vector.extract_strided_slice %681 {offsets = [20, 0], sizes = [2, 128], strides = [1, 1]} : vector<32x128xf32> to vector<2x128xf32>
    %876 = arith.truncf %874 : vector<2x32xf32> to vector<2x32xbf16>
    %cst_133 = arith.constant dense<0.000000e+00> : vector<2x128xf32>
    %877 = tpu.matmul %876, %682, %cst_133 {dimension_numbers = #tpu.dot_dimension_numbers<[1], [0], [0], [1], [0, 0, 1, 1], [], []>} : vector<2x32xbf16>, vector<32x128xbf16>, vector<2x128xf32> -> vector<2x128xf32>
    %878 = arith.addf %875, %877 : vector<2x128xf32>
    %879 = arith.negf %878 : vector<2x128xf32>
    %880 = math.exp %879 : vector<2x128xf32>
    %cst_134 = arith.constant 1.000000e+00 : f32
    %881 = vector.broadcast %cst_134 : f32 to vector<2x128xf32>
    %882 = arith.addf %881, %880 : vector<2x128xf32>
    %883 = arith.divf %881, %882 : vector<2x128xf32>
    %884 = math.tanh %878 : vector<2x128xf32>
    %885 = vector.extract_strided_slice %883 {offsets = [0, 0], sizes = [2, 32], strides = [1, 1]} : vector<2x128xf32> to vector<2x32xf32>
    %886 = vector.extract_strided_slice %883 {offsets = [0, 32], sizes = [2, 32], strides = [1, 1]} : vector<2x128xf32> to vector<2x32xf32>
    %887 = vector.extract_strided_slice %884 {offsets = [0, 64], sizes = [2, 32], strides = [1, 1]} : vector<2x128xf32> to vector<2x32xf32>
    %888 = vector.extract_strided_slice %883 {offsets = [0, 96], sizes = [2, 32], strides = [1, 1]} : vector<2x128xf32> to vector<2x32xf32>
    %889 = arith.mulf %886, %872 : vector<2x32xf32>
    %890 = arith.mulf %885, %887 : vector<2x32xf32>
    %891 = arith.addf %889, %890 : vector<2x32xf32>
    %892 = math.tanh %891 : vector<2x32xf32>
    %893 = arith.mulf %888, %892 : vector<2x32xf32>
    %894 = vector.extract_strided_slice %681 {offsets = [22, 0], sizes = [2, 128], strides = [1, 1]} : vector<32x128xf32> to vector<2x128xf32>
    %895 = arith.truncf %893 : vector<2x32xf32> to vector<2x32xbf16>
    %cst_135 = arith.constant dense<0.000000e+00> : vector<2x128xf32>
    %896 = tpu.matmul %895, %682, %cst_135 {dimension_numbers = #tpu.dot_dimension_numbers<[1], [0], [0], [1], [0, 0, 1, 1], [], []>} : vector<2x32xbf16>, vector<32x128xbf16>, vector<2x128xf32> -> vector<2x128xf32>
    %897 = arith.addf %894, %896 : vector<2x128xf32>
    %898 = arith.negf %897 : vector<2x128xf32>
    %899 = math.exp %898 : vector<2x128xf32>
    %cst_136 = arith.constant 1.000000e+00 : f32
    %900 = vector.broadcast %cst_136 : f32 to vector<2x128xf32>
    %901 = arith.addf %900, %899 : vector<2x128xf32>
    %902 = arith.divf %900, %901 : vector<2x128xf32>
    %903 = math.tanh %897 : vector<2x128xf32>
    %904 = vector.extract_strided_slice %902 {offsets = [0, 0], sizes = [2, 32], strides = [1, 1]} : vector<2x128xf32> to vector<2x32xf32>
    %905 = vector.extract_strided_slice %902 {offsets = [0, 32], sizes = [2, 32], strides = [1, 1]} : vector<2x128xf32> to vector<2x32xf32>
    %906 = vector.extract_strided_slice %903 {offsets = [0, 64], sizes = [2, 32], strides = [1, 1]} : vector<2x128xf32> to vector<2x32xf32>
    %907 = vector.extract_strided_slice %902 {offsets = [0, 96], sizes = [2, 32], strides = [1, 1]} : vector<2x128xf32> to vector<2x32xf32>
    %908 = arith.mulf %905, %891 : vector<2x32xf32>
    %909 = arith.mulf %904, %906 : vector<2x32xf32>
    %910 = arith.addf %908, %909 : vector<2x32xf32>
    %911 = math.tanh %910 : vector<2x32xf32>
    %912 = arith.mulf %907, %911 : vector<2x32xf32>
    %913 = vector.extract_strided_slice %681 {offsets = [24, 0], sizes = [2, 128], strides = [1, 1]} : vector<32x128xf32> to vector<2x128xf32>
    %914 = arith.truncf %912 : vector<2x32xf32> to vector<2x32xbf16>
    %cst_137 = arith.constant dense<0.000000e+00> : vector<2x128xf32>
    %915 = tpu.matmul %914, %682, %cst_137 {dimension_numbers = #tpu.dot_dimension_numbers<[1], [0], [0], [1], [0, 0, 1, 1], [], []>} : vector<2x32xbf16>, vector<32x128xbf16>, vector<2x128xf32> -> vector<2x128xf32>
    %916 = arith.addf %913, %915 : vector<2x128xf32>
    %917 = arith.negf %916 : vector<2x128xf32>
    %918 = math.exp %917 : vector<2x128xf32>
    %cst_138 = arith.constant 1.000000e+00 : f32
    %919 = vector.broadcast %cst_138 : f32 to vector<2x128xf32>
    %920 = arith.addf %919, %918 : vector<2x128xf32>
    %921 = arith.divf %919, %920 : vector<2x128xf32>
    %922 = math.tanh %916 : vector<2x128xf32>
    %923 = vector.extract_strided_slice %921 {offsets = [0, 0], sizes = [2, 32], strides = [1, 1]} : vector<2x128xf32> to vector<2x32xf32>
    %924 = vector.extract_strided_slice %921 {offsets = [0, 32], sizes = [2, 32], strides = [1, 1]} : vector<2x128xf32> to vector<2x32xf32>
    %925 = vector.extract_strided_slice %922 {offsets = [0, 64], sizes = [2, 32], strides = [1, 1]} : vector<2x128xf32> to vector<2x32xf32>
    %926 = vector.extract_strided_slice %921 {offsets = [0, 96], sizes = [2, 32], strides = [1, 1]} : vector<2x128xf32> to vector<2x32xf32>
    %927 = arith.mulf %924, %910 : vector<2x32xf32>
    %928 = arith.mulf %923, %925 : vector<2x32xf32>
    %929 = arith.addf %927, %928 : vector<2x32xf32>
    %930 = math.tanh %929 : vector<2x32xf32>
    %931 = arith.mulf %926, %930 : vector<2x32xf32>
    %932 = vector.extract_strided_slice %681 {offsets = [26, 0], sizes = [2, 128], strides = [1, 1]} : vector<32x128xf32> to vector<2x128xf32>
    %933 = arith.truncf %931 : vector<2x32xf32> to vector<2x32xbf16>
    %cst_139 = arith.constant dense<0.000000e+00> : vector<2x128xf32>
    %934 = tpu.matmul %933, %682, %cst_139 {dimension_numbers = #tpu.dot_dimension_numbers<[1], [0], [0], [1], [0, 0, 1, 1], [], []>} : vector<2x32xbf16>, vector<32x128xbf16>, vector<2x128xf32> -> vector<2x128xf32>
    %935 = arith.addf %932, %934 : vector<2x128xf32>
    %936 = arith.negf %935 : vector<2x128xf32>
    %937 = math.exp %936 : vector<2x128xf32>
    %cst_140 = arith.constant 1.000000e+00 : f32
    %938 = vector.broadcast %cst_140 : f32 to vector<2x128xf32>
    %939 = arith.addf %938, %937 : vector<2x128xf32>
    %940 = arith.divf %938, %939 : vector<2x128xf32>
    %941 = math.tanh %935 : vector<2x128xf32>
    %942 = vector.extract_strided_slice %940 {offsets = [0, 0], sizes = [2, 32], strides = [1, 1]} : vector<2x128xf32> to vector<2x32xf32>
    %943 = vector.extract_strided_slice %940 {offsets = [0, 32], sizes = [2, 32], strides = [1, 1]} : vector<2x128xf32> to vector<2x32xf32>
    %944 = vector.extract_strided_slice %941 {offsets = [0, 64], sizes = [2, 32], strides = [1, 1]} : vector<2x128xf32> to vector<2x32xf32>
    %945 = vector.extract_strided_slice %940 {offsets = [0, 96], sizes = [2, 32], strides = [1, 1]} : vector<2x128xf32> to vector<2x32xf32>
    %946 = arith.mulf %943, %929 : vector<2x32xf32>
    %947 = arith.mulf %942, %944 : vector<2x32xf32>
    %948 = arith.addf %946, %947 : vector<2x32xf32>
    %949 = math.tanh %948 : vector<2x32xf32>
    %950 = arith.mulf %945, %949 : vector<2x32xf32>
    %951 = vector.extract_strided_slice %681 {offsets = [28, 0], sizes = [2, 128], strides = [1, 1]} : vector<32x128xf32> to vector<2x128xf32>
    %952 = arith.truncf %950 : vector<2x32xf32> to vector<2x32xbf16>
    %cst_141 = arith.constant dense<0.000000e+00> : vector<2x128xf32>
    %953 = tpu.matmul %952, %682, %cst_141 {dimension_numbers = #tpu.dot_dimension_numbers<[1], [0], [0], [1], [0, 0, 1, 1], [], []>} : vector<2x32xbf16>, vector<32x128xbf16>, vector<2x128xf32> -> vector<2x128xf32>
    %954 = arith.addf %951, %953 : vector<2x128xf32>
    %955 = arith.negf %954 : vector<2x128xf32>
    %956 = math.exp %955 : vector<2x128xf32>
    %cst_142 = arith.constant 1.000000e+00 : f32
    %957 = vector.broadcast %cst_142 : f32 to vector<2x128xf32>
    %958 = arith.addf %957, %956 : vector<2x128xf32>
    %959 = arith.divf %957, %958 : vector<2x128xf32>
    %960 = math.tanh %954 : vector<2x128xf32>
    %961 = vector.extract_strided_slice %959 {offsets = [0, 0], sizes = [2, 32], strides = [1, 1]} : vector<2x128xf32> to vector<2x32xf32>
    %962 = vector.extract_strided_slice %959 {offsets = [0, 32], sizes = [2, 32], strides = [1, 1]} : vector<2x128xf32> to vector<2x32xf32>
    %963 = vector.extract_strided_slice %960 {offsets = [0, 64], sizes = [2, 32], strides = [1, 1]} : vector<2x128xf32> to vector<2x32xf32>
    %964 = vector.extract_strided_slice %959 {offsets = [0, 96], sizes = [2, 32], strides = [1, 1]} : vector<2x128xf32> to vector<2x32xf32>
    %965 = arith.mulf %962, %948 : vector<2x32xf32>
    %966 = arith.mulf %961, %963 : vector<2x32xf32>
    %967 = arith.addf %965, %966 : vector<2x32xf32>
    %968 = math.tanh %967 : vector<2x32xf32>
    %969 = arith.mulf %964, %968 : vector<2x32xf32>
    %970 = vector.extract_strided_slice %681 {offsets = [30, 0], sizes = [2, 128], strides = [1, 1]} : vector<32x128xf32> to vector<2x128xf32>
    %971 = arith.truncf %969 : vector<2x32xf32> to vector<2x32xbf16>
    %cst_143 = arith.constant dense<0.000000e+00> : vector<2x128xf32>
    %972 = tpu.matmul %971, %682, %cst_143 {dimension_numbers = #tpu.dot_dimension_numbers<[1], [0], [0], [1], [0, 0, 1, 1], [], []>} : vector<2x32xbf16>, vector<32x128xbf16>, vector<2x128xf32> -> vector<2x128xf32>
    %973 = arith.addf %970, %972 : vector<2x128xf32>
    %974 = arith.negf %973 : vector<2x128xf32>
    %975 = math.exp %974 : vector<2x128xf32>
    %cst_144 = arith.constant 1.000000e+00 : f32
    %976 = vector.broadcast %cst_144 : f32 to vector<2x128xf32>
    %977 = arith.addf %976, %975 : vector<2x128xf32>
    %978 = arith.divf %976, %977 : vector<2x128xf32>
    %979 = math.tanh %973 : vector<2x128xf32>
    %980 = vector.extract_strided_slice %978 {offsets = [0, 0], sizes = [2, 32], strides = [1, 1]} : vector<2x128xf32> to vector<2x32xf32>
    %981 = vector.extract_strided_slice %978 {offsets = [0, 32], sizes = [2, 32], strides = [1, 1]} : vector<2x128xf32> to vector<2x32xf32>
    %982 = vector.extract_strided_slice %979 {offsets = [0, 64], sizes = [2, 32], strides = [1, 1]} : vector<2x128xf32> to vector<2x32xf32>
    %983 = vector.extract_strided_slice %978 {offsets = [0, 96], sizes = [2, 32], strides = [1, 1]} : vector<2x128xf32> to vector<2x32xf32>
    %984 = arith.mulf %981, %967 : vector<2x32xf32>
    %985 = arith.mulf %980, %982 : vector<2x32xf32>
    %986 = arith.addf %984, %985 : vector<2x32xf32>
    %987 = math.tanh %986 : vector<2x32xf32>
    %988 = arith.mulf %983, %987 : vector<2x32xf32>
    %989 = tpu.concatenate %855, %874, %893, %912, %931, %950, %969, %988 in 0 : vector<2x32xf32>, vector<2x32xf32>, vector<2x32xf32>, vector<2x32xf32>, vector<2x32xf32>, vector<2x32xf32>, vector<2x32xf32>, vector<2x32xf32> -> vector<16x32xf32>
    %990 = arith.truncf %989 : vector<16x32xf32> to vector<16x32xbf16>
    %c0_145 = arith.constant 0 : index
    %c0_146 = arith.constant 0 : index
    %991 = vector.load %arg17[%c0_145, %c0_146] : memref<32x4xbf16, #tpu.memory_space<vmem>>, vector<32x4xbf16>
    %cst_147 = arith.constant dense<0.000000e+00> : vector<16x4xf32>
    %992 = tpu.matmul %990, %991, %cst_147 {dimension_numbers = #tpu.dot_dimension_numbers<[1], [0], [0], [1], [0, 0, 1, 1], [], []>} : vector<16x32xbf16>, vector<32x4xbf16>, vector<16x4xf32> -> vector<16x4xf32>
    %c0_148 = arith.constant 0 : index
    %c0_149 = arith.constant 0 : index
    %993 = vector.load %arg18[%c0_148, %c0_149] : memref<1x4xf32, #tpu.memory_space<vmem>>, vector<1x4xf32>
    %994 = vector.broadcast %993 : vector<1x4xf32> to vector<16x4xf32>
    %995 = arith.addf %992, %994 : vector<16x4xf32>
    %c0_150 = arith.constant 0 : index
    %c0_151 = arith.constant 0 : index
    %c0_152 = arith.constant 0 : index
    %996 = vector.load %arg19[%c0_150, %c0_151, %c0_152] : memref<1x16x4xf32, #tpu.memory_space<vmem>>, vector<1x16x4xf32>
    %997 = vector.shape_cast %996 : vector<1x16x4xf32> to vector<16x4xf32>
    %998 = vector.shape_cast %995 : vector<16x4xf32> to vector<1x16x4xf32>
    tpu.vector_store %arg19[%c0_150, %c0_151, %c0_152], %998 {strides = array<i32>} : memref<1x16x4xf32, #tpu.memory_space<vmem>>, vector<1x16x4xf32>,
    return
  }
  func.func @transform_0(%arg0: i32) -> (i32, i32, i32) {
    %c0_i32 = arith.constant 0 : i32
    %c0_i32_0 = arith.constant 0 : i32
    %c0_i32_1 = arith.constant 0 : i32
    return %arg0, %c0_i32, %c0_i32_0 : i32, i32, i32
  }
  func.func @transform_1(%arg0: i32) -> (i32, i32) {
    %c0_i32 = arith.constant 0 : i32
    %c0_i32_0 = arith.constant 0 : i32
    %c0_i32_1 = arith.constant 0 : i32
    return %c0_i32, %c0_i32_0 : i32, i32
  }
  func.func @transform_2(%arg0: i32) -> (i32, i32) {
    %c0_i32 = arith.constant 0 : i32
    %c0_i32_0 = arith.constant 0 : i32
    %c0_i32_1 = arith.constant 0 : i32
    return %c0_i32, %c0_i32_0 : i32, i32
  }
  func.func @transform_3(%arg0: i32) -> (i32, i32) {
    %c0_i32 = arith.constant 0 : i32
    %c0_i32_0 = arith.constant 0 : i32
    %c0_i32_1 = arith.constant 0 : i32
    return %c0_i32, %c0_i32_0 : i32, i32
  }
  func.func @transform_4(%arg0: i32) -> (i32, i32) {
    %c0_i32 = arith.constant 0 : i32
    %c0_i32_0 = arith.constant 0 : i32
    %c0_i32_1 = arith.constant 0 : i32
    return %c0_i32, %c0_i32_0 : i32, i32
  }
  func.func @transform_5(%arg0: i32) -> (i32, i32) {
    %c0_i32 = arith.constant 0 : i32
    %c0_i32_0 = arith.constant 0 : i32
    %c0_i32_1 = arith.constant 0 : i32
    return %c0_i32, %c0_i32_0 : i32, i32
  }
  func.func @transform_6(%arg0: i32) -> (i32, i32) {
    %c0_i32 = arith.constant 0 : i32
    %c0_i32_0 = arith.constant 0 : i32
    %c0_i32_1 = arith.constant 0 : i32
    return %c0_i32, %c0_i32_0 : i32, i32
  }
  func.func @transform_7(%arg0: i32) -> (i32, i32) {
    %c0_i32 = arith.constant 0 : i32
    %c0_i32_0 = arith.constant 0 : i32
    %c0_i32_1 = arith.constant 0 : i32
    return %c0_i32, %c0_i32_0 : i32, i32
  }
  func.func @transform_8(%arg0: i32) -> (i32, i32) {
    %c0_i32 = arith.constant 0 : i32
    %c0_i32_0 = arith.constant 0 : i32
    %c0_i32_1 = arith.constant 0 : i32
    return %c0_i32, %c0_i32_0 : i32, i32
  }
  func.func @transform_9(%arg0: i32) -> (i32, i32) {
    %c0_i32 = arith.constant 0 : i32
    %c0_i32_0 = arith.constant 0 : i32
    %c0_i32_1 = arith.constant 0 : i32
    return %c0_i32, %c0_i32_0 : i32, i32
  }
  func.func @transform_10(%arg0: i32) -> (i32, i32) {
    %c0_i32 = arith.constant 0 : i32
    %c0_i32_0 = arith.constant 0 : i32
    %c0_i32_1 = arith.constant 0 : i32
    return %c0_i32, %c0_i32_0 : i32, i32
  }
  func.func @transform_11(%arg0: i32) -> (i32, i32) {
    %c0_i32 = arith.constant 0 : i32
    %c0_i32_0 = arith.constant 0 : i32
    %c0_i32_1 = arith.constant 0 : i32
    return %c0_i32, %c0_i32_0 : i32, i32
  }
  func.func @transform_12(%arg0: i32) -> (i32, i32) {
    %c0_i32 = arith.constant 0 : i32
    %c0_i32_0 = arith.constant 0 : i32
    %c0_i32_1 = arith.constant 0 : i32
    return %c0_i32, %c0_i32_0 : i32, i32
  }
  func.func @transform_13(%arg0: i32) -> (i32, i32) {
    %c0_i32 = arith.constant 0 : i32
    %c0_i32_0 = arith.constant 0 : i32
    %c0_i32_1 = arith.constant 0 : i32
    return %c0_i32, %c0_i32_0 : i32, i32
  }
  func.func @transform_14(%arg0: i32) -> (i32, i32) {
    %c0_i32 = arith.constant 0 : i32
    %c0_i32_0 = arith.constant 0 : i32
    %c0_i32_1 = arith.constant 0 : i32
    return %c0_i32, %c0_i32_0 : i32, i32
  }
  func.func @transform_15(%arg0: i32) -> (i32, i32) {
    %c0_i32 = arith.constant 0 : i32
    %c0_i32_0 = arith.constant 0 : i32
    %c0_i32_1 = arith.constant 0 : i32
    return %c0_i32, %c0_i32_0 : i32, i32
  }
  func.func @transform_16(%arg0: i32) -> (i32, i32) {
    %c0_i32 = arith.constant 0 : i32
    %c0_i32_0 = arith.constant 0 : i32
    %c0_i32_1 = arith.constant 0 : i32
    return %c0_i32, %c0_i32_0 : i32, i32
  }
  func.func @transform_17(%arg0: i32) -> (i32, i32) {
    %c0_i32 = arith.constant 0 : i32
    %c0_i32_0 = arith.constant 0 : i32
    %c0_i32_1 = arith.constant 0 : i32
    return %c0_i32, %c0_i32_0 : i32, i32
  }
  func.func @transform_18(%arg0: i32) -> (i32, i32, i32) {
    %c0_i32 = arith.constant 0 : i32
    %c0_i32_0 = arith.constant 0 : i32
    %c0_i32_1 = arith.constant 0 : i32
    return %arg0, %c0_i32, %c0_i32_0 : i32, i32, i32
  }
}

</mosaic_0001>

<bundles_post_ra>
// kernel: cnn_lstm_forward.1
= control target key start
LH: loop header
LB: loop body
LE: loop exit
PB: predicated region body
PF: predicated region fallthrough
CT: control target
= control target key end

     0   :  { %s6247_s0 = inlined_call_operand.vmem [shape: f32[1,32,4], index: 0, kind: input, shape index: {}]   ;;  %s6248_s1 = inlined_call_operand.hbm [shape: bf16[20,64], index: 1, kind: input, shape index: {}]   ;;  %s6249_s2 = inlined_call_operand.vmem [shape: f32[1,64], index: 2, kind: input, shape index: {}]   ;;  %s6250_s3 = inlined_call_operand.hbm [shape: bf16[320,128], index: 3, kind: input, shape index: {}]   ;;  %s6251_s4 = inlined_call_operand.vmem [shape: f32[1,128], index: 4, kind: input, shape index: {}]   ;;  %s6252_s5 = inlined_call_operand.hbm [shape: bf16[384,128], index: 5, kind: input, shape index: {}]   ;;  %s6253_s6 = inlined_call_operand.vmem [shape: f32[1,128], index: 6, kind: input, shape index: {}]   ;;  %s6254_s7 = inlined_call_operand.vmem [shape: bf16[128,128], index: 7, kind: input, shape index: {}]   ;;  %s6255_s8 = inlined_call_operand.hbm [shape: bf16[32,128], index: 8, kind: input, shape index: {}]   ;;  %s6256_s9 = inlined_call_operand.vmem [shape: f32[1,128], index: 9, kind: input, shape index: {}]   ;;  %s6257_s10 = inlined_call_operand.hbm [shape: bf16[32,128], index: 10, kind: input, shape index: {}]   ;;  %s6258_s11 = inlined_call_operand.hbm [shape: bf16[32,128], index: 11, kind: input, shape index: {}]   ;;  %s6259_s12 = inlined_call_operand.vmem [shape: f32[1,128], index: 12, kind: input, shape index: {}]   ;;  %s6260_s13 = inlined_call_operand.hbm [shape: bf16[32,128], index: 13, kind: input, shape index: {}]   ;;  %s6261_s14 = inlined_call_operand.hbm [shape: bf16[32,128], index: 14, kind: input, shape index: {}]   ;;  %s6262_s15 = inlined_call_operand.vmem [shape: f32[1,128], index: 15, kind: input, shape index: {}]   ;;  %s6263_s16 = inlined_call_operand.vmem [shape: bf16[32,4], index: 16, kind: input, shape index: {}]   ;;  %s6264_s17 = inlined_call_operand.vmem [shape: f32[1,4], index: 17, kind: input, shape index: {}]   ;;  %s6265_s18 = inlined_call_operand.vmem [shape: f32[1,16,4], index: 18, kind: output, shape index: {}]  }
   0x1   :  { %6267 = sst [smem:[#allocation20_spill]] %s6247_s0 }
   0x2   :  { %6268 = sst [smem:[#allocation21_spill]] %s6248_s1 }
   0x3   :  { %6269 = sst [smem:[#allocation22_spill]] %s6249_s2 }
   0x4   :  { %23 = vsyncpa [#allocation3], 0 }
   0x5   :  { %24 = vsyncpa [#allocation5], 0 }
   0x6   :  { %25 = vsyncpa [#allocation8], 0 }
   0x7   :  { %26 = vsyncpa [#allocation11], 0 }
   0x8   :  { %27 = vsyncpa [#allocation14], 0  ;;  %s49_s29 = sshll.u32 %s6250_s3, 4  ;;  %s5328_s30 = smov [#allocation4]   ;;  %s50_s29 = int_to_ptr.hbm [resolvable:$true] %s49_s29 }
   0x9   :  { %s51_s0 = sshll.u32 %s5328_s30, 4  ;;  %s81_s20 = sshll.u32 %s6255_s8, 4  ;;  %s52_s0 = int_to_ptr.vmem [resolvable:$true] %s51_s0  ;;  %s82_s20 = int_to_ptr.hbm [resolvable:$true] %s81_s20 }
   0xa   :  { %s5329_s21 = smov 64   ;;  %s5330_s22 = smov 4  }
   0xb   :  { %57 = dma.hbm_to_vmem [thread:$0]  %s50_s29, 2560, %s52_s0, [#allocation5], %s5329_s21, %s5329_s21, %s5330_s22  }
   0xc   :  { %s5331_s2 = smov [#allocation7]   ;;  %s109_s3 = sshll.u32 %s6258_s11, 4  ;;  %s110_s3 = int_to_ptr.hbm [resolvable:$true] %s109_s3 }
   0xd   :  { %s83_s23 = sshll.u32 %s5331_s2, 4  ;;  %s6270_s27 = sld [smem:[#allocation21_spill]]  ;;  %s84_s23 = int_to_ptr.vmem [resolvable:$true] %s83_s23 }
   0xe   :  { %89 = dma.hbm_to_vmem [thread:$0]  %s82_s20, 256, %s84_s23, [#allocation8], %s5329_s21, %s5329_s21, %s5330_s22  }
   0xf   :  { %s5332_s30 = smov [#allocation10]   ;;  %s5333_s29 = smov [#allocation2]  }
  0x10   :  { %s111_s19 = sshll.u32 %s5332_s30, 4  ;;  %s36_s11 = sshll.u32 %s5333_s29, 4  ;;  %s112_s19 = int_to_ptr.vmem [resolvable:$true] %s111_s19  ;;  %s37_s11 = int_to_ptr.vmem [resolvable:$true] %s36_s11 }
  0x11   :  { %117 = dma.hbm_to_vmem [thread:$0]  %s110_s3, 256, %s112_s19, [#allocation11], %s5329_s21, %s5329_s21, %s5330_s22  }
  0x12   :  { %s64_s2 = sshll.u32 %s6252_s5, 4  ;;  %s96_s24 = sshll.u32 %s6257_s10, 4  ;;  %s65_s2 = int_to_ptr.hbm [resolvable:$true] %s64_s2  ;;  %s97_s24 = int_to_ptr.hbm [resolvable:$true] %s96_s24 }
  0x13   :  { %s34_s28 = sshll.u32 %s6270_s27, 4  ;;  %s5334_s25 = smov [#allocation6]   ;;  %s35_s28 = int_to_ptr.hbm [resolvable:$true] %s34_s28 }
  0x14   :  { %42 = dma.hbm_to_vmem [thread:$0]  %s35_s28, 192, %s37_s11, [#allocation3], %s5329_s21, %s5329_s21, %s5330_s22  }
  0x15   :  { %s66_s8 = sshll.u32 %s5334_s25, 4  ;;  %s5335_s3 = smov [#allocation9]   ;;  %s67_s8 = int_to_ptr.vmem [resolvable:$true] %s66_s8 }
  0x16   :  { %72 = dma.hbm_to_vmem [thread:$0]  %s65_s2, 3072, %s67_s8, [#allocation5], %s5329_s21, %s5329_s21, %s5330_s22  }
  0x17   :  { %s98_s5 = sshll.u32 %s5335_s3, 4  ;;  %s124_s30 = sshll.u32 %s6260_s13, 4  ;;  %s99_s5 = int_to_ptr.vmem [resolvable:$true] %s98_s5  ;;  %s125_s30 = int_to_ptr.hbm [resolvable:$true] %s124_s30 }
  0x18   :  { %104 = dma.hbm_to_vmem [thread:$0]  %s97_s24, 256, %s99_s5, [#allocation8], %s5329_s21, %s5329_s21, %s5330_s22  }
  0x19   :  { %s137_s19 = sshll.u32 %s6261_s14, 4  ;;  %s5336_s29 = smov [#allocation12]   ;;  %s138_s19 = int_to_ptr.hbm [resolvable:$true] %s137_s19 }
  0x1a   :  { %s126_s11 = sshll.u32 %s5336_s29, 4  ;;  %s5337_s0 = smov [#allocation13]   ;;  %s127_s11 = int_to_ptr.vmem [resolvable:$true] %s126_s11 }
  0x1b   :  { %132 = dma.hbm_to_vmem [thread:$0]  %s125_s30, 256, %s127_s11, [#allocation11], %s5329_s21, %s5329_s21, %s5330_s22  }
  0x1c   :  { %s139_s13 = sshll.u32 %s5337_s0, 4  ;;  %s140_s13 = int_to_ptr.vmem [resolvable:$true] %s139_s13 }
  0x1d   :  { %145 = dma.hbm_to_vmem [thread:$0]  %s138_s19, 256, %s140_s13, [#allocation14], %s5329_s21, %s5329_s21, %s5330_s22  }
  0x1e   :  { %5318 = dma.done.wait [#allocation3], 192  }
  0x1f   :  { %5319 = vsyncadd [#allocation3], 4294967104 }
  0x20   :  { %5320 = dma.done.wait [#allocation5], 5632  }
  0x21   :  { %5321 = vsyncadd [#allocation5], 4294961664 }
  0x22   :  { %5322 = dma.done.wait [#allocation8], 512  }
  0x23   :  { %5323 = vsyncadd [#allocation8], 4294966784 }
  0x24   :  { %5324 = dma.done.wait [#allocation11], 512  }
  0x25   :  { %5325 = vsyncadd [#allocation11], 4294966784 }
  0x26   :  { %5326 = dma.done.wait [#allocation14], 256  }
  0x27   :  { %5327 = vsyncadd [#allocation14], 4294967040  ;;  %s6271_s2 = sld [smem:[#allocation20_spill]]  ;;  %vm203_vm0 = vcmask 1041408   ;;  %vm215_vm1 = vcmask 1046528   ;;  %vm235_vm2 = vcmask 1044480  }
  0x28   :  { %s5338_s5 = smov 12   ;;  %vm225_vm3 = vcmask 1045504   ;;  %vm245_vm4 = vcmask 1043456   ;;  %s5339_s26 = smov 8   ;;  %v278_v39 = vld [vmem:[#allocation2 + $0x8] sm:$0x3] }
  0x29   :  { %s5340_s27 = smov 16   ;;  %v288_v40 = vunpack.c.l.b16 %v278_v39  ;;  %v4652_v43 = vld [vmem:[#allocation2] sm:$0xff]  ;;  %vm255_vm5 = vcmask 31744   ;;  %vm261_vm6 = vcmask 64512   ;;  %vm266_vm7 = vcmask 97280   ;;  %v4670_v63 = vld [vmem:[#allocation4 + $0x88] sm:$0xff] }
  0x2a   :  { %vm271_vm8 = vcmask 130048   ;;  %vm292_vm9 = vcmask 162816   ;;  %v4672_v60 = vld [vmem:[#allocation4 + $0x98] sm:$0xff]  ;;  %v4671_v61 = vld [vmem:[#allocation4 + $0x90] sm:$0xff]  ;;  %s6272_s10 = sld [smem:[#allocation22_spill]]  ;;  %vm374_vm10 = vcmask 523264  }
  0x2b   :  { %v290_v41 = vpack.c.b16 %v288_v40, %v288_v40  ;;  %602 = vmatpush.bf16.msra.mxu3 %v4672_v60  ;;  %vm635_vm11 = vcmask 1040384   ;;  %s5342_s30 = smov 32  }
  0x2c   :  { %vm4472_vm12 = vmneg %vm635_vm11 }
  0x2d   :  { %v185_v0 = vld [vmem:[%s6271_s2] sm:$0xff]  ;;  %v186_v1 = vld [vmem:[%s6271_s2 + $0x8] sm:$0xff]  ;;  %v187_v2 = vld [vmem:[%s6271_s2 + $0x10] sm:$0xff]  ;;  %v298_v42 = vsel %vm203_vm0, %v290_v41, 0 }
  0x2e   :  { %v188_v3 = vld [vmem:[%s6271_s2 + $0x18] sm:$0xff]  ;;  %v189_v4 = vpack.c.bf16 %v185_v0, %v185_v0  ;;  %v190_v5 = vpack.c.bf16 %v186_v1, %v186_v1  ;;  %v191_v6 = vpack.c.bf16 %v187_v2, %v187_v2  ;;  %306 = vmatpush.bf16.msra.mxu0 %v298_v42  ;;  %v4669_v0 = vld [vmem:[#allocation4 + $0x80] sm:$0xff]  ;;  %v4664_v41 = vld [vmem:[#allocation4 + $0x58] sm:$0xff] }
  0x2f   :  { %v192_v7 = vpack.c.bf16 %v188_v3, %v188_v3  ;;  %603 = vmatpush.bf16.msra.mxu3 %v4671_v61 }
  0x30   :  { %v197_v8 = vunpack.c.l.b16 %v189_v4  ;;  %v198_v9 = vunpack.c.l.b16 %v190_v5  ;;  %v199_v10 = vunpack.c.l.b16 %v191_v6  ;;  %v4732_v1 = vld [vmem:[%s6272_s10] ss:$0 sm:$0xff] }
  0x31   :  { %v200_v11 = vunpack.c.l.b16 %v192_v7 }
  0x32   :  { %v201_v12 = vpack.c.b16 %v198_v9, %v197_v8  ;;  %307 = vmatpush.bf16.msra.mxu0 %v4652_v43 }
  0x33   :  { %v202_v13 = vpack.c.b16 %v200_v11, %v199_v10  ;;  %604 = vmatpush.bf16.msra.mxu3 %v4670_v63 }
  0x34   :  { %v204_v14 = vrot.slane %v201_v12, 6 }
  0x35   :  { %v205_v15 = vrot.slane %v202_v13, 6 }
  0x36   :  { %v210_v16 = vsel %vm203_vm0, 0, %v204_v14 }
  0x37   :  { %v206_v17 = vsel %vm203_vm0, %v204_v14, %v205_v15  ;;  %v216_v18 = vrot.slane %v210_v16, 1  ;;  %v236_v19 = vrot.slane %v210_v16, 3  ;;  %v212_v24 = vsel %vm203_vm0, %v205_v15, 0  ;;  %605 = vmatpush.bf16.msra.mxu3 %v4669_v0 }
  0x38   :  { %v217_v20 = vrot.slane %v206_v17, 1  ;;  %v237_v21 = vrot.slane %v206_v17, 3  ;;  %v219_v25 = vrot.slane %v212_v24, 1  ;;  %v226_v26 = vrot.slane %v210_v16, 2 }
  0x39   :  { %v227_v27 = vrot.slane %v206_v17, 2  ;;  %v246_v28 = vrot.slane %v210_v16, 4  ;;  %v247_v29 = vrot.slane %v206_v17, 4  ;;  %v229_v31 = vrot.slane %v212_v24, 2 }
  0x3a   :  { %v218_v22 = vsel %vm215_vm1, %v216_v18, %v217_v20  ;;  %v238_v23 = vsel %vm235_vm2, %v236_v19, %v237_v21  ;;  %v220_v30 = vsel %vm215_vm1, %v217_v20, %v219_v25  ;;  %v239_v35 = vrot.slane %v212_v24, 3  ;;  %v4667_v20 = vld [vmem:[#allocation4 + $0x70] sm:$0xff] }
  0x3b   :  { %221 = vrot.lane.b32.xlu0 %v218_v22, %s5330_s22  ;;  %241 = vrot.lane.b32.xlu1 %v238_v23, %s5338_s5  ;;  %v228_v32 = vsel %vm225_vm3, %v226_v26, %v227_v27  ;;  %v248_v33 = vsel %vm245_vm4, %v246_v28, %v247_v29  ;;  %v230_v34 = vsel %vm225_vm3, %v227_v27, %v229_v31  ;;  %v249_v36 = vrot.slane %v212_v24, 4  ;;  %v4659_v24 = vld [vmem:[#allocation4 + $0x30] sm:$0xff]  ;;  %v4666_v27 = vld [vmem:[#allocation4 + $0x68] sm:$0xff]  ;;  %v4665_v31 = vld [vmem:[#allocation4 + $0x60] sm:$0xff] }
  0x3c   :  { %223 = vrot.lane.b32.xlu2 %v220_v30, %s5330_s22  ;;  %v240_v37 = vsel %vm235_vm2, %v237_v21, %v239_v35  ;;  %v4660_v21 = vld [vmem:[#allocation4 + $0x38] sm:$0xff] }
  0x3d   :  { %v250_v38 = vsel %vm245_vm4, %v247_v29, %v249_v36  ;;  %560 = vmatpush.bf16.msra.mxu1 %v4660_v21  ;;  %v4694_v21 = vld [vmem:[#allocation6 + $0xa8] sm:$0xff] }
  0x41   :  { %561 = vmatpush.bf16.msra.mxu1 %v4659_v24 }
  0x43   :  { %231 = vrot.lane.b32.xlu0 %v228_v32, %s5339_s26  ;;  %251 = vrot.lane.b32.xlu1 %v248_v33, %s5340_s27 }
  0x44   :  { %233 = vrot.lane.b32.xlu2 %v230_v34, %s5339_s26 }
  0x4b   :  { %243 = vrot.lane.b32.xlu0 %v240_v37, %s5338_s5  ;;  %253 = vrot.lane.b32.xlu1 %v250_v38, %s5340_s27 }
  0x96   :  { %v224_v46 = vpop.permute.xlu2 %223 }
  0x97   :  { %v260_v53 = vsel %vm255_vm5, %v206_v17, %v224_v46  ;;  %v4668_v17 = vld [vmem:[#allocation4 + $0x78] sm:$0xff]  ;;  %v4663_v46 = vld [vmem:[#allocation4 + $0x50] sm:$0xff] }
  0x98   :  { %579 = vmatpush.bf16.msra.mxu2 %v4668_v17  ;;  %v4674_v17 = vld [vmem:[#allocation6 + $0x8] sm:$0xff] }
  0x9c   :  { %580 = vmatpush.bf16.msra.mxu2 %v4667_v20  ;;  %v4673_v20 = vld [vmem:[#allocation6] sm:$0xff] }
  0x9e   :  { %v234_v54 = vpop.permute.xlu2 %233 }
  0x9f   :  { %v265_v55 = vsel %vm261_vm6, %v260_v53, %v234_v54  ;;  %v4658_v53 = vld [vmem:[#allocation4 + $0x28] sm:$0xff]  ;;  %v4657_v54 = vld [vmem:[#allocation4 + $0x20] sm:$0xff] }
  0xa0   :  { %581 = vmatpush.bf16.msra.mxu2 %v4666_v27  ;;  %562 = vmatpush.bf16.msra.mxu1 %v4658_v53  ;;  %v4692_v27 = vld [vmem:[#allocation6 + $0x98] sm:$0xff] }
  0xa4   :  { %582 = vmatpush.bf16.msra.mxu2 %v4665_v31  ;;  %563 = vmatpush.bf16.msra.mxu1 %v4657_v54  ;;  %v4683_v31 = vld [vmem:[#allocation6 + $0x50] sm:$0xff] }
  0xa8   :  { %583 = vmatpush.bf16.msra.mxu2 %v4664_v41 }
  0xac   :  { %584 = vmatpush.bf16.msra.mxu2 %v4663_v46 }
  0xad   :  { %v222_v44 = vpop.permute.xlu0 %221  ;;  %v242_v45 = vpop.permute.xlu1 %241 }
  0xae   :  { %v257_v47 = vsel %vm255_vm5, %v210_v16, %v222_v44 }
  0xb5   :  { %v232_v48 = vpop.permute.xlu0 %231  ;;  %v252_v49 = vpop.permute.xlu1 %251 }
  0xb6   :  { %v263_v50 = vsel %vm261_vm6, %v257_v47, %v232_v48  ;;  %v4662_v48 = vld [vmem:[#allocation4 + $0x48] sm:$0xff] }
  0xb7   :  { %v268_v51 = vsel %vm266_vm7, %v263_v50, %v242_v45  ;;  %585 = vmatpush.bf16.msra.mxu2 %v4662_v48  ;;  %v4661_v50 = vld [vmem:[#allocation4 + $0x40] sm:$0xff] }
  0xb8   :  { %v273_v52 = vsel %vm271_vm8, %v268_v51, %v252_v49 }
  0xb9   :  { %4292 = vmatmul.msk.bf16.vlgmr.msra.gmra.mxu0 %vm292_vm9, %v273_v52 }
  0xbb   :  { %586 = vmatpush.bf16.msra.mxu2 %v4661_v50 }
  0xbd   :  { %v244_v56 = vpop.permute.xlu0 %243  ;;  %v254_v58 = vpop.permute.xlu1 %253 }
  0xbe   :  { %v270_v57 = vsel %vm266_vm7, %v265_v55, %v244_v56  ;;  %v4656_v55 = vld [vmem:[#allocation4 + $0x18] sm:$0xff]  ;;  %v4655_v56 = vld [vmem:[#allocation4 + $0x10] sm:$0xff] }
  0xbf   :  { %v275_v59 = vsel %vm271_vm8, %v270_v57, %v254_v58  ;;  %564 = vmatpush.bf16.msra.mxu1 %v4656_v55  ;;  %v4654_v57 = vld [vmem:[#allocation4 + $0x8] sm:$0xff]  ;;  %v4653_v58 = vld [vmem:[#allocation4] sm:$0xff] }
  0xc3   :  { %565 = vmatpush.bf16.msra.mxu1 %v4655_v56 }
  0xc7   :  { %566 = vmatpush.bf16.msra.mxu1 %v4654_v57 }
  0xc9   :  { %4293 = vmatmul.msk.bf16.gmra.mxu0 %vm292_vm9, %v275_v59 }
  0xcb   :  { %567 = vmatpush.bf16.msra.mxu1 %v4653_v58 }
 0x136   :  { %v309_v62 = vpop.f32.mrf.mxu0 }
 0x137   :  { %v310_v4 = vadd.f32 %v4732_v1, %v309_v62 }
 0x139   :  { %v319_v6 = vmax.f32 %v310_v4, 0.0 }
 0x13b   :  { %v323_v9 = vpack.c.bf16 %v319_v6, %v319_v6 }
 0x13d   :  { %v331_v12 = vunpack.c.l.b16 %v323_v9  ;;  %v4679_v9 = vld [vmem:[#allocation6 + $0x30] sm:$0xff] }
 0x13e   :  { %v311_v2 = vpop.f32.mrf.mxu0 }
 0x13f   :  { %v312_v3 = vadd.f32 %v4732_v1, %v311_v2 }
 0x141   :  { %v320_v5 = vmax.f32 %v312_v3, 0.0 }
 0x143   :  { %v324_v8 = vpack.c.bf16 %v320_v5, %v320_v5 }
 0x145   :  { %v332_v11 = vunpack.c.l.b16 %v324_v8  ;;  %v4680_v8 = vld [vmem:[#allocation6 + $0x38] sm:$0xff] }
 0x146   :  { %v314_v7 = vpop.f32.mrf.mxu0  ;;  %858 = vmatpush.bf16.msrb.mxu0 %v4680_v8 }
 0x147   :  { %v315_v10 = vadd.f32 %v4732_v1, %v314_v7  ;;  %v335_v15 = vpack.c.b16 %v332_v11, %v331_v12  ;;  %v4677_v11 = vld [vmem:[#allocation6 + $0x20] sm:$0xff]  ;;  %v4676_v12 = vld [vmem:[#allocation6 + $0x18] sm:$0xff] }
 0x149   :  { %v321_v13 = vmax.f32 %v315_v10, 0.0  ;;  %v337_v22 = vrot.slane %v335_v15, 6  ;;  %v4678_v10 = vld [vmem:[#allocation6 + $0x28] sm:$0xff]  ;;  %v4696_v15 = vld [vmem:[#allocation6 + $0xb8] sm:$0xff] }
 0x14a   :  { %859 = vmatpush.bf16.msrb.mxu0 %v4679_v9  ;;  %896 = vmatpush.bf16.msrb.mxu1 %v4696_v15 }
 0x14b   :  { %v325_v18 = vpack.c.bf16 %v321_v13, %v321_v13  ;;  %v5518_v28 = vsel %vm203_vm0, 0, %v337_v22  ;;  %v4688_v13 = vld [vmem:[#allocation6 + $0x78] sm:$0xff] }
 0x14c   :  { %v369_v32 = vrot.slane %v5518_v28, 4  ;;  %v360_v35 = vrot.slane %v5518_v28, 3  ;;  %v346_v36 = vrot.slane %v5518_v28, 1  ;;  %v355_v60 = vrot.slane %v5518_v28, 2  ;;  %877 = vmatpush.bf16.msrb.mxu3 %v4688_v13 }
 0x14d   :  { %v333_v25 = vunpack.c.l.b16 %v325_v18  ;;  %v4695_v18 = vld [vmem:[#allocation6 + $0xb0] sm:$0xff] }
 0x14e   :  { %v316_v14 = vpop.f32.mrf.mxu0  ;;  %860 = vmatpush.bf16.msrb.mxu0 %v4678_v10  ;;  %897 = vmatpush.bf16.msrb.mxu1 %v4695_v18 }
 0x14f   :  { %v317_v16 = vadd.f32 %v4732_v1, %v316_v14  ;;  %v4675_v14 = vld [vmem:[#allocation6 + $0x10] sm:$0xff] }
 0x151   :  { %v322_v19 = vmax.f32 %v317_v16, 0.0  ;;  %v4687_v16 = vld [vmem:[#allocation6 + $0x70] sm:$0xff] }
 0x152   :  { %861 = vmatpush.bf16.msrb.mxu0 %v4677_v11  ;;  %878 = vmatpush.bf16.msrb.mxu3 %v4687_v16 }
 0x153   :  { %v326_v23 = vpack.c.bf16 %v322_v19, %v322_v19  ;;  %v4686_v19 = vld [vmem:[#allocation6 + $0x68] sm:$0xff]  ;;  %898 = vmatpush.bf16.msrb.mxu1 %v4694_v21 }
 0x155   :  { %v334_v26 = vunpack.c.l.b16 %v326_v23  ;;  %v4693_v23 = vld [vmem:[#allocation6 + $0xa0] sm:$0xff] }
 0x156   :  { %862 = vmatpush.bf16.msrb.mxu0 %v4676_v12  ;;  %879 = vmatpush.bf16.msrb.mxu3 %v4686_v19 }
 0x157   :  { %v336_v29 = vpack.c.b16 %v334_v26, %v333_v25  ;;  %899 = vmatpush.bf16.msrb.mxu1 %v4693_v23  ;;  %v4733_v25 = vld [vmem:[%s6251_s4] ss:$0 sm:$0xff]  ;;  %v4684_v26 = vld [vmem:[#allocation6 + $0x58] sm:$0xff]  ;;  %v4703_v23 = vld [vmem:[%s6254_s7 + $0x30] sm:$0xff] }
 0x159   :  { %v338_v30 = vrot.slane %v336_v29, 6 }
 0x15a   :  { %863 = vmatpush.bf16.msrb.mxu0 %v4675_v14 }
 0x15b   :  { %v339_v33 = vsel %vm203_vm0, %v337_v22, %v338_v30  ;;  %v343_v34 = vsel %vm203_vm0, %v338_v30, 0  ;;  %v4685_v22 = vld [vmem:[#allocation6 + $0x60] sm:$0xff]  ;;  %900 = vmatpush.bf16.msrb.mxu1 %v4692_v27  ;;  %v4700_v27 = vld [vmem:[%s6254_s7 + $0x18] sm:$0xff] }
 0x15c   :  { %v370_v37 = vrot.slane %v339_v33, 4  ;;  %v361_v38 = vrot.slane %v339_v33, 3  ;;  %v363_v39 = vrot.slane %v343_v34, 3  ;;  %v347_v40 = vrot.slane %v339_v33, 1  ;;  %880 = vmatpush.bf16.msrb.mxu3 %v4685_v22  ;;  %v4704_v22 = vld [vmem:[%s6254_s7 + $0x38] sm:$0xff] }
 0x15d   :  { %v349_v47 = vrot.slane %v343_v34, 1  ;;  %v372_v51 = vrot.slane %v343_v34, 4  ;;  %v356_v59 = vrot.slane %v339_v33, 2  ;;  %v358_v0 = vrot.slane %v343_v34, 2  ;;  %v4682_v34 = vld [vmem:[#allocation6 + $0x48] sm:$0xff]  ;;  %989 = vmatpush.bf16.msrb.mxu2 %v4704_v22 }
 0x15e   :  { %v371_v42 = vsel %vm245_vm4, %v369_v32, %v370_v37  ;;  %v364_v43 = vsel %vm235_vm2, %v361_v38, %v363_v39  ;;  %v362_v44 = vsel %vm235_vm2, %v360_v35, %v361_v38  ;;  %v348_v45 = vsel %vm215_vm1, %v346_v36, %v347_v40  ;;  %864 = vmatpush.bf16.msrb.mxu0 %v4674_v17  ;;  %v4691_v32 = vld [vmem:[#allocation6 + $0x90] sm:$0xff]  ;;  %v4690_v35 = vld [vmem:[#allocation6 + $0x88] sm:$0xff]  ;;  %v4681_v38 = vld [vmem:[#allocation6 + $0x40] sm:$0xff] }
 0x15f   :  { %4374 = vmatmul.msk.bf16.vlgmr.msra.gmra.mxu3 %vm374_vm10, %v371_v42  ;;  %367 = vrot.lane.b32.xlu1 %v364_v43, %s5329_s21  ;;  %v350_v49 = vsel %vm215_vm1, %v347_v40, %v349_v47  ;;  %v373_v52 = vsel %vm245_vm4, %v370_v37, %v372_v51  ;;  %v357_v62 = vsel %vm225_vm3, %v355_v60, %v356_v59  ;;  %v4689_v42 = vld [vmem:[#allocation6 + $0x80] sm:$0xff]  ;;  %vm1024_vm2 = vcmask 261120  }
 0x160   :  { %365 = vrot.lane.b32.xlu2 %v362_v44, %s5329_s21  ;;  %351 = vrot.lane.b32.xlu0 %v348_v45, %s5329_s21  ;;  %v359_v2 = vsel %vm225_vm3, %v356_v59, %v358_v0 }
 0x161   :  { %881 = vmatpush.bf16.msrb.mxu3 %v4684_v26  ;;  %901 = vmatpush.bf16.msrb.mxu1 %v4691_v32  ;;  %v4701_v26 = vld [vmem:[%s6254_s7 + $0x20] sm:$0xff]  ;;  %v5341_v32 = vmov 0  }
 0x162   :  { %865 = vmatpush.bf16.msrb.mxu0 %v4673_v20  ;;  %990 = vmatpush.bf16.msrb.mxu2 %v4703_v23 }
 0x165   :  { %882 = vmatpush.bf16.msrb.mxu3 %v4683_v31  ;;  %902 = vmatpush.bf16.msrb.mxu1 %v4690_v35  ;;  %v4697_v31 = vld [vmem:[%s6254_s7] sm:$0xff] }
 0x166   :  { %v4734_v35 = vld [vmem:[%s6253_s6] ss:$0 sm:$0xff] }
 0x168   :  { %353 = vrot.lane.b32.xlu2 %v350_v49, %s5329_s21 }
 0x169   :  { %883 = vmatpush.bf16.msrb.mxu3 %v4682_v34  ;;  %903 = vmatpush.bf16.msrb.mxu1 %v4689_v42 }
 0x16d   :  { %884 = vmatpush.bf16.msrb.mxu3 %v4681_v38 }
 0x16f   :  { %4375 = vmatmul.msk.bf16.gmra.mxu3 %vm374_vm10, %v373_v52 }
 0x1ba   :  { %v366_v61 = vpop.permute.xlu2 %365 }
 0x1bb   :  { %v384_v63 = vsel %vm374_vm10, %v357_v62, %v366_v61 }
 0x1bc   :  { %587 = vmatmul.bf16.vlgmr.msra.gmra.mxu2 %v384_v63 }
 0x1c2   :  { %v354_v6 = vpop.permute.xlu2 %353 }
 0x1c3   :  { %v380_v7 = vsel %vm374_vm10, %v339_v33, %v354_v6 }
 0x1d1   :  { %v368_v1 = vpop.permute.xlu1 %367 }
 0x1d2   :  { %v352_v3 = vpop.permute.xlu0 %351  ;;  %v388_v4 = vsel %vm374_vm10, %v359_v2, %v368_v1 }
 0x1d3   :  { %v376_v5 = vsel %vm374_vm10, %v5518_v28, %v352_v3  ;;  %592 = vmatmul.bf16.gmra.mxu2 %v388_v4 }
 0x1d4   :  { %568 = vmatmul.bf16.vlgmr.msra.gmra.mxu1 %v376_v5 }
 0x1e2   :  { %v607_v24 = vpop.f32.mrf.mxu3 }
 0x1e4   :  { %573 = vmatmul.bf16.gmra.mxu1 %v380_v7 }
 0x1ea   :  { %v609_v36 = vpop.f32.mrf.mxu3 }
 0x1f2   :  { %v612_v52 = vpop.f32.mrf.mxu3 }
 0x1fa   :  { %v614_v0 = vpop.f32.mrf.mxu3 }
 0x23f   :  { %v588_v28 = vpop.f32.mrf.mxu2 }
 0x247   :  { %v590_v39 = vpop.f32.mrf.mxu2 }
 0x251   :  { %v569_v29 = vpop.f32.mrf.mxu1 }
 0x252   :  { %v570_v30 = vadd.f32 %v4733_v25, %v569_v29  ;;  %v4698_v29 = vld [vmem:[%s6254_s7 + $0x8] sm:$0xff] }
 0x254   :  { %v589_v33 = vadd.f32 %v588_v28, %v570_v30  ;;  %v4699_v28 = vld [vmem:[%s6254_s7 + $0x10] sm:$0xff] }
 0x255   :  { %v5582_v30 = vld [vmem:[#allocation7] sm:$0xff] }
 0x256   :  { %v608_v37 = vadd.f32 %v607_v24, %v589_v33  ;;  %v593_v48 = vpop.f32.mrf.mxu2  ;;  %v4702_v24 = vld [vmem:[%s6254_s7 + $0x28] sm:$0xff] }
 0x257   :  { %991 = vmatpush.bf16.msrb.mxu2 %v4702_v24 }
 0x258   :  { %v617_v43 = vmax.f32 %v608_v37, 0.0 }
 0x259   :  { %v571_v40 = vpop.f32.mrf.mxu1 }
 0x25a   :  { %v572_v41 = vadd.f32 %v4733_v25, %v571_v40  ;;  %v621_v46 = vpack.c.bf16 %v617_v43, %v617_v43 }
 0x25b   :  { %992 = vmatpush.bf16.msrb.mxu2 %v4701_v26 }
 0x25c   :  { %v591_v44 = vadd.f32 %v590_v39, %v572_v41  ;;  %v629_v53 = vunpack.c.l.b16 %v621_v46 }
 0x25e   :  { %v610_v45 = vadd.f32 %v609_v36, %v591_v44  ;;  %v595_v61 = vpop.f32.mrf.mxu2 }
 0x25f   :  { %993 = vmatpush.bf16.msrb.mxu2 %v4700_v27 }
 0x260   :  { %v618_v47 = vmax.f32 %v610_v45, 0.0 }
 0x261   :  { %v574_v49 = vpop.f32.mrf.mxu1 }
 0x262   :  { %v622_v50 = vpack.c.bf16 %v618_v47, %v618_v47  ;;  %v575_v51 = vadd.f32 %v4733_v25, %v574_v49 }
 0x263   :  { %994 = vmatpush.bf16.msrb.mxu2 %v4699_v28 }
 0x264   :  { %v630_v54 = vunpack.c.l.b16 %v622_v50  ;;  %v594_v55 = vadd.f32 %v593_v48, %v575_v51 }
 0x266   :  { %v633_v56 = vpack.c.b16 %v630_v54, %v629_v53  ;;  %v613_v57 = vadd.f32 %v612_v52, %v594_v55 }
 0x267   :  { %995 = vmatpush.bf16.msrb.mxu2 %v4698_v29 }
 0x268   :  { %v636_v58 = vrot.slane %v633_v56, 7  ;;  %v619_v62 = vmax.f32 %v613_v57, 0.0 }
 0x269   :  { %v576_v59 = vpop.f32.mrf.mxu1 }
 0x26a   :  { %v577_v60 = vadd.f32 %v4733_v25, %v576_v59  ;;  %4473 = vmatmul.msk.bf16.vlgmr.msrb.gmra.mxu0 %vm4472_vm12, %v636_v58  ;;  %v623_v2 = vpack.c.bf16 %v619_v62, %v619_v62  ;;  %v642_v9 = vsel %vm635_vm11, 0, %v636_v58  ;;  %v5565_v25 = vld [vmem:[#allocation7 + $0x8] sm:$0xff] }
 0x26b   :  { %v648_v13 = vrot.slane %v642_v9, 1  ;;  %v655_v14 = vrot.slane %v642_v9, 2  ;;  %1033 = vmatpush.bf16.msra.mxu0 %v5565_v25  ;;  %1091 = vmatpush.bf16.msra.mxu3 %v5565_v25 }
 0x26c   :  { %v596_v63 = vadd.f32 %v595_v61, %v577_v60  ;;  %v631_v5 = vunpack.c.l.b16 %v623_v2  ;;  %1221 = vmatpush.bf16.msra.mxu1 %v5565_v25  ;;  %996 = vmatpush.bf16.msrb.mxu2 %v4697_v31  ;;  %v5609_v2 = vld [vmem:[%s6256_s9] ss:$0 sm:$0xff] }
 0x26e   :  { %v615_v1 = vadd.f32 %v614_v0, %v596_v63 }
 0x26f   :  { %1034 = vmatpush.bf16.msra.mxu0 %v5582_v30  ;;  %1092 = vmatpush.bf16.msra.mxu3 %v5582_v30 }
 0x270   :  { %v620_v3 = vmax.f32 %v615_v1, 0.0  ;;  %1222 = vmatpush.bf16.msra.mxu1 %v5582_v30  ;;  %1286 = vmatpush.bf16.msra.mxu2 %v5565_v25 }
 0x272   :  { %v624_v4 = vpack.c.bf16 %v620_v3, %v620_v3 }
 0x273   :  { %1156 = vmatpush.bf16.msrb.mxu0 %v5565_v25 }
 0x274   :  { %v632_v6 = vunpack.c.l.b16 %v624_v4  ;;  %1287 = vmatpush.bf16.msra.mxu2 %v5582_v30 }
 0x276   :  { %v634_v7 = vpack.c.b16 %v632_v6, %v631_v5 }
 0x277   :  { %1157 = vmatpush.bf16.msrb.mxu0 %v5582_v30 }
 0x278   :  { %v637_v8 = vrot.slane %v634_v7, 7 }
 0x27a   :  { %v638_v10 = vsel %vm635_vm11, %v636_v58, %v637_v8  ;;  %v645_v17 = vsel %vm635_vm11, %v637_v8, 0 }
 0x27b   :  { %v649_v11 = vrot.slane %v638_v10, 1  ;;  %v656_v12 = vrot.slane %v638_v10, 2  ;;  %871 = vmatmul.bf16.gmra.mxu0 %v638_v10  ;;  %v651_v18 = vrot.slane %v645_v17, 1  ;;  %v658_v19 = vrot.slane %v645_v17, 2 }
 0x27d   :  { %v650_v15 = vsel %vm215_vm1, %v648_v13, %v649_v11  ;;  %v657_v16 = vsel %vm225_vm3, %v655_v14, %v656_v12  ;;  %v652_v20 = vsel %vm215_vm1, %v649_v11, %v651_v18  ;;  %v659_v21 = vsel %vm225_vm3, %v656_v12, %v658_v19 }
 0x27e   :  { %885 = vmatmul.bf16.vlgmr.msrb.gmra.mxu3 %v650_v15  ;;  %904 = vmatmul.bf16.vlgmr.msrb.gmra.mxu1 %v657_v16 }
 0x27f   :  { %1347 = vmatpush.bf16.msrb.mxu3 %v5565_v25  ;;  %1477 = vmatpush.bf16.msrb.mxu1 %v5565_v25 }
 0x283   :  { %1348 = vmatpush.bf16.msrb.mxu3 %v5582_v30  ;;  %1478 = vmatpush.bf16.msrb.mxu1 %v5582_v30 }
 0x28b   :  { %1035 = vmatmul.bf16.vlgmr.msra.gmra.mxu0 %v5341_v32 }
 0x28c   :  { %1412 = vmatpush.bf16.msra.mxu0 %v5565_v25 }
 0x28e   :  { %890 = vmatmul.bf16.gmra.mxu3 %v652_v20  ;;  %909 = vmatmul.bf16.gmra.mxu1 %v659_v21 }
 0x290   :  { %1413 = vmatpush.bf16.msra.mxu0 %v5582_v30 }
 0x2e7   :  { %v867_v33 = vpop.f32.mrf.mxu0 }
 0x2e8   :  { %v868_v38 = vadd.f32 %v4734_v35, %v867_v33 }
 0x2ef   :  { %v869_v36 = vpop.f32.mrf.mxu0 }
 0x2f0   :  { %v870_v41 = vadd.f32 %v4734_v35, %v869_v36 }
 0x2f8   :  { %v872_v45 = vpop.f32.mrf.mxu0 }
 0x2f9   :  { %v873_v52 = vadd.f32 %v4734_v35, %v872_v45 }
 0x2fb   :  { %v905_v34 = vpop.f32.mrf.mxu1 }
 0x300   :  { %v874_v53 = vpop.f32.mrf.mxu0 }
 0x301   :  { %v886_v37 = vpop.f32.mrf.mxu3  ;;  %v875_v55 = vadd.f32 %v4734_v35, %v874_v53 }
 0x302   :  { %v887_v39 = vadd.f32 %v886_v37, %v868_v38 }
 0x303   :  { %v907_v40 = vpop.f32.mrf.mxu1 }
 0x304   :  { %v906_v43 = vadd.f32 %v905_v34, %v887_v39 }
 0x306   :  { %v915_v47 = vmax.f32 %v906_v43, 0.0 }
 0x308   :  { %v1036_v0 = vpop.f32.mrf.mxu0 }
 0x309   :  { %v888_v42 = vpop.f32.mrf.mxu3 }
 0x30a   :  { %v889_v44 = vadd.f32 %v888_v42, %v870_v41 }
 0x30b   :  { %v910_v50 = vpop.f32.mrf.mxu1 }
 0x30c   :  { %v908_v46 = vadd.f32 %v907_v40, %v889_v44 }
 0x30e   :  { %v916_v48 = vmax.f32 %v908_v46, 0.0 }
 0x310   :  { %v919_v49 = vpack.c.bf16 %v916_v48, %v915_v47  ;;  %v1038_v1 = vpop.f32.mrf.mxu0 }
 0x311   :  { %v891_v51 = vpop.f32.mrf.mxu3 }
 0x312   :  { %997 = vmatmul.bf16.vlgmr.msrb.gmra.mxu2 %v919_v49  ;;  %v892_v54 = vadd.f32 %v891_v51, %v873_v52 }
 0x313   :  { %1542 = vmatpush.bf16.msrb.mxu2 %v5565_v25  ;;  %v912_v59 = vpop.f32.mrf.mxu1 }
 0x314   :  { %v911_v57 = vadd.f32 %v910_v50, %v892_v54 }
 0x316   :  { %v917_v61 = vmax.f32 %v911_v57, 0.0 }
 0x317   :  { %1543 = vmatpush.bf16.msrb.mxu2 %v5582_v30 }
 0x319   :  { %v893_v56 = vpop.f32.mrf.mxu3 }
 0x31a   :  { %v894_v58 = vadd.f32 %v893_v56, %v875_v55 }
 0x31c   :  { %v913_v60 = vadd.f32 %v912_v59, %v894_v58 }
 0x31e   :  { %v918_v62 = vmax.f32 %v913_v60, 0.0 }
 0x320   :  { %v920_v63 = vpack.c.bf16 %v918_v62, %v917_v61 }
 0x322   :  { %1002 = vmatmul.bf16.gmra.mxu2 %v920_v63 }
 0x395   :  { %v998_v3 = vpop.f32.mrf.mxu2 }
 0x396   :  { %v5612_v4 = vadd.f32 %v5609_v2, %v998_v3 }
 0x398   :  { %v1040_v5 = vadd.f32 %v1036_v0, %v5612_v4 }
 0x39a   :  { %4739 = vtanh.f32 %v1040_v5  ;;  %v4514_v10 = vmul.f32 -1.442695, %v1040_v5 }
 0x39c   :  { %4741 = vpow2.f32 %v4514_v10 }
 0x39d   :  { %v5615_v6 = vpop.f32.mrf.mxu2 }
 0x3a0   :  { %v4740_v7 = vpop.eup %4739 }
 0x3a1   :  { %1063 = vrot.lane.b32.xlu0 %v4740_v7, %s5329_s21 }
 0x3a2   :  { %v4742_v11 = vpop.eup %4741 }
 0x3a3   :  { %v1044_v12 = vadd.f32 1.0, %v4742_v11 }
 0x3a5   :  { %v1003_v8 = vpop.f32.mrf.mxu2  ;;  %4743 = vrcp.f32 %v1044_v12  ;;  %v1056_v18 = vand.u32 2147483648, %v1044_v12  ;;  %vm1050_vm14 = vweird.f32 %v1044_v12  ;;  %v1054_v19 = vand.u32 2147483647, %v1044_v12 }
 0x3a6   :  { %v5619_v9 = vadd.f32 %v5609_v2, %v1003_v8 }
 0x3a7   :  { %v1057_v21 = vor.u32 1.1754944e-38, %v1056_v18  ;;  %vm1055_vm1 = vcmp.eq.f32.partialorder %v1054_v19, 8.507059e+37 }
 0x3ab   :  { %v4744_v13 = vpop.eup %4743 }
 0x3ac   :  { %v1046_v14 = vmul.f32 %v4744_v13, %v1044_v12  ;;  %vm1051_vm13 = vweird.f32 %v4744_v13 }
 0x3ad   :  { %vm1052_vm15 = vmor %vm1050_vm14, %vm1051_vm13 }
 0x3ae   :  { %v1047_v15 = vsub.f32 1.0, %v1046_v14 }
 0x3b0   :  { %v1048_v16 = vmul.f32 %v4744_v13, %v1047_v15 }
 0x3b2   :  { %v1049_v17 = vadd.f32 %v4744_v13, %v1048_v16 }
 0x3b4   :  { %v1053_v20 = vsel %vm1052_vm15, %v4744_v13, %v1049_v17 }
 0x3b5   :  { %v1058_v23 = vsel %vm1055_vm1, %v1057_v21, %v1053_v20 }
 0x3b6   :  { %v1061_v26 = vmul.f32 0.0, %v1058_v23 }
 0x413   :  { %v1064_v22 = vpop.permute.xlu0 %1063 }
 0x414   :  { %v1066_v24 = vmul.f32 %v1064_v22, %v1058_v23 }
 0x416   :  { %1068 = vrot.lane.b32.xlu1 %v1066_v24, %s5342_s30 }
 0x488   :  { %v1069_v27 = vpop.permute.xlu1 %1068 }
 0x489   :  { %v1071_v28 = vadd.f32 %v1069_v27, %v1061_v26 }
 0x48b   :  { %4745 = vtanh.f32 %v1071_v28  ;;  %v1123_v56 = vrot.slane %v1071_v28, 6 }
 0x491   :  { %v4746_v29 = vpop.eup %4745 }
 0x492   :  { %1074 = vrot.lane.b32.xlu2 %v4746_v29, %s5329_s21 }
 0x4ec   :  { %v1075_v31 = vpop.permute.xlu2 %1074 }
 0x4ed   :  { %v5623_v33 = vmul.f32 %v1075_v31, %v1058_v23 }
 0x4ef   :  { %v1078_v34 = vpack.c.bf16 %v5623_v33, %v5623_v33 }
 0x4f1   :  { %1080 = vrot.lane.b32.xlu0 %v1078_v34, %s5342_s30 }
 0x563   :  { %v1081_v35 = vpop.permute.xlu0 %1080 }
 0x564   :  { %4515 = vmatmul.msk.bf16.vlgmr.msra.gmra.mxu3 %vm1024_vm2, %v1081_v35 }
 0x565   :  { %1603 = vmatpush.bf16.msra.mxu3 %v5565_v25 }
 0x569   :  { %1604 = vmatpush.bf16.msra.mxu3 %v5582_v30 }
 0x5e7   :  { %v1094_v36 = vpop.f32.mrf.mxu3 }
 0x5e8   :  { %v1099_v37 = vrot.slane %v1094_v36, 6 }
 0x5ea   :  { %v1101_v38 = vadd.f32 %v1099_v37, %v5612_v4 }
 0x5ec   :  { %4747 = vtanh.f32 %v1101_v38  ;;  %v4516_v41 = vmul.f32 -1.442695, %v1101_v38 }
 0x5ee   :  { %4749 = vpow2.f32 %v4516_v41 }
 0x5ef   :  { %v1096_v39 = vpop.f32.mrf.mxu3 }
 0x5f2   :  { %v4748_v40 = vpop.eup %4747 }
 0x5f3   :  { %1127 = vrot.lane.b32.xlu1 %v4748_v40, %s5329_s21 }
 0x5f4   :  { %v4750_v42 = vpop.eup %4749 }
 0x5f5   :  { %v1105_v43 = vadd.f32 1.0, %v4750_v42 }
 0x5f7   :  { %4751 = vrcp.f32 %v1105_v43  ;;  %v1117_v49 = vand.u32 2147483648, %v1105_v43  ;;  %vm1111_vm7 = vweird.f32 %v1105_v43  ;;  %v1115_v50 = vand.u32 2147483647, %v1105_v43 }
 0x5f9   :  { %v1118_v52 = vor.u32 1.1754944e-38, %v1117_v49  ;;  %vm1116_vm9 = vcmp.eq.f32.partialorder %v1115_v50, 8.507059e+37 }
 0x5fd   :  { %v4752_v44 = vpop.eup %4751 }
 0x5fe   :  { %v1107_v45 = vmul.f32 %v4752_v44, %v1105_v43  ;;  %vm1112_vm6 = vweird.f32 %v4752_v44 }
 0x5ff   :  { %vm1113_vm8 = vmor %vm1111_vm7, %vm1112_vm6 }
 0x600   :  { %v1108_v46 = vsub.f32 1.0, %v1107_v45 }
 0x602   :  { %v1109_v47 = vmul.f32 %v4752_v44, %v1108_v46 }
 0x604   :  { %v1110_v48 = vadd.f32 %v4752_v44, %v1109_v47 }
 0x606   :  { %v1114_v51 = vsel %vm1113_vm8, %v4752_v44, %v1110_v48 }
 0x607   :  { %v1119_v54 = vsel %vm1116_vm9, %v1118_v52, %v1114_v51 }
 0x608   :  { %v1125_v57 = vmul.f32 %v1123_v56, %v1119_v54 }
 0x665   :  { %v1128_v53 = vpop.permute.xlu1 %1127 }
 0x666   :  { %v1130_v55 = vmul.f32 %v1128_v53, %v1119_v54 }
 0x668   :  { %1132 = vrot.lane.b32.xlu2 %v1130_v55, %s5342_s30 }
 0x6c2   :  { %v1133_v58 = vpop.permute.xlu2 %1132 }
 0x6c3   :  { %v1135_v59 = vadd.f32 %v1133_v58, %v1125_v57 }
 0x6c5   :  { %4753 = vtanh.f32 %v1135_v59  ;;  %v1188_v27 = vrot.slane %v1135_v59, 6 }
 0x6cb   :  { %v4754_v60 = vpop.eup %4753 }
 0x6cc   :  { %1138 = vrot.lane.b32.xlu0 %v4754_v60, %s5329_s21 }
 0x73e   :  { %v1139_v61 = vpop.permute.xlu0 %1138 }
 0x73f   :  { %v1141_v62 = vmul.f32 %v1139_v61, %v1119_v54 }
 0x741   :  { %v1142_v63 = vpack.c.bf16 %v1141_v62, %v1141_v62  ;;  %v2040_v37 = vsel %vm203_vm0, %v5623_v33, %v1141_v62 }
 0x743   :  { %v1144_v0 = vrot.slane %v1142_v63, 1 }
 0x745   :  { %1145 = vrot.lane.b32.xlu1 %v1144_v0, %s5342_s30 }
 0x7b7   :  { %v1146_v1 = vpop.permute.xlu1 %1145 }
 0x7b8   :  { %4517 = vmatmul.msk.bf16.vlgmr.msrb.gmra.mxu0 %vm1024_vm2, %v1146_v1 }
 0x7b9   :  { %1668 = vmatpush.bf16.msrb.mxu0 %v5565_v25 }
 0x7bd   :  { %1669 = vmatpush.bf16.msrb.mxu0 %v5582_v30 }
 0x835   :  { %v1159_v3 = vpop.f32.mrf.mxu0 }
 0x836   :  { %v1164_v5 = vrot.slane %v1159_v3, 4 }
 0x838   :  { %v1166_v7 = vadd.f32 %v1164_v5, %v5612_v4 }
 0x83a   :  { %4755 = vtanh.f32 %v1166_v7  ;;  %v4518_v11 = vmul.f32 -1.442695, %v1166_v7 }
 0x83c   :  { %4757 = vpow2.f32 %v4518_v11  ;;  %v5661_v11 = vpop.f32.mrf.mxu2 }
 0x83d   :  { %v1161_v8 = vpop.f32.mrf.mxu0 }
 0x840   :  { %v4756_v10 = vpop.eup %4755 }
 0x841   :  { %1192 = vrot.lane.b32.xlu2 %v4756_v10, %s5329_s21 }
 0x842   :  { %v4758_v12 = vpop.eup %4757 }
 0x843   :  { %v1170_v13 = vadd.f32 1.0, %v4758_v12  ;;  %v5665_v12 = vadd.f32 %v5609_v2, %v5615_v6 }
 0x845   :  { %4759 = vrcp.f32 %v1170_v13  ;;  %v1182_v19 = vand.u32 2147483648, %v1170_v13  ;;  %vm1176_vm11 = vweird.f32 %v1170_v13  ;;  %v1180_v20 = vand.u32 2147483647, %v1170_v13 }
 0x847   :  { %v1183_v22 = vor.u32 1.1754944e-38, %v1182_v19  ;;  %vm1181_vm13 = vcmp.eq.f32.partialorder %v1180_v20, 8.507059e+37 }
 0x84b   :  { %v4760_v14 = vpop.eup %4759 }
 0x84c   :  { %v1172_v15 = vmul.f32 %v4760_v14, %v1170_v13  ;;  %vm1177_vm10 = vweird.f32 %v4760_v14 }
 0x84d   :  { %vm1178_vm12 = vmor %vm1176_vm11, %vm1177_vm10 }
 0x84e   :  { %v1173_v16 = vsub.f32 1.0, %v1172_v15 }
 0x850   :  { %v1174_v17 = vmul.f32 %v4760_v14, %v1173_v16 }
 0x852   :  { %v1175_v18 = vadd.f32 %v4760_v14, %v1174_v17 }
 0x854   :  { %v1179_v21 = vsel %vm1178_vm12, %v4760_v14, %v1175_v18 }
 0x855   :  { %v1184_v24 = vsel %vm1181_vm13, %v1183_v22, %v1179_v21 }
 0x856   :  { %v1190_v28 = vmul.f32 %v1188_v27, %v1184_v24 }
 0x89b   :  { %v1193_v23 = vpop.permute.xlu2 %1192 }
 0x89c   :  { %v1195_v26 = vmul.f32 %v1193_v23, %v1184_v24 }
 0x89e   :  { %1197 = vrot.lane.b32.xlu0 %v1195_v26, %s5342_s30 }
 0x910   :  { %v1198_v29 = vpop.permute.xlu0 %1197 }
 0x911   :  { %v1200_v31 = vadd.f32 %v1198_v29, %v1190_v28 }
 0x913   :  { %4761 = vtanh.f32 %v1200_v31  ;;  %v1253_v60 = vrot.slane %v1200_v31, 6 }
 0x919   :  { %v4762_v34 = vpop.eup %4761 }
 0x91a   :  { %1203 = vrot.lane.b32.xlu1 %v4762_v34, %s5329_s21 }
 0x98c   :  { %v1204_v35 = vpop.permute.xlu1 %1203 }
 0x98d   :  { %v1206_v36 = vmul.f32 %v1204_v35, %v1184_v24 }
 0x98f   :  { %v1207_v38 = vpack.c.bf16 %v1206_v36, %v1206_v36  ;;  %v2042_v39 = vsel %vm245_vm4, %v2040_v37, %v1206_v36 }
 0x991   :  { %v1209_v40 = vrot.slane %v1207_v38, 2 }
 0x993   :  { %1210 = vrot.lane.b32.xlu2 %v1209_v40, %s5342_s30 }
 0x9ed   :  { %v1211_v41 = vpop.permute.xlu2 %1210 }
 0x9ee   :  { %4519 = vmatmul.msk.bf16.vlgmr.msra.gmra.mxu1 %vm1024_vm2, %v1211_v41 }
 0x9ef   :  { %1733 = vmatpush.bf16.msra.mxu1 %v5565_v25 }
 0x9f3   :  { %1734 = vmatpush.bf16.msra.mxu1 %v5582_v30 }
 0xa6b   :  { %v1224_v42 = vpop.f32.mrf.mxu1 }
 0xa6c   :  { %v1229_v43 = vrot.slane %v1224_v42, 2 }
 0xa6e   :  { %v1231_v44 = vadd.f32 %v1229_v43, %v5612_v4 }
 0xa70   :  { %4763 = vtanh.f32 %v1231_v44  ;;  %v4520_v46 = vmul.f32 -1.442695, %v1231_v44 }
 0xa72   :  { %4765 = vpow2.f32 %v4520_v46 }
 0xa73   :  { %v1226_v45 = vpop.f32.mrf.mxu1 }
 0xa76   :  { %v4764_v33 = vpop.eup %4763 }
 0xa77   :  { %1257 = vrot.lane.b32.xlu0 %v4764_v33, %s5329_s21 }
 0xa78   :  { %v4766_v47 = vpop.eup %4765 }
 0xa79   :  { %v1235_v48 = vadd.f32 1.0, %v4766_v47 }
 0xa7b   :  { %4767 = vrcp.f32 %v1235_v48  ;;  %v1247_v54 = vand.u32 2147483648, %v1235_v48  ;;  %vm1241_vm15 = vweird.f32 %v1235_v48  ;;  %v1245_v55 = vand.u32 2147483647, %v1235_v48 }
 0xa7d   :  { %v1248_v56 = vor.u32 1.1754944e-38, %v1247_v54  ;;  %vm1246_vm6 = vcmp.eq.f32.partialorder %v1245_v55, 8.507059e+37 }
 0xa81   :  { %v4768_v49 = vpop.eup %4767 }
 0xa82   :  { %v1237_v50 = vmul.f32 %v4768_v49, %v1235_v48  ;;  %vm1242_vm14 = vweird.f32 %v4768_v49 }
 0xa83   :  { %vm1243_vm1 = vmor %vm1241_vm15, %vm1242_vm14 }
 0xa84   :  { %v1238_v51 = vsub.f32 1.0, %v1237_v50 }
 0xa86   :  { %v1239_v52 = vmul.f32 %v4768_v49, %v1238_v51 }
 0xa88   :  { %v1240_v53 = vadd.f32 %v4768_v49, %v1239_v52 }
 0xa8a   :  { %v1244_v4 = vsel %vm1243_vm1, %v4768_v49, %v1240_v53 }
 0xa8b   :  { %v1249_v58 = vsel %vm1246_vm6, %v1248_v56, %v1244_v4 }
 0xa8c   :  { %v1255_v61 = vmul.f32 %v1253_v60, %v1249_v58 }
 0xae9   :  { %v1258_v57 = vpop.permute.xlu0 %1257 }
 0xaea   :  { %v1260_v59 = vmul.f32 %v1258_v57, %v1249_v58 }
 0xaec   :  { %1262 = vrot.lane.b32.xlu1 %v1260_v59, %s5342_s30 }
 0xb5e   :  { %v1263_v62 = vpop.permute.xlu1 %1262 }
 0xb5f   :  { %v1265_v63 = vadd.f32 %v1263_v62, %v1255_v61 }
 0xb61   :  { %4769 = vtanh.f32 %v1265_v63  ;;  %v1315_v34 = vrot.slane %v1265_v63, 6 }
 0xb67   :  { %v4770_v0 = vpop.eup %4769 }
 0xb68   :  { %1268 = vrot.lane.b32.xlu2 %v4770_v0, %s5329_s21 }
 0xbc2   :  { %v1269_v1 = vpop.permute.xlu2 %1268 }
 0xbc3   :  { %v1271_v3 = vmul.f32 %v1269_v1, %v1249_v58 }
 0xbc5   :  { %v1272_v5 = vpack.c.bf16 %v1271_v3, %v1271_v3  ;;  %v5655_v7 = vsel %vm225_vm3, %v2042_v39, %v1271_v3 }
 0xbc7   :  { %v1274_v8 = vrot.slane %v1272_v5, 3 }
 0xbc9   :  { %1275 = vrot.lane.b32.xlu0 %v1274_v8, %s5342_s30 }
 0xc3b   :  { %v1276_v10 = vpop.permute.xlu0 %1275 }
 0xc3c   :  { %4521 = vmatmul.msk.bf16.vlgmr.msra.gmra.mxu2 %vm1024_vm2, %v1276_v10 }
 0xc3d   :  { %1798 = vmatpush.bf16.msra.mxu2 %v5565_v25 }
 0xc41   :  { %1799 = vmatpush.bf16.msra.mxu2 %v5582_v30 }
 0xcbf   :  { %v1289_v13 = vpop.f32.mrf.mxu2 }
 0xcc0   :  { %v1293_v14 = vadd.f32 %v1289_v13, %v5665_v12 }
 0xcc2   :  { %4771 = vtanh.f32 %v1293_v14  ;;  %v4522_v17 = vmul.f32 -1.442695, %v1293_v14 }
 0xcc4   :  { %4773 = vpow2.f32 %v4522_v17 }
 0xcc7   :  { %v1291_v15 = vpop.f32.mrf.mxu2 }
 0xcc8   :  { %v4772_v16 = vpop.eup %4771 }
 0xcc9   :  { %1319 = vrot.lane.b32.xlu1 %v4772_v16, %s5329_s21 }
 0xcca   :  { %v4774_v18 = vpop.eup %4773 }
 0xccb   :  { %v1297_v19 = vadd.f32 1.0, %v4774_v18 }
 0xccd   :  { %4775 = vrcp.f32 %v1297_v19  ;;  %v1309_v2 = vand.u32 2147483648, %v1297_v19  ;;  %vm1303_vm8 = vweird.f32 %v1297_v19  ;;  %v1307_v6 = vand.u32 2147483647, %v1297_v19 }
 0xccf   :  { %v1310_v27 = vor.u32 1.1754944e-38, %v1309_v2  ;;  %vm1308_vm10 = vcmp.eq.f32.partialorder %v1307_v6, 8.507059e+37 }
 0xcd3   :  { %v4776_v20 = vpop.eup %4775 }
 0xcd4   :  { %v1299_v21 = vmul.f32 %v4776_v20, %v1297_v19  ;;  %vm1304_vm7 = vweird.f32 %v4776_v20 }
 0xcd5   :  { %vm1305_vm9 = vmor %vm1303_vm8, %vm1304_vm7 }
 0xcd6   :  { %v1300_v22 = vsub.f32 1.0, %v1299_v21 }
 0xcd8   :  { %v1301_v23 = vmul.f32 %v4776_v20, %v1300_v22 }
 0xcda   :  { %v1302_v24 = vadd.f32 %v4776_v20, %v1301_v23 }
 0xcdc   :  { %v1306_v26 = vsel %vm1305_vm9, %v4776_v20, %v1302_v24 }
 0xcdd   :  { %v1311_v29 = vsel %vm1308_vm10, %v1310_v27, %v1306_v26 }
 0xcde   :  { %v1317_v35 = vmul.f32 %v1315_v34, %v1311_v29 }
 0xd3b   :  { %v1320_v28 = vpop.permute.xlu1 %1319 }
 0xd3c   :  { %v1322_v31 = vmul.f32 %v1320_v28, %v1311_v29 }
 0xd3e   :  { %1324 = vrot.lane.b32.xlu2 %v1322_v31, %s5342_s30 }
 0xd98   :  { %v1325_v36 = vpop.permute.xlu2 %1324 }
 0xd99   :  { %v1327_v37 = vadd.f32 %v1325_v36, %v1317_v35 }
 0xd9b   :  { %4777 = vtanh.f32 %v1327_v37  ;;  %v1379_v61 = vrot.slane %v1327_v37, 6 }
 0xda1   :  { %v4778_v38 = vpop.eup %4777 }
 0xda2   :  { %1330 = vrot.lane.b32.xlu0 %v4778_v38, %s5329_s21 }
 0xe14   :  { %v1331_v39 = vpop.permute.xlu0 %1330 }
 0xe15   :  { %v5671_v40 = vmul.f32 %v1331_v39, %v1311_v29 }
 0xe17   :  { %v1334_v41 = vpack.c.bf16 %v5671_v40, %v5671_v40 }
 0xe19   :  { %1336 = vrot.lane.b32.xlu1 %v1334_v41, %s5342_s30 }
 0xe8b   :  { %v1337_v42 = vpop.permute.xlu1 %1336 }
 0xe8c   :  { %4523 = vmatmul.msk.bf16.vlgmr.msrb.gmra.mxu3 %vm1024_vm2, %v1337_v42 }
 0xe8d   :  { %1859 = vmatpush.bf16.msrb.mxu3 %v5565_v25 }
 0xe91   :  { %1860 = vmatpush.bf16.msrb.mxu3 %v5582_v30 }
 0xf0f   :  { %v1350_v43 = vpop.f32.mrf.mxu3 }
 0xf10   :  { %v1355_v44 = vrot.slane %v1350_v43, 6 }
 0xf12   :  { %v1357_v45 = vadd.f32 %v1355_v44, %v5665_v12 }
 0xf14   :  { %4779 = vtanh.f32 %v1357_v45  ;;  %v4524_v47 = vmul.f32 -1.442695, %v1357_v45 }
 0xf16   :  { %4781 = vpow2.f32 %v4524_v47 }
 0xf17   :  { %v1352_v33 = vpop.f32.mrf.mxu3 }
 0xf1a   :  { %v4780_v46 = vpop.eup %4779 }
 0xf1b   :  { %1383 = vrot.lane.b32.xlu2 %v4780_v46, %s5329_s21 }
 0xf1c   :  { %v4782_v48 = vpop.eup %4781 }
 0xf1d   :  { %v1361_v49 = vadd.f32 1.0, %v4782_v48 }
 0xf1f   :  { %4783 = vrcp.f32 %v1361_v49  ;;  %v1373_v55 = vand.u32 2147483648, %v1361_v49  ;;  %vm1367_vm12 = vweird.f32 %v1361_v49  ;;  %v1371_v4 = vand.u32 2147483647, %v1361_v49 }
 0xf21   :  { %v1374_v57 = vor.u32 1.1754944e-38, %v1373_v55  ;;  %vm1372_vm14 = vcmp.eq.f32.partialorder %v1371_v4, 8.507059e+37 }
 0xf25   :  { %v4784_v50 = vpop.eup %4783 }
 0xf26   :  { %v1363_v51 = vmul.f32 %v4784_v50, %v1361_v49  ;;  %vm1368_vm11 = vweird.f32 %v4784_v50 }
 0xf27   :  { %vm1369_vm13 = vmor %vm1367_vm12, %vm1368_vm11 }
 0xf28   :  { %v1364_v52 = vsub.f32 1.0, %v1363_v51 }
 0xf2a   :  { %v1365_v53 = vmul.f32 %v4784_v50, %v1364_v52 }
 0xf2c   :  { %v1366_v54 = vadd.f32 %v4784_v50, %v1365_v53 }
 0xf2e   :  { %v1370_v56 = vsel %vm1369_vm13, %v4784_v50, %v1366_v54 }
 0xf2f   :  { %v1375_v59 = vsel %vm1372_vm14, %v1374_v57, %v1370_v56 }
 0xf30   :  { %v1381_v62 = vmul.f32 %v1379_v61, %v1375_v59 }
 0xf75   :  { %v1384_v58 = vpop.permute.xlu2 %1383 }
 0xf76   :  { %v1386_v60 = vmul.f32 %v1384_v58, %v1375_v59 }
 0xf78   :  { %1388 = vrot.lane.b32.xlu0 %v1386_v60, %s5342_s30 }
 0xfea   :  { %v1389_v63 = vpop.permute.xlu0 %1388 }
 0xfeb   :  { %v1391_v0 = vadd.f32 %v1389_v63, %v1381_v62 }
 0xfed   :  { %4785 = vtanh.f32 %v1391_v0  ;;  %v1444_v36 = vrot.slane %v1391_v0, 6 }
 0xff3   :  { %v4786_v1 = vpop.eup %4785 }
 0xff4   :  { %1394 = vrot.lane.b32.xlu1 %v4786_v1, %s5329_s21 }
0x1066   :  { %v1395_v3 = vpop.permute.xlu1 %1394 }
0x1067   :  { %v1397_v5 = vmul.f32 %v1395_v3, %v1375_v59 }
0x1069   :  { %v1398_v8 = vpack.c.bf16 %v1397_v5, %v1397_v5  ;;  %v2045_v44 = vsel %vm203_vm0, %v5671_v40, %v1397_v5 }
0x106b   :  { %v1400_v10 = vrot.slane %v1398_v8, 1 }
0x106d   :  { %1401 = vrot.lane.b32.xlu2 %v1400_v10, %s5342_s30 }
0x10c7   :  { %v1402_v13 = vpop.permute.xlu2 %1401 }
0x10c8   :  { %4525 = vmatmul.msk.bf16.vlgmr.msra.gmra.mxu0 %vm1024_vm2, %v1402_v13 }
0x10c9   :  { %1924 = vmatpush.bf16.msra.mxu0 %v5565_v25 }
0x10cd   :  { %1925 = vmatpush.bf16.msra.mxu0 %v5582_v30 }
0x1145   :  { %v1415_v14 = vpop.f32.mrf.mxu0 }
0x1146   :  { %v1420_v15 = vrot.slane %v1415_v14, 4 }
0x1148   :  { %v1422_v16 = vadd.f32 %v1420_v15, %v5665_v12 }
0x114a   :  { %4787 = vtanh.f32 %v1422_v16  ;;  %v4526_v19 = vmul.f32 -1.442695, %v1422_v16 }
0x114c   :  { %4789 = vpow2.f32 %v4526_v19 }
0x114d   :  { %v1417_v17 = vpop.f32.mrf.mxu0 }
0x1150   :  { %v4788_v18 = vpop.eup %4787 }
0x1151   :  { %1448 = vrot.lane.b32.xlu0 %v4788_v18, %s5329_s21 }
0x1152   :  { %v4790_v20 = vpop.eup %4789 }
0x1153   :  { %v1426_v21 = vadd.f32 1.0, %v4790_v20 }
0x1155   :  { %4791 = vrcp.f32 %v1426_v21  ;;  %v1438_v26 = vand.u32 2147483648, %v1426_v21  ;;  %vm1432_vm1 = vweird.f32 %v1426_v21  ;;  %v1436_v27 = vand.u32 2147483647, %v1426_v21 }
0x1157   :  { %v1439_v29 = vor.u32 1.1754944e-38, %v1438_v26  ;;  %vm1437_vm7 = vcmp.eq.f32.partialorder %v1436_v27, 8.507059e+37 }
0x115b   :  { %v4792_v22 = vpop.eup %4791 }
0x115c   :  { %v1428_v23 = vmul.f32 %v4792_v22, %v1426_v21  ;;  %vm1433_vm15 = vweird.f32 %v4792_v22 }
0x115d   :  { %vm1434_vm6 = vmor %vm1432_vm1, %vm1433_vm15 }
0x115e   :  { %v1429_v24 = vsub.f32 1.0, %v1428_v23 }
0x1160   :  { %v1430_v2 = vmul.f32 %v4792_v22, %v1429_v24 }
0x1162   :  { %v1431_v6 = vadd.f32 %v4792_v22, %v1430_v2 }
0x1164   :  { %v1435_v28 = vsel %vm1434_vm6, %v4792_v22, %v1431_v6 }
0x1165   :  { %v1440_v34 = vsel %vm1437_vm7, %v1439_v29, %v1435_v28 }
0x1166   :  { %v1446_v37 = vmul.f32 %v1444_v36, %v1440_v34 }
0x11c3   :  { %v1449_v31 = vpop.permute.xlu0 %1448 }
0x11c4   :  { %v1451_v35 = vmul.f32 %v1449_v31, %v1440_v34 }
0x11c6   :  { %1453 = vrot.lane.b32.xlu1 %v1451_v35, %s5342_s30 }
0x1238   :  { %v1454_v38 = vpop.permute.xlu1 %1453 }
0x1239   :  { %v1456_v39 = vadd.f32 %v1454_v38, %v1446_v37 }
0x123b   :  { %4793 = vtanh.f32 %v1456_v39  ;;  %v1509_v63 = vrot.slane %v1456_v39, 6 }
0x1241   :  { %v4794_v41 = vpop.eup %4793 }
0x1242   :  { %1459 = vrot.lane.b32.xlu2 %v4794_v41, %s5329_s21 }
0x129c   :  { %v1460_v42 = vpop.permute.xlu2 %1459 }
0x129d   :  { %v1462_v43 = vmul.f32 %v1460_v42, %v1440_v34 }
0x129f   :  { %v1463_v45 = vpack.c.bf16 %v1462_v43, %v1462_v43  ;;  %v2046_v33 = vsel %vm245_vm4, %v2045_v44, %v1462_v43 }
0x12a1   :  { %v1465_v46 = vrot.slane %v1463_v45, 2 }
0x12a3   :  { %1466 = vrot.lane.b32.xlu0 %v1465_v46, %s5342_s30 }
0x1315   :  { %v1467_v47 = vpop.permute.xlu0 %1466 }
0x1316   :  { %4527 = vmatmul.msk.bf16.vlgmr.msrb.gmra.mxu1 %vm1024_vm2, %v1467_v47 }
0x1317   :  { %1989 = vmatpush.bf16.msrb.mxu1 %v5565_v25 }
0x131b   :  { %1990 = vmatpush.bf16.msrb.mxu1 %v5582_v30 }
0x1393   :  { %v1480_v48 = vpop.f32.mrf.mxu1 }
0x1394   :  { %v1485_v49 = vrot.slane %v1480_v48, 2 }
0x1396   :  { %v1487_v50 = vadd.f32 %v1485_v49, %v5665_v12 }
0x1398   :  { %4795 = vtanh.f32 %v1487_v50  ;;  %v4528_v52 = vmul.f32 -1.442695, %v1487_v50 }
0x139a   :  { %4797 = vpow2.f32 %v4528_v52 }
0x139b   :  { %v1482_v51 = vpop.f32.mrf.mxu1 }
0x139e   :  { %v4796_v40 = vpop.eup %4795 }
0x139f   :  { %1513 = vrot.lane.b32.xlu1 %v4796_v40, %s5329_s21 }
0x13a0   :  { %v4798_v53 = vpop.eup %4797 }
0x13a1   :  { %v1491_v54 = vadd.f32 1.0, %v4798_v53 }
0x13a3   :  { %4799 = vrcp.f32 %v1491_v54  ;;  %v1503_v30 = vand.u32 2147483648, %v1491_v54  ;;  %vm1497_vm9 = vweird.f32 %v1491_v54  ;;  %v1501_v58 = vand.u32 2147483647, %v1491_v54 }
0x13a5   :  { %v1504_v59 = vor.u32 1.1754944e-38, %v1503_v30  ;;  %vm1502_vm11 = vcmp.eq.f32.partialorder %v1501_v58, 8.507059e+37 }
0x13a9   :  { %v4800_v55 = vpop.eup %4799 }
0x13aa   :  { %v1493_v4 = vmul.f32 %v4800_v55, %v1491_v54  ;;  %vm1498_vm8 = vweird.f32 %v4800_v55 }
0x13ab   :  { %vm1499_vm10 = vmor %vm1497_vm9, %vm1498_vm8 }
0x13ac   :  { %v1494_v56 = vsub.f32 1.0, %v1493_v4 }
0x13ae   :  { %v1495_v25 = vmul.f32 %v4800_v55, %v1494_v56 }
0x13b0   :  { %v1496_v57 = vadd.f32 %v4800_v55, %v1495_v25 }
0x13b2   :  { %v1500_v12 = vsel %vm1499_vm10, %v4800_v55, %v1496_v57 }
0x13b3   :  { %v1505_v61 = vsel %vm1502_vm11, %v1504_v59, %v1500_v12 }
0x13b4   :  { %v1511_v0 = vmul.f32 %v1509_v63, %v1505_v61 }
0x1411   :  { %v1514_v60 = vpop.permute.xlu1 %1513 }
0x1412   :  { %v1516_v62 = vmul.f32 %v1514_v60, %v1505_v61 }
0x1414   :  { %1518 = vrot.lane.b32.xlu2 %v1516_v62, %s5342_s30 }
0x146e   :  { %v1519_v1 = vpop.permute.xlu2 %1518 }
0x146f   :  { %v1521_v3 = vadd.f32 %v1519_v1, %v1511_v0 }
0x1471   :  { %4801 = vtanh.f32 %v1521_v3  ;;  %v1571_v39 = vrot.slane %v1521_v3, 6 }
0x1477   :  { %v4802_v5 = vpop.eup %4801 }
0x1478   :  { %1524 = vrot.lane.b32.xlu0 %v4802_v5, %s5329_s21 }
0x14ea   :  { %v1525_v8 = vpop.permute.xlu0 %1524 }
0x14eb   :  { %v1527_v10 = vmul.f32 %v1525_v8, %v1505_v61 }
0x14ed   :  { %v1528_v13 = vpack.c.bf16 %v1527_v10, %v1527_v10  ;;  %v5703_v14 = vsel %vm225_vm3, %v2046_v33, %v1527_v10 }
0x14ee   :  { %v2054_v15 = vpack.c.bf16 %v5703_v14, %v5655_v7 }
0x14ef   :  { %v1530_v16 = vrot.slane %v1528_v13, 3 }
0x14f1   :  { %1531 = vrot.lane.b32.xlu1 %v1530_v16, %s5342_s30 }
0x1563   :  { %v1532_v17 = vpop.permute.xlu1 %1531 }
0x1564   :  { %4529 = vmatmul.msk.bf16.vlgmr.msrb.gmra.mxu2 %vm1024_vm2, %v1532_v17 }
0x15e7   :  { %v1545_v18 = vpop.f32.mrf.mxu2 }
0x15e8   :  { %v1549_v19 = vadd.f32 %v1545_v18, %v5619_v9 }
0x15ea   :  { %4803 = vtanh.f32 %v1549_v19  ;;  %v4530_v22 = vmul.f32 -1.442695, %v1549_v19 }
0x15ec   :  { %4805 = vpow2.f32 %v4530_v22 }
0x15ef   :  { %v1547_v20 = vpop.f32.mrf.mxu2 }
0x15f0   :  { %v4804_v21 = vpop.eup %4803 }
0x15f1   :  { %1575 = vrot.lane.b32.xlu2 %v4804_v21, %s5329_s21 }
0x15f2   :  { %v4806_v23 = vpop.eup %4805 }
0x15f3   :  { %v1553_v24 = vadd.f32 1.0, %v4806_v23 }
0x15f5   :  { %4807 = vrcp.f32 %v1553_v24  ;;  %v1565_v29 = vand.u32 2147483648, %v1553_v24  ;;  %vm1559_vm13 = vweird.f32 %v1553_v24  ;;  %v1563_v31 = vand.u32 2147483647, %v1553_v24 }
0x15f7   :  { %v1566_v35 = vor.u32 1.1754944e-38, %v1565_v29  ;;  %vm1564_vm15 = vcmp.eq.f32.partialorder %v1563_v31, 8.507059e+37 }
0x15fb   :  { %v4808_v2 = vpop.eup %4807 }
0x15fc   :  { %v1555_v6 = vmul.f32 %v4808_v2, %v1553_v24  ;;  %vm1560_vm12 = vweird.f32 %v4808_v2 }
0x15fd   :  { %vm1561_vm14 = vmor %vm1559_vm13, %vm1560_vm12 }
0x15fe   :  { %v1556_v26 = vsub.f32 1.0, %v1555_v6 }
0x1600   :  { %v1557_v27 = vmul.f32 %v4808_v2, %v1556_v26 }
0x1602   :  { %v1558_v28 = vadd.f32 %v4808_v2, %v1557_v27 }
0x1604   :  { %v1562_v34 = vsel %vm1561_vm14, %v4808_v2, %v1558_v28 }
0x1605   :  { %v1567_v37 = vsel %vm1564_vm15, %v1566_v35, %v1562_v34 }
0x1606   :  { %v1573_v41 = vmul.f32 %v1571_v39, %v1567_v37 }
0x164b   :  { %v1576_v36 = vpop.permute.xlu2 %1575 }
0x164c   :  { %v1578_v38 = vmul.f32 %v1576_v36, %v1567_v37 }
0x164e   :  { %1580 = vrot.lane.b32.xlu0 %v1578_v38, %s5342_s30 }
0x16c0   :  { %v1581_v42 = vpop.permute.xlu0 %1580 }
0x16c1   :  { %v1583_v43 = vadd.f32 %v1581_v42, %v1573_v41 }
0x16c3   :  { %4809 = vtanh.f32 %v1583_v43  ;;  %v1635_v63 = vrot.slane %v1583_v43, 6 }
0x16c9   :  { %v4810_v44 = vpop.eup %4809 }
0x16ca   :  { %1586 = vrot.lane.b32.xlu1 %v4810_v44, %s5329_s21 }
0x173c   :  { %v1587_v45 = vpop.permute.xlu1 %1586 }
0x173d   :  { %v5713_v33 = vmul.f32 %v1587_v45, %v1567_v37 }
0x173f   :  { %v1590_v46 = vpack.c.bf16 %v5713_v33, %v5713_v33 }
0x1741   :  { %1592 = vrot.lane.b32.xlu2 %v1590_v46, %s5342_s30 }
0x179b   :  { %v1593_v47 = vpop.permute.xlu2 %1592 }
0x179c   :  { %4531 = vmatmul.msk.bf16.vlgmr.msra.gmra.mxu3 %vm1024_vm2, %v1593_v47 }
0x181f   :  { %v1606_v48 = vpop.f32.mrf.mxu3 }
0x1820   :  { %v1611_v49 = vrot.slane %v1606_v48, 6 }
0x1822   :  { %v1613_v50 = vadd.f32 %v1611_v49, %v5619_v9 }
0x1824   :  { %4811 = vtanh.f32 %v1613_v50  ;;  %v4532_v52 = vmul.f32 -1.442695, %v1613_v50 }
0x1826   :  { %4813 = vpow2.f32 %v4532_v52 }
0x1827   :  { %v1608_v51 = vpop.f32.mrf.mxu3 }
0x182a   :  { %v4812_v40 = vpop.eup %4811 }
0x182b   :  { %1639 = vrot.lane.b32.xlu0 %v4812_v40, %s5329_s21 }
0x182c   :  { %v4814_v53 = vpop.eup %4813 }
0x182d   :  { %v1617_v54 = vadd.f32 1.0, %v4814_v53 }
0x182f   :  { %4815 = vrcp.f32 %v1617_v54  ;;  %v1629_v30 = vand.u32 2147483648, %v1617_v54  ;;  %vm1623_vm6 = vweird.f32 %v1617_v54  ;;  %v1627_v58 = vand.u32 2147483647, %v1617_v54 }
0x1831   :  { %v1630_v59 = vor.u32 1.1754944e-38, %v1629_v30  ;;  %vm1628_vm8 = vcmp.eq.f32.partialorder %v1627_v58, 8.507059e+37 }
0x1835   :  { %v4816_v55 = vpop.eup %4815 }
0x1836   :  { %v1619_v4 = vmul.f32 %v4816_v55, %v1617_v54  ;;  %vm1624_vm1 = vweird.f32 %v4816_v55 }
0x1837   :  { %vm1625_vm7 = vmor %vm1623_vm6, %vm1624_vm1 }
0x1838   :  { %v1620_v56 = vsub.f32 1.0, %v1619_v4 }
0x183a   :  { %v1621_v25 = vmul.f32 %v4816_v55, %v1620_v56 }
0x183c   :  { %v1622_v57 = vadd.f32 %v4816_v55, %v1621_v25 }
0x183e   :  { %v1626_v12 = vsel %vm1625_vm7, %v4816_v55, %v1622_v57 }
0x183f   :  { %v1631_v61 = vsel %vm1628_vm8, %v1630_v59, %v1626_v12 }
0x1840   :  { %v1637_v0 = vmul.f32 %v1635_v63, %v1631_v61 }
0x189d   :  { %v1640_v60 = vpop.permute.xlu0 %1639 }
0x189e   :  { %v1642_v62 = vmul.f32 %v1640_v60, %v1631_v61 }
0x18a0   :  { %1644 = vrot.lane.b32.xlu1 %v1642_v62, %s5342_s30 }
0x1912   :  { %v1645_v1 = vpop.permute.xlu1 %1644 }
0x1913   :  { %v1647_v3 = vadd.f32 %v1645_v1, %v1637_v0 }
0x1915   :  { %4817 = vtanh.f32 %v1647_v3  ;;  %v1700_v41 = vrot.slane %v1647_v3, 6 }
0x191b   :  { %v4818_v5 = vpop.eup %4817 }
0x191c   :  { %1650 = vrot.lane.b32.xlu2 %v4818_v5, %s5329_s21 }
0x1976   :  { %v1651_v8 = vpop.permute.xlu2 %1650 }
0x1977   :  { %v1653_v10 = vmul.f32 %v1651_v8, %v1631_v61 }
0x1979   :  { %v1654_v13 = vpack.c.bf16 %v1653_v10, %v1653_v10  ;;  %v2048_v48 = vsel %vm203_vm0, %v5713_v33, %v1653_v10 }
0x197b   :  { %v1656_v16 = vrot.slane %v1654_v13, 1 }
0x197d   :  { %1657 = vrot.lane.b32.xlu0 %v1656_v16, %s5342_s30 }
0x19ef   :  { %v1658_v17 = vpop.permute.xlu0 %1657 }
0x19f0   :  { %4533 = vmatmul.msk.bf16.vlgmr.msrb.gmra.mxu0 %vm1024_vm2, %v1658_v17 }
0x1a6d   :  { %v1671_v18 = vpop.f32.mrf.mxu0 }
0x1a6e   :  { %v1676_v19 = vrot.slane %v1671_v18, 4 }
0x1a70   :  { %v1678_v20 = vadd.f32 %v1676_v19, %v5619_v9 }
0x1a72   :  { %4819 = vtanh.f32 %v1678_v20  ;;  %v4534_v23 = vmul.f32 -1.442695, %v1678_v20 }
0x1a74   :  { %4821 = vpow2.f32 %v4534_v23 }
0x1a75   :  { %v1673_v21 = vpop.f32.mrf.mxu0 }
0x1a78   :  { %v4820_v22 = vpop.eup %4819 }
0x1a79   :  { %1704 = vrot.lane.b32.xlu1 %v4820_v22, %s5329_s21  ;;  %v5123_v22 = vld [vmem:[%s6256_s9] ss:$0 sm:$0xff] }
0x1a7a   :  { %v4822_v24 = vpop.eup %4821  ;;  %v5747_v23 = vadd.f32 %v5123_v22, %v5661_v11 }
0x1a7b   :  { %v1682_v2 = vadd.f32 1.0, %v4822_v24 }
0x1a7d   :  { %4823 = vrcp.f32 %v1682_v2  ;;  %v1694_v31 = vand.u32 2147483648, %v1682_v2  ;;  %vm1688_vm10 = vweird.f32 %v1682_v2  ;;  %v1692_v34 = vand.u32 2147483647, %v1682_v2 }
0x1a7f   :  { %v1695_v36 = vor.u32 1.1754944e-38, %v1694_v31  ;;  %vm1693_vm12 = vcmp.eq.f32.partialorder %v1692_v34, 8.507059e+37 }
0x1a83   :  { %v4824_v6 = vpop.eup %4823 }
0x1a84   :  { %v1684_v26 = vmul.f32 %v4824_v6, %v1682_v2  ;;  %vm1689_vm9 = vweird.f32 %v4824_v6 }
0x1a85   :  { %vm1690_vm11 = vmor %vm1688_vm10, %vm1689_vm9 }
0x1a86   :  { %v1685_v27 = vsub.f32 1.0, %v1684_v26 }
0x1a88   :  { %v1686_v28 = vmul.f32 %v4824_v6, %v1685_v27 }
0x1a8a   :  { %v1687_v29 = vadd.f32 %v4824_v6, %v1686_v28 }
0x1a8c   :  { %v1691_v35 = vsel %vm1690_vm11, %v4824_v6, %v1687_v29 }
0x1a8d   :  { %v1696_v38 = vsel %vm1693_vm12, %v1695_v36, %v1691_v35 }
0x1a8e   :  { %v1702_v42 = vmul.f32 %v1700_v41, %v1696_v38 }
0x1aeb   :  { %v1705_v37 = vpop.permute.xlu1 %1704 }
0x1aec   :  { %v1707_v39 = vmul.f32 %v1705_v37, %v1696_v38 }
0x1aee   :  { %1709 = vrot.lane.b32.xlu2 %v1707_v39, %s5342_s30 }
0x1b48   :  { %v1710_v43 = vpop.permute.xlu2 %1709 }
0x1b49   :  { %v1712_v44 = vadd.f32 %v1710_v43, %v1702_v42 }
0x1b4b   :  { %4825 = vtanh.f32 %v1712_v44  ;;  %v1765_v3 = vrot.slane %v1712_v44, 6 }
0x1b51   :  { %v4826_v45 = vpop.eup %4825 }
0x1b52   :  { %1715 = vrot.lane.b32.xlu0 %v4826_v45, %s5329_s21  ;;  %v4708_v45 = vld [vmem:[#allocation9 + $0x8] sm:$0xff] }
0x1b53   :  { %2094 = vmatpush.bf16.msrb.mxu2 %v4708_v45 }
0x1bc4   :  { %v1716_v46 = vpop.permute.xlu0 %1715 }
0x1bc5   :  { %v1718_v47 = vmul.f32 %v1716_v46, %v1696_v38  ;;  %v4707_v46 = vld [vmem:[#allocation9] sm:$0xff] }
0x1bc6   :  { %2095 = vmatpush.bf16.msrb.mxu2 %v4707_v46 }
0x1bc7   :  { %v1719_v49 = vpack.c.bf16 %v1718_v47, %v1718_v47  ;;  %v2049_v50 = vsel %vm245_vm4, %v2048_v48, %v1718_v47 }
0x1bc9   :  { %v1721_v51 = vrot.slane %v1719_v49, 2 }
0x1bcb   :  { %1722 = vrot.lane.b32.xlu1 %v1721_v51, %s5342_s30 }
0x1c3d   :  { %v1723_v40 = vpop.permute.xlu1 %1722 }
0x1c3e   :  { %4535 = vmatmul.msk.bf16.vlgmr.msra.gmra.mxu1 %vm1024_vm2, %v1723_v40 }
0x1cbb   :  { %v1736_v52 = vpop.f32.mrf.mxu1 }
0x1cbc   :  { %v1741_v53 = vrot.slane %v1736_v52, 2 }
0x1cbe   :  { %v1743_v54 = vadd.f32 %v1741_v53, %v5619_v9  ;;  %v5769_v53 = vld [vmem:[#allocation10] sm:$0xff] }
0x1cc0   :  { %4827 = vtanh.f32 %v1743_v54  ;;  %v4536_v56 = vmul.f32 -1.442695, %v1743_v54 }
0x1cc2   :  { %4829 = vpow2.f32 %v4536_v56 }
0x1cc3   :  { %v1738_v55 = vpop.f32.mrf.mxu1 }
0x1cc6   :  { %v4828_v4 = vpop.eup %4827 }
0x1cc7   :  { %1769 = vrot.lane.b32.xlu2 %v4828_v4, %s5329_s21 }
0x1cc8   :  { %v4830_v33 = vpop.eup %4829 }
0x1cc9   :  { %v1747_v25 = vadd.f32 1.0, %v4830_v33 }
0x1ccb   :  { %4831 = vrcp.f32 %v1747_v25  ;;  %v1759_v60 = vand.u32 2147483648, %v1747_v25  ;;  %vm1753_vm14 = vweird.f32 %v1747_v25  ;;  %v1757_v61 = vand.u32 2147483647, %v1747_v25 }
0x1ccd   :  { %v1760_v62 = vor.u32 1.1754944e-38, %v1759_v60  ;;  %vm1758_vm1 = vcmp.eq.f32.partialorder %v1757_v61, 8.507059e+37 }
0x1cd1   :  { %v4832_v57 = vpop.eup %4831 }
0x1cd2   :  { %v1749_v30 = vmul.f32 %v4832_v57, %v1747_v25  ;;  %vm1754_vm13 = vweird.f32 %v4832_v57 }
0x1cd3   :  { %vm1755_vm15 = vmor %vm1753_vm14, %vm1754_vm13 }
0x1cd4   :  { %v1750_v58 = vsub.f32 1.0, %v1749_v30 }
0x1cd6   :  { %v1751_v12 = vmul.f32 %v4832_v57, %v1750_v58 }
0x1cd8   :  { %v1752_v59 = vadd.f32 %v4832_v57, %v1751_v12 }
0x1cda   :  { %v1756_v9 = vsel %vm1755_vm15, %v4832_v57, %v1752_v59  ;;  %v5790_v57 = vld [vmem:[%s6259_s12] ss:$0 sm:$0xff] }
0x1cdb   :  { %v1761_v0 = vsel %vm1758_vm1, %v1760_v62, %v1756_v9 }
0x1cdc   :  { %v1767_v5 = vmul.f32 %v1765_v3, %v1761_v0 }
0x1d21   :  { %v1770_v63 = vpop.permute.xlu2 %1769 }
0x1d22   :  { %v1772_v1 = vmul.f32 %v1770_v63, %v1761_v0 }
0x1d24   :  { %1774 = vrot.lane.b32.xlu0 %v1772_v1, %s5342_s30 }
0x1d96   :  { %v1775_v8 = vpop.permute.xlu0 %1774 }
0x1d97   :  { %v1777_v10 = vadd.f32 %v1775_v8, %v1767_v5 }
0x1d99   :  { %4833 = vtanh.f32 %v1777_v10  ;;  %v1827_v47 = vrot.slane %v1777_v10, 6 }
0x1d9f   :  { %v4834_v13 = vpop.eup %4833 }
0x1da0   :  { %1780 = vrot.lane.b32.xlu1 %v4834_v13, %s5329_s21 }
0x1e12   :  { %v1781_v16 = vpop.permute.xlu1 %1780 }
0x1e13   :  { %v1783_v17 = vmul.f32 %v1781_v16, %v1761_v0 }
0x1e15   :  { %v1784_v18 = vpack.c.bf16 %v1783_v17, %v1783_v17  ;;  %v5739_v19 = vsel %vm225_vm3, %v2049_v50, %v1783_v17 }
0x1e17   :  { %v1786_v20 = vrot.slane %v1784_v18, 3 }
0x1e19   :  { %1787 = vrot.lane.b32.xlu2 %v1786_v20, %s5342_s30 }
0x1e73   :  { %v1788_v21 = vpop.permute.xlu2 %1787 }
0x1e74   :  { %4537 = vmatmul.msk.bf16.vlgmr.msra.gmra.mxu2 %vm1024_vm2, %v1788_v21 }
0x1ef7   :  { %v1801_v24 = vpop.f32.mrf.mxu2 }
0x1ef8   :  { %v1805_v2 = vadd.f32 %v1801_v24, %v5747_v23 }
0x1efa   :  { %4835 = vtanh.f32 %v1805_v2  ;;  %v4538_v27 = vmul.f32 -1.442695, %v1805_v2 }
0x1efc   :  { %4837 = vpow2.f32 %v4538_v27 }
0x1eff   :  { %v1803_v6 = vpop.f32.mrf.mxu2 }
0x1f00   :  { %v4836_v26 = vpop.eup %4835 }
0x1f01   :  { %1831 = vrot.lane.b32.xlu0 %v4836_v26, %s5329_s21 }
0x1f02   :  { %v4838_v28 = vpop.eup %4837 }
0x1f03   :  { %v1809_v29 = vadd.f32 1.0, %v4838_v28 }
0x1f05   :  { %4839 = vrcp.f32 %v1809_v29  ;;  %v1821_v11 = vand.u32 2147483648, %v1809_v29  ;;  %vm1815_vm7 = vweird.f32 %v1809_v29  ;;  %v1819_v38 = vand.u32 2147483647, %v1809_v29 }
0x1f07   :  { %v1822_v41 = vor.u32 1.1754944e-38, %v1821_v11  ;;  %vm1820_vm9 = vcmp.eq.f32.partialorder %v1819_v38, 8.507059e+37 }
0x1f0b   :  { %v4840_v31 = vpop.eup %4839 }
0x1f0c   :  { %v1811_v34 = vmul.f32 %v4840_v31, %v1809_v29  ;;  %vm1816_vm6 = vweird.f32 %v4840_v31 }
0x1f0d   :  { %vm1817_vm8 = vmor %vm1815_vm7, %vm1816_vm6 }
0x1f0e   :  { %v1812_v35 = vsub.f32 1.0, %v1811_v34 }
0x1f10   :  { %v1813_v36 = vmul.f32 %v4840_v31, %v1812_v35 }
0x1f12   :  { %v1814_v37 = vadd.f32 %v4840_v31, %v1813_v36 }
0x1f14   :  { %v1818_v39 = vsel %vm1817_vm8, %v4840_v31, %v1814_v37 }
0x1f15   :  { %v1823_v43 = vsel %vm1820_vm9, %v1822_v41, %v1818_v39 }
0x1f16   :  { %v1829_v48 = vmul.f32 %v1827_v47, %v1823_v43 }
0x1f73   :  { %v1832_v42 = vpop.permute.xlu0 %1831 }
0x1f74   :  { %v1834_v44 = vmul.f32 %v1832_v42, %v1823_v43 }
0x1f76   :  { %1836 = vrot.lane.b32.xlu1 %v1834_v44, %s5342_s30 }
0x1f7e   :  { %2066 = vrot.lane.b32.xlu1 %v2054_v15, %s5342_s30  ;;  %v5766_v15 = vld [vmem:[#allocation10 + $0x8] sm:$0xff] }
0x1f7f   :  { %2129 = vmatpush.bf16.msra.mxu3 %v5766_v15  ;;  %2187 = vmatpush.bf16.msrb.mxu0 %v5766_v15 }
0x1f80   :  { %2252 = vmatpush.bf16.msra.mxu1 %v5766_v15  ;;  %2508 = vmatpush.bf16.msra.mxu2 %v5766_v15 }
0x1f83   :  { %2130 = vmatpush.bf16.msra.mxu3 %v5769_v53  ;;  %2188 = vmatpush.bf16.msrb.mxu0 %v5769_v53 }
0x1f84   :  { %2253 = vmatpush.bf16.msra.mxu1 %v5769_v53  ;;  %2509 = vmatpush.bf16.msra.mxu2 %v5769_v53 }
0x1fe8   :  { %v1837_v49 = vpop.permute.xlu1 %1836 }
0x1fe9   :  { %v5756_v50 = vadd.f32 %v1837_v49, %v1829_v48 }
0x1feb   :  { %4841 = vtanh.f32 %v5756_v50  ;;  %v1891_v39 = vrot.slane %v5756_v50, 6 }
0x1ff0   :  { %v2067_v51 = vpop.permute.xlu1 %2066 }
0x1ff1   :  { %v4842_v40 = vpop.eup %4841  ;;  %4553 = vmatmul.msk.bf16.vlgmr.msrb.gmra.mxu2 %vm1024_vm2, %v2067_v51 }
0x1ff2   :  { %1842 = vrot.lane.b32.xlu2 %v4842_v40, %s5329_s21  ;;  %2764 = vmatpush.bf16.msrb.mxu2 %v5766_v15 }
0x1ff6   :  { %2765 = vmatpush.bf16.msrb.mxu2 %v5769_v53 }
0x204c   :  { %v1843_v52 = vpop.permute.xlu2 %1842 }
0x204d   :  { %v5761_v7 = vmul.f32 %v1843_v52, %v1823_v43 }
0x204f   :  { %v1846_v14 = vpack.c.bf16 %v5761_v7, %v5761_v7 }
0x2051   :  { %1848 = vrot.lane.b32.xlu0 %v1846_v14, %s5342_s30 }
0x2074   :  { %v2097_v30 = vpop.f32.mrf.mxu2 }
0x2075   :  { %v5794_v58 = vadd.f32 %v5790_v57, %v2097_v30 }
0x20c3   :  { %v1849_v54 = vpop.permute.xlu0 %1848 }
0x20c4   :  { %4539 = vmatmul.msk.bf16.vlgmr.msrb.gmra.mxu3 %vm1024_vm2, %v1849_v54 }
0x20c5   :  { %2317 = vmatpush.bf16.msrb.mxu3 %v5766_v15 }
0x20c9   :  { %2318 = vmatpush.bf16.msrb.mxu3 %v5769_v53 }
0x20d4   :  { %2131 = vmatmul.bf16.vlgmr.msra.gmra.mxu3 %v5341_v32 }
0x20d5   :  { %2573 = vmatpush.bf16.msra.mxu3 %v5766_v15 }
0x20d9   :  { %2574 = vmatpush.bf16.msra.mxu3 %v5769_v53 }
0x2147   :  { %v1862_v55 = vpop.f32.mrf.mxu3 }
0x2148   :  { %v1867_v4 = vrot.slane %v1862_v55, 6 }
0x214a   :  { %v1869_v56 = vadd.f32 %v1867_v4, %v5747_v23 }
0x214c   :  { %4843 = vtanh.f32 %v1869_v56  ;;  %v4540_v9 = vmul.f32 -1.442695, %v1869_v56 }
0x214f   :  { %v1864_v33 = vpop.f32.mrf.mxu3 }
0x2152   :  { %v4844_v25 = vpop.eup %4843 }
0x2153   :  { %1895 = vrot.lane.b32.xlu2 %v4844_v25, %s5329_s21 }
0x2157   :  { %v2132_v12 = vpop.f32.mrf.mxu3 }
0x2158   :  { %v2136_v59 = vadd.f32 %v2132_v12, %v5794_v58 }
0x215a   :  { %4845 = vtanh.f32 %v2136_v59  ;;  %v4563_v8 = vmul.f32 -1.442695, %v2136_v59 }
0x215b   :  { %4847 = vpow2.f32 %v4540_v9 }
0x215f   :  { %v2134_v60 = vpop.f32.mrf.mxu3 }
0x2160   :  { %v4846_v61 = vpop.eup %4845 }
0x2161   :  { %2159 = vrot.lane.b32.xlu0 %v4846_v61, %s5329_s21  ;;  %v4848_v62 = vpop.eup %4847 }
0x2162   :  { %v1873_v63 = vadd.f32 1.0, %v4848_v62 }
0x2164   :  { %4849 = vrcp.f32 %v1873_v63  ;;  %v1885_v13 = vand.u32 2147483648, %v1873_v63  ;;  %vm1879_vm11 = vweird.f32 %v1873_v63  ;;  %v1883_v16 = vand.u32 2147483647, %v1873_v63 }
0x2165   :  { %4851 = vpow2.f32 %v4563_v8 }
0x2166   :  { %v1886_v18 = vor.u32 1.1754944e-38, %v1885_v13  ;;  %vm1884_vm13 = vcmp.eq.f32.partialorder %v1883_v16, 8.507059e+37 }
0x216a   :  { %v4850_v0 = vpop.eup %4849 }
0x216b   :  { %v1875_v1 = vmul.f32 %v4850_v0, %v1873_v63  ;;  %vm1880_vm10 = vweird.f32 %v4850_v0  ;;  %v4852_v24 = vpop.eup %4851 }
0x216c   :  { %vm1881_vm12 = vmor %vm1879_vm11, %vm1880_vm10  ;;  %v2140_v2 = vadd.f32 1.0, %v4852_v24 }
0x216d   :  { %v1876_v3 = vsub.f32 1.0, %v1875_v1 }
0x216e   :  { %4853 = vrcp.f32 %v2140_v2  ;;  %v2152_v31 = vand.u32 2147483648, %v2140_v2  ;;  %vm2146_vm15 = vweird.f32 %v2140_v2  ;;  %v2150_v34 = vand.u32 2147483647, %v2140_v2 }
0x216f   :  { %v1877_v5 = vmul.f32 %v4850_v0, %v1876_v3 }
0x2170   :  { %v2153_v36 = vor.u32 1.1754944e-38, %v2152_v31  ;;  %vm2151_vm6 = vcmp.eq.f32.partialorder %v2150_v34, 8.507059e+37 }
0x2171   :  { %v1878_v10 = vadd.f32 %v4850_v0, %v1877_v5 }
0x2173   :  { %v1882_v17 = vsel %vm1881_vm12, %v4850_v0, %v1878_v10 }
0x2174   :  { %v1887_v21 = vsel %vm1884_vm13, %v1886_v18, %v1882_v17  ;;  %v4854_v6 = vpop.eup %4853 }
0x2175   :  { %v2142_v26 = vmul.f32 %v4854_v6, %v2140_v2  ;;  %vm2147_vm14 = vweird.f32 %v4854_v6  ;;  %v1893_v41 = vmul.f32 %v1891_v39, %v1887_v21 }
0x2176   :  { %vm2148_vm1 = vmor %vm2146_vm15, %vm2147_vm14 }
0x2177   :  { %v2143_v27 = vsub.f32 1.0, %v2142_v26 }
0x2179   :  { %v2144_v28 = vmul.f32 %v4854_v6, %v2143_v27 }
0x217b   :  { %v2145_v29 = vadd.f32 %v4854_v6, %v2144_v28 }
0x217d   :  { %v2149_v35 = vsel %vm2148_vm1, %v4854_v6, %v2145_v29 }
0x217e   :  { %v2154_v11 = vsel %vm2151_vm6, %v2153_v36, %v2149_v35 }
0x217f   :  { %v2157_v45 = vmul.f32 0.0, %v2154_v11 }
0x21ad   :  { %v1896_v20 = vpop.permute.xlu2 %1895 }
0x21ae   :  { %v1898_v22 = vmul.f32 %v1896_v20, %v1887_v21 }
0x21b0   :  { %1900 = vrot.lane.b32.xlu1 %v1898_v22, %s5342_s30 }
0x21d3   :  { %v2160_v37 = vpop.permute.xlu0 %2159 }
0x21d4   :  { %v2162_v38 = vmul.f32 %v2160_v37, %v2154_v11 }
0x21d6   :  { %2164 = vrot.lane.b32.xlu2 %v2162_v38, %s5342_s30 }
0x2222   :  { %v1901_v42 = vpop.permute.xlu1 %1900 }
0x2223   :  { %v5801_v43 = vadd.f32 %v1901_v42, %v1893_v41 }
0x2225   :  { %4855 = vtanh.f32 %v5801_v43  ;;  %v1956_v42 = vrot.slane %v5801_v43, 6 }
0x222b   :  { %v4856_v44 = vpop.eup %4855 }
0x222c   :  { %1906 = vrot.lane.b32.xlu0 %v4856_v44, %s5329_s21 }
0x2230   :  { %v2165_v46 = vpop.permute.xlu2 %2164 }
0x2231   :  { %v5805_v47 = vadd.f32 %v2165_v46, %v2157_v45 }
0x2233   :  { %4857 = vtanh.f32 %v5805_v47 }
0x2239   :  { %v4858_v48 = vpop.eup %4857 }
0x223a   :  { %2170 = vrot.lane.b32.xlu1 %v4858_v48, %s5329_s21 }
0x229e   :  { %v1907_v49 = vpop.permute.xlu0 %1906 }
0x229f   :  { %v5809_v50 = vmul.f32 %v1907_v49, %v1887_v21  ;;  %v2219_v49 = vrot.slane %v5805_v47, 6 }
0x22a1   :  { %v1910_v51 = vpack.c.bf16 %v5809_v50, %v5809_v50 }
0x22a3   :  { %v1912_v40 = vrot.slane %v1910_v51, 1 }
0x22a5   :  { %1913 = vrot.lane.b32.xlu2 %v1912_v40, %s5342_s30 }
0x22ac   :  { %v2171_v52 = vpop.permute.xlu1 %2170 }
0x22ad   :  { %v5814_v14 = vmul.f32 %v2171_v52, %v2154_v11 }
0x22af   :  { %v2174_v54 = vpack.c.bf16 %v5814_v14, %v5814_v14 }
0x22b1   :  { %2176 = vrot.lane.b32.xlu0 %v2174_v54, %s5342_s30 }
0x22ff   :  { %v1914_v55 = vpop.permute.xlu2 %1913 }
0x2300   :  { %4541 = vmatmul.msk.bf16.vlgmr.msra.gmra.mxu0 %vm1024_vm2, %v1914_v55 }
0x2301   :  { %2382 = vmatpush.bf16.msra.mxu0 %v5766_v15 }
0x2305   :  { %2383 = vmatpush.bf16.msra.mxu0 %v5769_v53 }
0x2323   :  { %v2177_v4 = vpop.permute.xlu0 %2176 }
0x2324   :  { %4564 = vmatmul.msk.bf16.vlgmr.msrb.gmra.mxu0 %vm1024_vm2, %v2177_v4  ;;  %v2051_v4 = vsel %vm203_vm0, %v5761_v7, %v5809_v50 }
0x2325   :  { %2638 = vmatpush.bf16.msrb.mxu0 %v5766_v15 }
0x2329   :  { %2639 = vmatpush.bf16.msrb.mxu0 %v5769_v53 }
0x237d   :  { %v1927_v56 = vpop.f32.mrf.mxu0 }
0x237e   :  { %v1932_v33 = vrot.slane %v1927_v56, 4 }
0x2380   :  { %v1934_v25 = vadd.f32 %v1932_v33, %v5747_v23 }
0x2382   :  { %4859 = vtanh.f32 %v1934_v25  ;;  %v4542_v63 = vmul.f32 -1.442695, %v1934_v25 }
0x2385   :  { %v1929_v30 = vpop.f32.mrf.mxu0 }
0x2388   :  { %v4860_v12 = vpop.eup %4859 }
0x2389   :  { %1960 = vrot.lane.b32.xlu1 %v4860_v12, %s5329_s21 }
0x23a1   :  { %v2190_v59 = vpop.f32.mrf.mxu0 }
0x23a2   :  { %v2195_v60 = vrot.slane %v2190_v59, 6 }
0x23a4   :  { %v2197_v61 = vadd.f32 %v2195_v60, %v5794_v58 }
0x23a6   :  { %4861 = vtanh.f32 %v2197_v61  ;;  %v4565_v1 = vmul.f32 -1.442695, %v2197_v61 }
0x23a7   :  { %4863 = vpow2.f32 %v4542_v63 }
0x23a8   :  { %4865 = vpow2.f32 %v4565_v1 }
0x23a9   :  { %v2192_v9 = vpop.f32.mrf.mxu0 }
0x23ac   :  { %v4862_v62 = vpop.eup %4861 }
0x23ad   :  { %2223 = vrot.lane.b32.xlu2 %v4862_v62, %s5329_s21  ;;  %v4864_v0 = vpop.eup %4863 }
0x23ae   :  { %v1938_v3 = vadd.f32 1.0, %v4864_v0  ;;  %v4866_v5 = vpop.eup %4865 }
0x23af   :  { %v2201_v10 = vadd.f32 1.0, %v4866_v5 }
0x23b0   :  { %4867 = vrcp.f32 %v1938_v3  ;;  %v1950_v22 = vand.u32 2147483648, %v1938_v3  ;;  %vm1944_vm8 = vweird.f32 %v1938_v3  ;;  %v1948_v24 = vand.u32 2147483647, %v1938_v3 }
0x23b1   :  { %4869 = vrcp.f32 %v2201_v10  ;;  %v2213_v35 = vand.u32 2147483648, %v2201_v10  ;;  %vm2207_vm12 = vweird.f32 %v2201_v10  ;;  %v2211_v36 = vand.u32 2147483647, %v2201_v10 }
0x23b2   :  { %v1951_v26 = vor.u32 1.1754944e-38, %v1950_v22  ;;  %vm1949_vm10 = vcmp.eq.f32.partialorder %v1948_v24, 8.507059e+37 }
0x23b3   :  { %v2214_v11 = vor.u32 1.1754944e-38, %v2213_v35  ;;  %vm2212_vm14 = vcmp.eq.f32.partialorder %v2211_v36, 8.507059e+37 }
0x23b6   :  { %v4868_v8 = vpop.eup %4867 }
0x23b7   :  { %v1940_v13 = vmul.f32 %v4868_v8, %v1938_v3  ;;  %v4870_v18 = vpop.eup %4869  ;;  %vm1945_vm7 = vweird.f32 %v4868_v8 }
0x23b8   :  { %v2203_v21 = vmul.f32 %v4870_v18, %v2201_v10  ;;  %vm1946_vm9 = vmor %vm1944_vm8, %vm1945_vm7  ;;  %vm2208_vm11 = vweird.f32 %v4870_v18 }
0x23b9   :  { %v1941_v16 = vsub.f32 1.0, %v1940_v13  ;;  %vm2209_vm13 = vmor %vm2207_vm12, %vm2208_vm11 }
0x23ba   :  { %v2204_v6 = vsub.f32 1.0, %v2203_v21 }
0x23bb   :  { %v1942_v17 = vmul.f32 %v4868_v8, %v1941_v16 }
0x23bc   :  { %v2205_v31 = vmul.f32 %v4870_v18, %v2204_v6 }
0x23bd   :  { %v1943_v20 = vadd.f32 %v4868_v8, %v1942_v17 }
0x23be   :  { %v2206_v34 = vadd.f32 %v4870_v18, %v2205_v31 }
0x23bf   :  { %v1947_v2 = vsel %vm1946_vm9, %v4868_v8, %v1943_v20 }
0x23c0   :  { %v1952_v27 = vsel %vm1949_vm10, %v1951_v26, %v1947_v2  ;;  %v2210_v37 = vsel %vm2209_vm13, %v4870_v18, %v2206_v34 }
0x23c1   :  { %v2215_v39 = vsel %vm2212_vm14, %v2214_v11, %v2210_v37  ;;  %v1958_v44 = vmul.f32 %v1956_v42, %v1952_v27 }
0x23c2   :  { %v2221_v51 = vmul.f32 %v2219_v49, %v2215_v39 }
0x23fb   :  { %v1961_v28 = vpop.permute.xlu1 %1960 }
0x23fc   :  { %v1963_v29 = vmul.f32 %v1961_v28, %v1952_v27 }
0x23fe   :  { %1965 = vrot.lane.b32.xlu0 %v1963_v29, %s5342_s30 }
0x2407   :  { %v2224_v38 = vpop.permute.xlu2 %2223 }
0x2408   :  { %v2226_v41 = vmul.f32 %v2224_v38, %v2215_v39 }
0x240a   :  { %2228 = vrot.lane.b32.xlu1 %v2226_v41, %s5342_s30 }
0x2470   :  { %v1966_v45 = vpop.permute.xlu0 %1965 }
0x2471   :  { %v5832_v46 = vadd.f32 %v1966_v45, %v1958_v44 }
0x2473   :  { %4871 = vtanh.f32 %v5832_v46 }
0x2479   :  { %v4872_v48 = vpop.eup %4871 }
0x247a   :  { %1971 = vrot.lane.b32.xlu2 %v4872_v48, %s5329_s21 }
0x247c   :  { %v2229_v40 = vpop.permute.xlu1 %2228 }
0x247d   :  { %v2231_v52 = vadd.f32 %v2229_v40, %v2221_v51 }
0x247f   :  { %4873 = vtanh.f32 %v2231_v52 }
0x2485   :  { %v4874_v54 = vpop.eup %4873 }
0x2486   :  { %2234 = vrot.lane.b32.xlu0 %v4874_v54, %s5329_s21 }
0x24d4   :  { %v1972_v55 = vpop.permute.xlu2 %1971 }
0x24d5   :  { %v1974_v43 = vmul.f32 %v1972_v55, %v1952_v27  ;;  %v2284_v27 = vrot.slane %v2231_v52, 6 }
0x24d7   :  { %v1975_v56 = vpack.c.bf16 %v1974_v43, %v1974_v43  ;;  %v5842_v33 = vsel %vm245_vm4, %v2051_v4, %v1974_v43 }
0x24d9   :  { %v1977_v47 = vrot.slane %v1975_v56, 2 }
0x24db   :  { %1978 = vrot.lane.b32.xlu1 %v1977_v47, %s5342_s30 }
0x24f8   :  { %v2235_v25 = vpop.permute.xlu0 %2234 }
0x24f9   :  { %v2237_v30 = vmul.f32 %v2235_v25, %v2215_v39 }
0x24fb   :  { %v2238_v12 = vpack.c.bf16 %v2237_v30, %v2237_v30  ;;  %v3136_v37 = vsel %vm203_vm0, %v5814_v14, %v2237_v30 }
0x24fd   :  { %v2240_v59 = vrot.slane %v2238_v12, 1 }
0x24ff   :  { %2241 = vrot.lane.b32.xlu2 %v2240_v59, %s5342_s30 }
0x254d   :  { %v1979_v60 = vpop.permute.xlu1 %1978 }
0x254e   :  { %4543 = vmatmul.msk.bf16.vlgmr.msrb.gmra.mxu1 %vm1024_vm2, %v1979_v60 }
0x254f   :  { %2443 = vmatpush.bf16.msrb.mxu1 %v5766_v15 }
0x2553   :  { %2444 = vmatpush.bf16.msrb.mxu1 %v5769_v53 }
0x2559   :  { %v2242_v7 = vpop.permute.xlu2 %2241 }
0x255e   :  { %4566 = vmatmul.msk.bf16.vlgmr.msra.gmra.mxu1 %vm1024_vm2, %v2242_v7 }
0x255f   :  { %2699 = vmatpush.bf16.msra.mxu1 %v5766_v15 }
0x2563   :  { %2700 = vmatpush.bf16.msra.mxu1 %v5769_v53 }
0x25cb   :  { %v5852_v50 = vpop.f32.mrf.mxu1 }
0x25d3   :  { %v1994_v61 = vpop.f32.mrf.mxu1 }
0x25db   :  { %v2255_v9 = vpop.f32.mrf.mxu1 }
0x25dc   :  { %v2260_v62 = vrot.slane %v2255_v9, 4 }
0x25de   :  { %v2262_v63 = vadd.f32 %v2260_v62, %v5794_v58 }
0x25e0   :  { %4875 = vtanh.f32 %v2262_v63  ;;  %v4567_v3 = vmul.f32 -1.442695, %v2262_v63 }
0x25e2   :  { %4877 = vpow2.f32 %v4567_v3 }
0x25e3   :  { %v2257_v0 = vpop.f32.mrf.mxu1 }
0x25e6   :  { %v4876_v1 = vpop.eup %4875 }
0x25e7   :  { %2288 = vrot.lane.b32.xlu0 %v4876_v1, %s5329_s21 }
0x25e8   :  { %v4878_v5 = vpop.eup %4877 }
0x25e9   :  { %v2266_v8 = vadd.f32 1.0, %v4878_v5 }
0x25eb   :  { %4879 = vrcp.f32 %v2266_v8  ;;  %v2278_v20 = vand.u32 2147483648, %v2266_v8  ;;  %vm2272_vm1 = vweird.f32 %v2266_v8  ;;  %v2276_v21 = vand.u32 2147483647, %v2266_v8 }
0x25ed   :  { %v2279_v24 = vor.u32 1.1754944e-38, %v2278_v20  ;;  %vm2277_vm7 = vcmp.eq.f32.partialorder %v2276_v21, 8.507059e+37 }
0x25f1   :  { %v4880_v10 = vpop.eup %4879 }
0x25f2   :  { %v2268_v13 = vmul.f32 %v4880_v10, %v2266_v8  ;;  %vm2273_vm15 = vweird.f32 %v4880_v10 }
0x25f3   :  { %vm2274_vm6 = vmor %vm2272_vm1, %vm2273_vm15 }
0x25f4   :  { %v2269_v16 = vsub.f32 1.0, %v2268_v13 }
0x25f6   :  { %v2270_v17 = vmul.f32 %v4880_v10, %v2269_v16 }
0x25f8   :  { %v2271_v18 = vadd.f32 %v4880_v10, %v2270_v17 }
0x25fa   :  { %v2275_v22 = vsel %vm2274_vm6, %v4880_v10, %v2271_v18  ;;  %v2099_v10 = vpop.f32.mrf.mxu2 }
0x25fb   :  { %v2280_v6 = vsel %vm2277_vm7, %v2279_v24, %v2275_v22  ;;  %v5877_v13 = vadd.f32 %v5790_v57, %v2099_v10 }
0x25fc   :  { %v2286_v28 = vmul.f32 %v2284_v27, %v2280_v6 }
0x2659   :  { %v2289_v2 = vpop.permute.xlu0 %2288 }
0x265a   :  { %v2291_v26 = vmul.f32 %v2289_v2, %v2280_v6 }
0x265c   :  { %2293 = vrot.lane.b32.xlu1 %v2291_v26, %s5342_s30 }
0x26ce   :  { %v2294_v29 = vpop.permute.xlu1 %2293 }
0x26cf   :  { %v2296_v31 = vadd.f32 %v2294_v29, %v2286_v28 }
0x26d1   :  { %4881 = vtanh.f32 %v2296_v31  ;;  %v2349_v60 = vrot.slane %v2296_v31, 6 }
0x26d7   :  { %v4882_v34 = vpop.eup %4881 }
0x26d8   :  { %2299 = vrot.lane.b32.xlu2 %v4882_v34, %s5329_s21  ;;  %v1997_v34 = vrot.slane %v5852_v50, 2 }
0x2732   :  { %v2300_v35 = vpop.permute.xlu2 %2299 }
0x2733   :  { %v2302_v36 = vmul.f32 %v2300_v35, %v2280_v6 }
0x2735   :  { %v2303_v11 = vpack.c.bf16 %v2302_v36, %v2302_v36  ;;  %v3137_v38 = vsel %vm245_vm4, %v3136_v37, %v2302_v36  ;;  %v1999_v37 = vadd.f32 %v1997_v34, %v5747_v23 }
0x2737   :  { %v2305_v39 = vrot.slane %v2303_v11, 2  ;;  %v4544_v23 = vmul.f32 -1.442695, %v1999_v37 }
0x2739   :  { %2306 = vrot.lane.b32.xlu0 %v2305_v39, %s5342_s30 }
0x27ab   :  { %v2307_v41 = vpop.permute.xlu0 %2306 }
0x27ac   :  { %4568 = vmatmul.msk.bf16.vlgmr.msrb.gmra.mxu3 %vm1024_vm2, %v2307_v41 }
0x27ad   :  { %2829 = vmatpush.bf16.msrb.mxu3 %v5766_v15 }
0x27b1   :  { %2830 = vmatpush.bf16.msrb.mxu3 %v5769_v53 }
0x282f   :  { %v2320_v42 = vpop.f32.mrf.mxu3 }
0x2830   :  { %v2325_v44 = vrot.slane %v2320_v42, 2 }
0x2832   :  { %v2327_v45 = vadd.f32 %v2325_v44, %v5794_v58 }
0x2834   :  { %4883 = vtanh.f32 %v2327_v45  ;;  %v4569_v49 = vmul.f32 -1.442695, %v2327_v45 }
0x2836   :  { %4885 = vpow2.f32 %v4569_v49 }
0x2837   :  { %v2322_v48 = vpop.f32.mrf.mxu3 }
0x283a   :  { %v4884_v14 = vpop.eup %4883 }
0x283b   :  { %2353 = vrot.lane.b32.xlu1 %v4884_v14, %s5329_s21 }
0x283c   :  { %v4886_v51 = vpop.eup %4885 }
0x283d   :  { %v2331_v40 = vadd.f32 1.0, %v4886_v51 }
0x283f   :  { %4887 = vrcp.f32 %v2331_v40  ;;  %v2343_v56 = vand.u32 2147483648, %v2331_v40  ;;  %vm2337_vm9 = vweird.f32 %v2331_v40  ;;  %v2341_v47 = vand.u32 2147483647, %v2331_v40 }
0x2841   :  { %v2344_v25 = vor.u32 1.1754944e-38, %v2343_v56  ;;  %vm2342_vm11 = vcmp.eq.f32.partialorder %v2341_v47, 8.507059e+37 }
0x2845   :  { %v4888_v52 = vpop.eup %4887 }
0x2846   :  { %v2333_v54 = vmul.f32 %v4888_v52, %v2331_v40  ;;  %vm2338_vm8 = vweird.f32 %v4888_v52 }
0x2847   :  { %vm2339_vm10 = vmor %vm2337_vm9, %vm2338_vm8 }
0x2848   :  { %v2334_v55 = vsub.f32 1.0, %v2333_v54 }
0x284a   :  { %v2335_v43 = vmul.f32 %v4888_v52, %v2334_v55 }
0x284c   :  { %v2336_v4 = vadd.f32 %v4888_v52, %v2335_v43 }
0x284e   :  { %v2340_v58 = vsel %vm2339_vm10, %v4888_v52, %v2336_v4 }
0x284f   :  { %v2345_v12 = vsel %vm2342_vm11, %v2344_v25, %v2340_v58 }
0x2850   :  { %v2351_v7 = vmul.f32 %v2349_v60, %v2345_v12 }
0x28ad   :  { %v2354_v30 = vpop.permute.xlu1 %2353 }
0x28ae   :  { %v2356_v59 = vmul.f32 %v2354_v30, %v2345_v12 }
0x28b0   :  { %2358 = vrot.lane.b32.xlu2 %v2356_v59, %s5342_s30 }
0x290a   :  { %v2359_v61 = vpop.permute.xlu2 %2358 }
0x290b   :  { %v2361_v9 = vadd.f32 %v2359_v61, %v2351_v7 }
0x290d   :  { %4889 = vtanh.f32 %v2361_v9  ;;  %v2411_v42 = vrot.slane %v2361_v9, 6 }
0x2913   :  { %v4890_v62 = vpop.eup %4889 }
0x2914   :  { %2364 = vrot.lane.b32.xlu0 %v4890_v62, %s5329_s21 }
0x2986   :  { %v2365_v63 = vpop.permute.xlu0 %2364 }
0x2987   :  { %v2367_v0 = vmul.f32 %v2365_v63, %v2345_v12  ;;  %v2021_v63 = vrot.slane %v5832_v46, 6 }
0x2989   :  { %v2368_v1 = vpack.c.bf16 %v2367_v0, %v2367_v0  ;;  %v5870_v3 = vsel %vm225_vm3, %v3137_v38, %v2367_v0 }
0x298b   :  { %v2370_v5 = vrot.slane %v2368_v1, 3 }
0x298d   :  { %2371 = vrot.lane.b32.xlu1 %v2370_v5, %s5342_s30 }
0x29ff   :  { %v2372_v8 = vpop.permute.xlu1 %2371 }
0x2a00   :  { %4570 = vmatmul.msk.bf16.vlgmr.msra.gmra.mxu0 %vm1024_vm2, %v2372_v8 }
0x2a01   :  { %2894 = vmatpush.bf16.msra.mxu0 %v5766_v15 }
0x2a05   :  { %2895 = vmatpush.bf16.msra.mxu0 %v5769_v53 }
0x2a7d   :  { %v2385_v16 = vpop.f32.mrf.mxu0 }
0x2a7e   :  { %v2389_v17 = vadd.f32 %v2385_v16, %v5877_v13 }
0x2a80   :  { %4891 = vtanh.f32 %v2389_v17  ;;  %v4571_v21 = vmul.f32 -1.442695, %v2389_v17 }
0x2a82   :  { %4893 = vpow2.f32 %v4571_v21 }
0x2a85   :  { %v2387_v18 = vpop.f32.mrf.mxu0 }
0x2a86   :  { %v4892_v20 = vpop.eup %4891 }
0x2a87   :  { %2415 = vrot.lane.b32.xlu2 %v4892_v20, %s5329_s21 }
0x2a88   :  { %v4894_v22 = vpop.eup %4893 }
0x2a89   :  { %v2393_v24 = vadd.f32 1.0, %v4894_v22 }
0x2a8b   :  { %4895 = vrcp.f32 %v2393_v24  ;;  %v2405_v29 = vand.u32 2147483648, %v2393_v24  ;;  %vm2399_vm13 = vweird.f32 %v2393_v24  ;;  %v2403_v31 = vand.u32 2147483647, %v2393_v24 }
0x2a8c   :  { %4897 = vtanh.f32 %v1999_v37 }
0x2a8d   :  { %v2406_v36 = vor.u32 1.1754944e-38, %v2405_v29  ;;  %vm2404_vm15 = vcmp.eq.f32.partialorder %v2403_v31, 8.507059e+37 }
0x2a91   :  { %v4896_v2 = vpop.eup %4895 }
0x2a92   :  { %v2395_v6 = vmul.f32 %v4896_v2, %v2393_v24  ;;  %vm2400_vm12 = vweird.f32 %v4896_v2  ;;  %v4898_v41 = vpop.eup %4897 }
0x2a93   :  { %vm2401_vm14 = vmor %vm2399_vm13, %vm2400_vm12 }
0x2a94   :  { %v2396_v26 = vsub.f32 1.0, %v2395_v6 }
0x2a96   :  { %v2397_v27 = vmul.f32 %v4896_v2, %v2396_v26 }
0x2a98   :  { %v2398_v28 = vadd.f32 %v4896_v2, %v2397_v27 }
0x2a9a   :  { %v2402_v35 = vsel %vm2401_vm14, %v4896_v2, %v2398_v28 }
0x2a9b   :  { %v2407_v38 = vsel %vm2404_vm15, %v2406_v36, %v2402_v35 }
0x2a9c   :  { %v2413_v44 = vmul.f32 %v2411_v42, %v2407_v38 }
0x2ae1   :  { %v2416_v11 = vpop.permute.xlu2 %2415 }
0x2ae2   :  { %v2418_v39 = vmul.f32 %v2416_v11, %v2407_v38 }
0x2ae4   :  { %2420 = vrot.lane.b32.xlu0 %v2418_v39, %s5342_s30 }
0x2aec   :  { %2025 = vrot.lane.b32.xlu0 %v4898_v41, %s5329_s21 }
0x2b56   :  { %v2421_v45 = vpop.permute.xlu0 %2420 }
0x2b57   :  { %v5885_v48 = vadd.f32 %v2421_v45, %v2413_v44 }
0x2b59   :  { %4899 = vtanh.f32 %v5885_v48 }
0x2b5a   :  { %4901 = vpow2.f32 %v4544_v23 }
0x2b5e   :  { %v2026_v12 = vpop.permute.xlu0 %2025 }
0x2b5f   :  { %v4900_v50 = vpop.eup %4899 }
0x2b60   :  { %2426 = vrot.lane.b32.xlu1 %v4900_v50, %s5329_s21  ;;  %v4902_v14 = vpop.eup %4901 }
0x2b61   :  { %v2003_v49 = vadd.f32 1.0, %v4902_v14 }
0x2b63   :  { %4903 = vrcp.f32 %v2003_v49  ;;  %v2015_v47 = vand.u32 2147483648, %v2003_v49  ;;  %vm2009_vm6 = vweird.f32 %v2003_v49  ;;  %v2013_v58 = vand.u32 2147483647, %v2003_v49 }
0x2b65   :  { %v2016_v30 = vor.u32 1.1754944e-38, %v2015_v47  ;;  %vm2014_vm8 = vcmp.eq.f32.partialorder %v2013_v58, 8.507059e+37 }
0x2b69   :  { %v4904_v51 = vpop.eup %4903 }
0x2b6a   :  { %v2005_v40 = vmul.f32 %v4904_v51, %v2003_v49  ;;  %vm2010_vm1 = vweird.f32 %v4904_v51 }
0x2b6b   :  { %vm2011_vm7 = vmor %vm2009_vm6, %vm2010_vm1 }
0x2b6c   :  { %v2006_v52 = vsub.f32 1.0, %v2005_v40 }
0x2b6e   :  { %v2007_v54 = vmul.f32 %v4904_v51, %v2006_v52 }
0x2b70   :  { %v2008_v4 = vadd.f32 %v4904_v51, %v2007_v54 }
0x2b72   :  { %v2012_v25 = vsel %vm2011_vm7, %v4904_v51, %v2008_v4 }
0x2b73   :  { %v2017_v59 = vsel %vm2014_vm8, %v2016_v30, %v2012_v25 }
0x2b74   :  { %v2028_v60 = vmul.f32 %v2026_v12, %v2017_v59  ;;  %v2023_v1 = vmul.f32 %v2021_v63, %v2017_v59 }
0x2bd2   :  { %v2427_v55 = vpop.permute.xlu1 %2426 }
0x2bd3   :  { %v5889_v43 = vmul.f32 %v2427_v55, %v2407_v38  ;;  %v2475_v38 = vrot.slane %v5885_v48, 6 }
0x2bd5   :  { %v2430_v56 = vpack.c.bf16 %v5889_v43, %v5889_v43 }
0x2bd7   :  { %2432 = vrot.lane.b32.xlu2 %v2430_v56, %s5342_s30 }
0x2bdf   :  { %2030 = vrot.lane.b32.xlu2 %v2028_v60, %s5342_s30 }
0x2c31   :  { %v2433_v7 = vpop.permute.xlu2 %2432 }
0x2c32   :  { %4572 = vmatmul.msk.bf16.vlgmr.msrb.gmra.mxu1 %vm1024_vm2, %v2433_v7 }
0x2c33   :  { %2955 = vmatpush.bf16.msrb.mxu1 %v5766_v15 }
0x2c37   :  { %2956 = vmatpush.bf16.msrb.mxu1 %v5769_v53 }
0x2c39   :  { %v2031_v0 = vpop.permute.xlu2 %2030 }
0x2c3a   :  { %v2033_v8 = vadd.f32 %v2031_v0, %v2023_v1 }
0x2caf   :  { %v2446_v61 = vpop.f32.mrf.mxu1 }
0x2cb0   :  { %v2451_v9 = vrot.slane %v2446_v61, 6 }
0x2cb2   :  { %v2453_v62 = vadd.f32 %v2451_v9, %v5877_v13 }
0x2cb4   :  { %4905 = vtanh.f32 %v2453_v62  ;;  %v4573_v17 = vmul.f32 -1.442695, %v2453_v62 }
0x2cb5   :  { %4907 = vtanh.f32 %v2033_v8 }
0x2cb6   :  { %4909 = vpow2.f32 %v4573_v17 }
0x2cb7   :  { %v2448_v5 = vpop.f32.mrf.mxu1 }
0x2cba   :  { %v4906_v10 = vpop.eup %4905 }
0x2cbb   :  { %2479 = vrot.lane.b32.xlu1 %v4906_v10, %s5329_s21  ;;  %v4908_v16 = vpop.eup %4907 }
0x2cbc   :  { %v4910_v18 = vpop.eup %4909 }
0x2cbd   :  { %v2457_v20 = vadd.f32 1.0, %v4910_v18 }
0x2cbf   :  { %4911 = vrcp.f32 %v2457_v20  ;;  %v2469_v6 = vand.u32 2147483648, %v2457_v20  ;;  %vm2463_vm10 = vweird.f32 %v2457_v20  ;;  %v2467_v26 = vand.u32 2147483647, %v2457_v20 }
0x2cc1   :  { %v2470_v28 = vor.u32 1.1754944e-38, %v2469_v6  ;;  %vm2468_vm12 = vcmp.eq.f32.partialorder %v2467_v26, 8.507059e+37 }
0x2cc3   :  { %2036 = vrot.lane.b32.xlu1 %v4908_v16, %s5329_s21 }
0x2cc5   :  { %v4912_v21 = vpop.eup %4911 }
0x2cc6   :  { %v2459_v22 = vmul.f32 %v4912_v21, %v2457_v20  ;;  %vm2464_vm9 = vweird.f32 %v4912_v21 }
0x2cc7   :  { %vm2465_vm11 = vmor %vm2463_vm10, %vm2464_vm9 }
0x2cc8   :  { %v2460_v46 = vsub.f32 1.0, %v2459_v22 }
0x2cca   :  { %v2461_v24 = vmul.f32 %v4912_v21, %v2460_v46 }
0x2ccc   :  { %v2462_v2 = vadd.f32 %v4912_v21, %v2461_v24 }
0x2cce   :  { %v2466_v27 = vsel %vm2465_vm11, %v4912_v21, %v2462_v2 }
0x2ccf   :  { %v2471_v31 = vsel %vm2468_vm12, %v2470_v28, %v2466_v27 }
0x2cd0   :  { %v2477_v39 = vmul.f32 %v2475_v38, %v2471_v31 }
0x2d2d   :  { %v2480_v29 = vpop.permute.xlu1 %2479 }
0x2d2e   :  { %v2482_v34 = vmul.f32 %v2480_v29, %v2471_v31 }
0x2d30   :  { %2484 = vrot.lane.b32.xlu0 %v2482_v34, %s5342_s30 }
0x2d35   :  { %v2037_v35 = vpop.permute.xlu1 %2036 }
0x2d36   :  { %v2039_v36 = vmul.f32 %v2037_v35, %v2017_v59 }
0x2d38   :  { %v2053_v37 = vsel %vm225_vm3, %v5842_v33, %v2039_v36 }
0x2d39   :  { %v2055_v11 = vpack.c.bf16 %v2053_v37, %v5739_v19 }
0x2d3b   :  { %2068 = vrot.lane.b32.xlu0 %v2055_v11, %s5342_s30 }
0x2da2   :  { %v2485_v41 = vpop.permute.xlu0 %2484 }
0x2da3   :  { %v2487_v42 = vadd.f32 %v2485_v41, %v2477_v39 }
0x2da5   :  { %4913 = vtanh.f32 %v2487_v42  ;;  %v2540_v1 = vrot.slane %v2487_v42, 6 }
0x2dab   :  { %v4914_v44 = vpop.eup %4913 }
0x2dac   :  { %2490 = vrot.lane.b32.xlu2 %v4914_v44, %s5329_s21 }
0x2dad   :  { %v2069_v45 = vpop.permute.xlu0 %2068 }
0x2dae   :  { %4554 = vmatmul.msk.bf16.gmra.mxu2 %vm1024_vm2, %v2069_v45 }
0x2e06   :  { %v2491_v50 = vpop.permute.xlu2 %2490 }
0x2e07   :  { %v2493_v23 = vmul.f32 %v2491_v50, %v2471_v31 }
0x2e09   :  { %v2494_v14 = vpack.c.bf16 %v2493_v23, %v2493_v23  ;;  %v3139_v20 = vsel %vm203_vm0, %v5889_v43, %v2493_v23 }
0x2e0b   :  { %v2496_v33 = vrot.slane %v2494_v14, 1 }
0x2e0d   :  { %2497 = vrot.lane.b32.xlu1 %v2496_v33, %s5342_s30 }
0x2e31   :  { %v5914_v48 = vpop.f32.mrf.mxu2 }
0x2e39   :  { %v5916_v49 = vpop.f32.mrf.mxu2 }
0x2e7f   :  { %v2498_v19 = vpop.permute.xlu1 %2497 }
0x2e80   :  { %4574 = vmatmul.msk.bf16.vlgmr.msra.gmra.mxu2 %vm1024_vm2, %v2498_v19 }
0x2e81   :  { %3020 = vmatpush.bf16.msra.mxu2 %v5766_v15 }
0x2e85   :  { %3021 = vmatpush.bf16.msra.mxu2 %v5769_v53 }
0x2f03   :  { %v2511_v51 = vpop.f32.mrf.mxu2 }
0x2f04   :  { %v2516_v40 = vrot.slane %v2511_v51, 4 }
0x2f06   :  { %v2518_v52 = vadd.f32 %v2516_v40, %v5877_v13 }
0x2f08   :  { %4915 = vtanh.f32 %v2518_v52  ;;  %v4575_v4 = vmul.f32 -1.442695, %v2518_v52 }
0x2f0a   :  { %4917 = vpow2.f32 %v4575_v4  ;;  %v5942_v4 = vadd.f32 %v5790_v57, %v5914_v48 }
0x2f0b   :  { %v2513_v54 = vpop.f32.mrf.mxu2 }
0x2f0e   :  { %v4916_v55 = vpop.eup %4915 }
0x2f0f   :  { %2544 = vrot.lane.b32.xlu2 %v4916_v55, %s5329_s21 }
0x2f10   :  { %v4918_v56 = vpop.eup %4917 }
0x2f11   :  { %v2522_v47 = vadd.f32 1.0, %v4918_v56 }
0x2f13   :  { %4919 = vrcp.f32 %v2522_v47  ;;  %v2534_v60 = vand.u32 2147483648, %v2522_v47  ;;  %vm2528_vm14 = vweird.f32 %v2522_v47  ;;  %v2532_v7 = vand.u32 2147483647, %v2522_v47 }
0x2f15   :  { %v2535_v9 = vor.u32 1.1754944e-38, %v2534_v60  ;;  %vm2533_vm1 = vcmp.eq.f32.partialorder %v2532_v7, 8.507059e+37 }
0x2f19   :  { %v4920_v58 = vpop.eup %4919 }
0x2f1a   :  { %v2524_v25 = vmul.f32 %v4920_v58, %v2522_v47  ;;  %vm2529_vm13 = vweird.f32 %v4920_v58 }
0x2f1b   :  { %vm2530_vm15 = vmor %vm2528_vm14, %vm2529_vm13 }
0x2f1c   :  { %v2525_v30 = vsub.f32 1.0, %v2524_v25 }
0x2f1e   :  { %v2526_v12 = vmul.f32 %v4920_v58, %v2525_v30 }
0x2f20   :  { %v2527_v59 = vadd.f32 %v4920_v58, %v2526_v12 }
0x2f22   :  { %v2531_v61 = vsel %vm2530_vm15, %v4920_v58, %v2527_v59 }
0x2f23   :  { %v2536_v63 = vsel %vm2533_vm1, %v2535_v9, %v2531_v61 }
0x2f24   :  { %v2542_v5 = vmul.f32 %v2540_v1, %v2536_v63 }
0x2f69   :  { %v2545_v62 = vpop.permute.xlu2 %2544 }
0x2f6a   :  { %v2547_v0 = vmul.f32 %v2545_v62, %v2536_v63 }
0x2f6c   :  { %2549 = vrot.lane.b32.xlu0 %v2547_v0, %s5342_s30 }
0x2fde   :  { %v2550_v8 = vpop.permute.xlu0 %2549 }
0x2fdf   :  { %v2552_v10 = vadd.f32 %v2550_v8, %v2542_v5 }
0x2fe1   :  { %4921 = vtanh.f32 %v2552_v10  ;;  %v2605_v44 = vrot.slane %v2552_v10, 6 }
0x2fe7   :  { %v4922_v16 = vpop.eup %4921 }
0x2fe8   :  { %2555 = vrot.lane.b32.xlu1 %v4922_v16, %s5329_s21 }
0x305a   :  { %v2556_v17 = vpop.permute.xlu1 %2555 }
0x305b   :  { %v2558_v18 = vmul.f32 %v2556_v17, %v2536_v63 }
0x305d   :  { %v2559_v21 = vpack.c.bf16 %v2558_v18, %v2558_v18  ;;  %v3140_v22 = vsel %vm245_vm4, %v3139_v20, %v2558_v18 }
0x305f   :  { %v2561_v46 = vrot.slane %v2559_v21, 2 }
0x3061   :  { %2562 = vrot.lane.b32.xlu2 %v2561_v46, %s5342_s30 }
0x30bb   :  { %v2563_v24 = vpop.permute.xlu2 %2562 }
0x30bc   :  { %4576 = vmatmul.msk.bf16.vlgmr.msra.gmra.mxu3 %vm1024_vm2, %v2563_v24 }
0x30bd   :  { %3085 = vmatpush.bf16.msra.mxu3 %v5766_v15 }
0x30c1   :  { %3086 = vmatpush.bf16.msra.mxu3 %v5769_v53 }
0x313f   :  { %v2576_v2 = vpop.f32.mrf.mxu3 }
0x3140   :  { %v2581_v6 = vrot.slane %v2576_v2, 2 }
0x3142   :  { %v2583_v26 = vadd.f32 %v2581_v6, %v5877_v13 }
0x3144   :  { %4923 = vtanh.f32 %v2583_v26  ;;  %v4577_v28 = vmul.f32 -1.442695, %v2583_v26 }
0x3146   :  { %4925 = vpow2.f32 %v4577_v28 }
0x3147   :  { %v2578_v27 = vpop.f32.mrf.mxu3 }
0x314a   :  { %v4924_v43 = vpop.eup %4923 }
0x314b   :  { %2609 = vrot.lane.b32.xlu0 %v4924_v43, %s5329_s21 }
0x314c   :  { %v4926_v29 = vpop.eup %4925 }
0x314d   :  { %v2587_v31 = vadd.f32 1.0, %v4926_v29 }
0x314f   :  { %4927 = vrcp.f32 %v2587_v31  ;;  %v2599_v53 = vand.u32 2147483648, %v2587_v31  ;;  %vm2593_vm7 = vweird.f32 %v2587_v31  ;;  %v2597_v11 = vand.u32 2147483647, %v2587_v31 }
0x3151   :  { %v2600_v38 = vor.u32 1.1754944e-38, %v2599_v53  ;;  %vm2598_vm9 = vcmp.eq.f32.partialorder %v2597_v11, 8.507059e+37 }
0x3155   :  { %v4928_v34 = vpop.eup %4927 }
0x3156   :  { %v2589_v35 = vmul.f32 %v4928_v34, %v2587_v31  ;;  %vm2594_vm6 = vweird.f32 %v4928_v34 }
0x3157   :  { %vm2595_vm8 = vmor %vm2593_vm7, %vm2594_vm6 }
0x3158   :  { %v2590_v36 = vsub.f32 1.0, %v2589_v35 }
0x315a   :  { %v2591_v15 = vmul.f32 %v4928_v34, %v2590_v36 }
0x315c   :  { %v2592_v37 = vadd.f32 %v4928_v34, %v2591_v15 }
0x315e   :  { %v2596_v13 = vsel %vm2595_vm8, %v4928_v34, %v2592_v37 }
0x315f   :  { %v2601_v41 = vsel %vm2598_vm9, %v2600_v38, %v2596_v13 }
0x3160   :  { %v2607_v45 = vmul.f32 %v2605_v44, %v2601_v41 }
0x31bd   :  { %v2610_v39 = vpop.permute.xlu0 %2609 }
0x31be   :  { %v2612_v42 = vmul.f32 %v2610_v39, %v2601_v41 }
0x31c0   :  { %2614 = vrot.lane.b32.xlu1 %v2612_v42, %s5342_s30 }
0x3232   :  { %v2615_v50 = vpop.permute.xlu1 %2614 }
0x3233   :  { %v2617_v23 = vadd.f32 %v2615_v50, %v2607_v45 }
0x3235   :  { %4929 = vtanh.f32 %v2617_v23  ;;  %v2667_v10 = vrot.slane %v2617_v23, 6 }
0x323b   :  { %v4930_v14 = vpop.eup %4929 }
0x323c   :  { %2620 = vrot.lane.b32.xlu2 %v4930_v14, %s5329_s21 }
0x3296   :  { %v2621_v33 = vpop.permute.xlu2 %2620 }
0x3297   :  { %v2623_v19 = vmul.f32 %v2621_v33, %v2601_v41 }
0x3299   :  { %v2624_v51 = vpack.c.bf16 %v2623_v19, %v2623_v19  ;;  %v5934_v40 = vsel %vm225_vm3, %v3140_v22, %v2623_v19 }
0x329a   :  { %v3148_v52 = vpack.c.bf16 %v5934_v40, %v5870_v3 }
0x329b   :  { %v2626_v54 = vrot.slane %v2624_v51, 3 }
0x329d   :  { %2627 = vrot.lane.b32.xlu0 %v2626_v54, %s5342_s30 }
0x330f   :  { %v2628_v55 = vpop.permute.xlu0 %2627 }
0x3310   :  { %4578 = vmatmul.msk.bf16.vlgmr.msrb.gmra.mxu0 %vm1024_vm2, %v2628_v55 }
0x338d   :  { %v2641_v56 = vpop.f32.mrf.mxu0 }
0x338e   :  { %v2645_v47 = vadd.f32 %v2641_v56, %v5942_v4 }
0x3390   :  { %4931 = vtanh.f32 %v2645_v47  ;;  %v4579_v30 = vmul.f32 -1.442695, %v2645_v47 }
0x3392   :  { %4933 = vpow2.f32 %v4579_v30 }
0x3395   :  { %v2643_v58 = vpop.f32.mrf.mxu0 }
0x3396   :  { %v4932_v25 = vpop.eup %4931 }
0x3397   :  { %2671 = vrot.lane.b32.xlu1 %v4932_v25, %s5329_s21 }
0x3398   :  { %v4934_v12 = vpop.eup %4933 }
0x3399   :  { %v2649_v59 = vadd.f32 1.0, %v4934_v12 }
0x339b   :  { %4935 = vrcp.f32 %v2649_v59  ;;  %v2661_v57 = vand.u32 2147483648, %v2649_v59  ;;  %vm2655_vm11 = vweird.f32 %v2649_v59  ;;  %v2659_v48 = vand.u32 2147483647, %v2649_v59 }
0x339d   :  { %v2662_v0 = vor.u32 1.1754944e-38, %v2661_v57  ;;  %vm2660_vm13 = vcmp.eq.f32.partialorder %v2659_v48, 8.507059e+37 }
0x33a1   :  { %v4936_v60 = vpop.eup %4935 }
0x33a2   :  { %v2651_v7 = vmul.f32 %v4936_v60, %v2649_v59  ;;  %vm2656_vm10 = vweird.f32 %v4936_v60 }
0x33a3   :  { %vm2657_vm12 = vmor %vm2655_vm11, %vm2656_vm10 }
0x33a4   :  { %v2652_v61 = vsub.f32 1.0, %v2651_v7 }
0x33a6   :  { %v2653_v9 = vmul.f32 %v4936_v60, %v2652_v61 }
0x33a8   :  { %v2654_v62 = vadd.f32 %v4936_v60, %v2653_v9 }
0x33aa   :  { %v2658_v63 = vsel %vm2657_vm12, %v4936_v60, %v2654_v62 }
0x33ab   :  { %v2663_v5 = vsel %vm2660_vm13, %v2662_v0, %v2658_v63 }
0x33ac   :  { %v2669_v16 = vmul.f32 %v2667_v10, %v2663_v5 }
0x3409   :  { %v2672_v1 = vpop.permute.xlu1 %2671 }
0x340a   :  { %v2674_v8 = vmul.f32 %v2672_v1, %v2663_v5 }
0x340c   :  { %2676 = vrot.lane.b32.xlu2 %v2674_v8, %s5342_s30 }
0x3466   :  { %v2677_v17 = vpop.permute.xlu2 %2676 }
0x3467   :  { %v2679_v18 = vadd.f32 %v2677_v17, %v2669_v16 }
0x3469   :  { %4937 = vtanh.f32 %v2679_v18  ;;  %v2731_v44 = vrot.slane %v2679_v18, 6 }
0x346f   :  { %v4938_v20 = vpop.eup %4937 }
0x3470   :  { %2682 = vrot.lane.b32.xlu0 %v4938_v20, %s5329_s21 }
0x34e2   :  { %v2683_v21 = vpop.permute.xlu0 %2682 }
0x34e3   :  { %v5948_v22 = vmul.f32 %v2683_v21, %v2663_v5 }
0x34e5   :  { %v2686_v46 = vpack.c.bf16 %v5948_v22, %v5948_v22 }
0x34e7   :  { %2688 = vrot.lane.b32.xlu1 %v2686_v46, %s5342_s30 }
0x3559   :  { %v2689_v24 = vpop.permute.xlu1 %2688 }
0x355a   :  { %4580 = vmatmul.msk.bf16.vlgmr.msra.gmra.mxu1 %vm1024_vm2, %v2689_v24 }
0x35d7   :  { %v2702_v2 = vpop.f32.mrf.mxu1 }
0x35d8   :  { %v2707_v6 = vrot.slane %v2702_v2, 6 }
0x35da   :  { %v2709_v26 = vadd.f32 %v2707_v6, %v5942_v4 }
0x35dc   :  { %4939 = vtanh.f32 %v2709_v26  ;;  %v4581_v28 = vmul.f32 -1.442695, %v2709_v26 }
0x35de   :  { %4941 = vpow2.f32 %v4581_v28 }
0x35df   :  { %v2704_v27 = vpop.f32.mrf.mxu1 }
0x35e2   :  { %v4940_v43 = vpop.eup %4939 }
0x35e3   :  { %2735 = vrot.lane.b32.xlu2 %v4940_v43, %s5329_s21 }
0x35e4   :  { %v4942_v29 = vpop.eup %4941 }
0x35e5   :  { %v2713_v31 = vadd.f32 1.0, %v4942_v29 }
0x35e7   :  { %4943 = vrcp.f32 %v2713_v31  ;;  %v2725_v53 = vand.u32 2147483648, %v2713_v31  ;;  %vm2719_vm15 = vweird.f32 %v2713_v31  ;;  %v2723_v11 = vand.u32 2147483647, %v2713_v31 }
0x35e9   :  { %v2726_v38 = vor.u32 1.1754944e-38, %v2725_v53  ;;  %vm2724_vm6 = vcmp.eq.f32.partialorder %v2723_v11, 8.507059e+37 }
0x35ed   :  { %v4944_v34 = vpop.eup %4943 }
0x35ee   :  { %v2715_v35 = vmul.f32 %v4944_v34, %v2713_v31  ;;  %vm2720_vm14 = vweird.f32 %v4944_v34 }
0x35ef   :  { %vm2721_vm1 = vmor %vm2719_vm15, %vm2720_vm14 }
0x35f0   :  { %v2716_v36 = vsub.f32 1.0, %v2715_v35 }
0x35f2   :  { %v2717_v15 = vmul.f32 %v4944_v34, %v2716_v36 }
0x35f4   :  { %v2718_v37 = vadd.f32 %v4944_v34, %v2717_v15 }
0x35f6   :  { %v2722_v13 = vsel %vm2721_vm1, %v4944_v34, %v2718_v37 }
0x35f7   :  { %v2727_v41 = vsel %vm2724_vm6, %v2726_v38, %v2722_v13 }
0x35f8   :  { %v2733_v45 = vmul.f32 %v2731_v44, %v2727_v41 }
0x363d   :  { %v2736_v39 = vpop.permute.xlu2 %2735 }
0x363e   :  { %v2738_v42 = vmul.f32 %v2736_v39, %v2727_v41 }
0x3640   :  { %2740 = vrot.lane.b32.xlu0 %v2738_v42, %s5342_s30 }
0x36b2   :  { %v2741_v50 = vpop.permute.xlu0 %2740 }
0x36b3   :  { %v2743_v23 = vadd.f32 %v2741_v50, %v2733_v45 }
0x36b5   :  { %4945 = vtanh.f32 %v2743_v23  ;;  %v2796_v16 = vrot.slane %v2743_v23, 6 }
0x36bb   :  { %v4946_v14 = vpop.eup %4945 }
0x36bc   :  { %2746 = vrot.lane.b32.xlu1 %v4946_v14, %s5329_s21 }
0x372e   :  { %v2747_v33 = vpop.permute.xlu1 %2746 }
0x372f   :  { %v2749_v19 = vmul.f32 %v2747_v33, %v2727_v41 }
0x3731   :  { %v2750_v51 = vpack.c.bf16 %v2749_v19, %v2749_v19  ;;  %v3142_v2 = vsel %vm203_vm0, %v5948_v22, %v2749_v19 }
0x3733   :  { %v2752_v54 = vrot.slane %v2750_v51, 1 }
0x3735   :  { %2753 = vrot.lane.b32.xlu2 %v2752_v54, %s5342_s30 }
0x378f   :  { %v2754_v55 = vpop.permute.xlu2 %2753 }
0x3790   :  { %4582 = vmatmul.msk.bf16.vlgmr.msrb.gmra.mxu2 %vm1024_vm2, %v2754_v55 }
0x3813   :  { %v2767_v56 = vpop.f32.mrf.mxu2 }
0x3814   :  { %v2772_v47 = vrot.slane %v2767_v56, 4 }
0x3816   :  { %v2774_v58 = vadd.f32 %v2772_v47, %v5942_v4 }
0x3818   :  { %4947 = vtanh.f32 %v2774_v58  ;;  %v4583_v12 = vmul.f32 -1.442695, %v2774_v58 }
0x381a   :  { %4949 = vpow2.f32 %v4583_v12 }
0x381b   :  { %v2769_v25 = vpop.f32.mrf.mxu2 }
0x381e   :  { %v4948_v30 = vpop.eup %4947 }
0x381f   :  { %2800 = vrot.lane.b32.xlu0 %v4948_v30, %s5329_s21  ;;  %v5124_v30 = vld [vmem:[%s6259_s12] ss:$0 sm:$0xff] }
0x3820   :  { %v4950_v59 = vpop.eup %4949  ;;  %v5982_v12 = vadd.f32 %v5124_v30, %v5916_v49 }
0x3821   :  { %v2778_v60 = vadd.f32 1.0, %v4950_v59 }
0x3823   :  { %4951 = vrcp.f32 %v2778_v60  ;;  %v2790_v48 = vand.u32 2147483648, %v2778_v60  ;;  %vm2784_vm8 = vweird.f32 %v2778_v60  ;;  %v2788_v63 = vand.u32 2147483647, %v2778_v60 }
0x3825   :  { %v2791_v1 = vor.u32 1.1754944e-38, %v2790_v48  ;;  %vm2789_vm10 = vcmp.eq.f32.partialorder %v2788_v63, 8.507059e+37 }
0x3829   :  { %v4952_v7 = vpop.eup %4951 }
0x382a   :  { %v2780_v61 = vmul.f32 %v4952_v7, %v2778_v60  ;;  %vm2785_vm7 = vweird.f32 %v4952_v7 }
0x382b   :  { %vm2786_vm9 = vmor %vm2784_vm8, %vm2785_vm7 }
0x382c   :  { %v2781_v9 = vsub.f32 1.0, %v2780_v61 }
0x382e   :  { %v2782_v62 = vmul.f32 %v4952_v7, %v2781_v9 }
0x3830   :  { %v2783_v57 = vadd.f32 %v4952_v7, %v2782_v62 }
0x3832   :  { %v2787_v0 = vsel %vm2786_vm9, %v4952_v7, %v2783_v57 }
0x3833   :  { %v2792_v8 = vsel %vm2789_vm10, %v2791_v1, %v2787_v0 }
0x3834   :  { %v2798_v17 = vmul.f32 %v2796_v16, %v2792_v8 }
0x3891   :  { %v2801_v5 = vpop.permute.xlu0 %2800 }
0x3892   :  { %v2803_v10 = vmul.f32 %v2801_v5, %v2792_v8 }
0x3894   :  { %2805 = vrot.lane.b32.xlu1 %v2803_v10, %s5342_s30 }
0x3906   :  { %v2806_v18 = vpop.permute.xlu1 %2805 }
0x3907   :  { %v2808_v20 = vadd.f32 %v2806_v18, %v2798_v17 }
0x3909   :  { %4953 = vtanh.f32 %v2808_v20  ;;  %v2861_v23 = vrot.slane %v2808_v20, 6 }
0x390f   :  { %v4954_v21 = vpop.eup %4953 }
0x3910   :  { %2811 = vrot.lane.b32.xlu2 %v4954_v21, %s5329_s21  ;;  %v4712_v21 = vld [vmem:[#allocation12 + $0x8] sm:$0xff] }
0x3911   :  { %3188 = vmatpush.bf16.msrb.mxu0 %v4712_v21 }
0x396a   :  { %v2812_v46 = vpop.permute.xlu2 %2811 }
0x396b   :  { %v2814_v24 = vmul.f32 %v2812_v46, %v2792_v8  ;;  %v4711_v46 = vld [vmem:[#allocation12] sm:$0xff] }
0x396c   :  { %3189 = vmatpush.bf16.msrb.mxu0 %v4711_v46 }
0x396d   :  { %v2815_v6 = vpack.c.bf16 %v2814_v24, %v2814_v24  ;;  %v3143_v26 = vsel %vm245_vm4, %v3142_v2, %v2814_v24 }
0x396f   :  { %v2817_v27 = vrot.slane %v2815_v6, 2 }
0x3971   :  { %2818 = vrot.lane.b32.xlu0 %v2817_v27, %s5342_s30 }
0x39e3   :  { %v2819_v43 = vpop.permute.xlu0 %2818 }
0x39e4   :  { %4584 = vmatmul.msk.bf16.vlgmr.msrb.gmra.mxu3 %vm1024_vm2, %v2819_v43 }
0x3a67   :  { %v2832_v28 = vpop.f32.mrf.mxu3 }
0x3a68   :  { %v2837_v29 = vrot.slane %v2832_v28, 2 }
0x3a6a   :  { %v2839_v31 = vadd.f32 %v2837_v29, %v5942_v4  ;;  %v6004_v29 = vld [vmem:[#allocation13] sm:$0xff] }
0x3a6c   :  { %4955 = vtanh.f32 %v2839_v31  ;;  %v4585_v36 = vmul.f32 -1.442695, %v2839_v31 }
0x3a6e   :  { %4957 = vpow2.f32 %v4585_v36 }
0x3a6f   :  { %v2834_v34 = vpop.f32.mrf.mxu3 }
0x3a72   :  { %v4956_v35 = vpop.eup %4955 }
0x3a73   :  { %2865 = vrot.lane.b32.xlu1 %v4956_v35, %s5329_s21 }
0x3a74   :  { %v4958_v22 = vpop.eup %4957 }
0x3a75   :  { %v2843_v15 = vadd.f32 1.0, %v4958_v22 }
0x3a77   :  { %4959 = vrcp.f32 %v2843_v15  ;;  %v2855_v39 = vand.u32 2147483648, %v2843_v15  ;;  %vm2849_vm12 = vweird.f32 %v2843_v15  ;;  %v2853_v41 = vand.u32 2147483647, %v2843_v15 }
0x3a79   :  { %v2856_v42 = vor.u32 1.1754944e-38, %v2855_v39  ;;  %vm2854_vm14 = vcmp.eq.f32.partialorder %v2853_v41, 8.507059e+37 }
0x3a7d   :  { %v4960_v37 = vpop.eup %4959 }
0x3a7e   :  { %v2845_v53 = vmul.f32 %v4960_v37, %v2843_v15  ;;  %vm2850_vm11 = vweird.f32 %v4960_v37 }
0x3a7f   :  { %vm2851_vm13 = vmor %vm2849_vm12, %vm2850_vm11 }
0x3a80   :  { %v2846_v11 = vsub.f32 1.0, %v2845_v53 }
0x3a82   :  { %v2847_v13 = vmul.f32 %v4960_v37, %v2846_v11 }
0x3a84   :  { %v2848_v38 = vadd.f32 %v4960_v37, %v2847_v13 }
0x3a86   :  { %v2852_v4 = vsel %vm2851_vm13, %v4960_v37, %v2848_v38  ;;  %v6025_v37 = vld [vmem:[%s6262_s15] ss:$0 sm:$0xff] }
0x3a87   :  { %v2857_v45 = vsel %vm2854_vm14, %v2856_v42, %v2852_v4 }
0x3a88   :  { %v2863_v14 = vmul.f32 %v2861_v23, %v2857_v45 }
0x3ae5   :  { %v2866_v44 = vpop.permute.xlu1 %2865 }
0x3ae6   :  { %v2868_v50 = vmul.f32 %v2866_v44, %v2857_v45 }
0x3ae8   :  { %2870 = vrot.lane.b32.xlu2 %v2868_v50, %s5342_s30 }
0x3b42   :  { %v2871_v33 = vpop.permute.xlu2 %2870 }
0x3b43   :  { %v2873_v19 = vadd.f32 %v2871_v33, %v2863_v14 }
0x3b45   :  { %4961 = vtanh.f32 %v2873_v19  ;;  %v2923_v24 = vrot.slane %v2873_v19, 6 }
0x3b4b   :  { %v4962_v51 = vpop.eup %4961 }
0x3b4c   :  { %2876 = vrot.lane.b32.xlu0 %v4962_v51, %s5329_s21 }
0x3bbe   :  { %v2877_v54 = vpop.permute.xlu0 %2876 }
0x3bbf   :  { %v2879_v55 = vmul.f32 %v2877_v54, %v2857_v45 }
0x3bc1   :  { %v2880_v56 = vpack.c.bf16 %v2879_v55, %v2879_v55  ;;  %v5974_v47 = vsel %vm225_vm3, %v3143_v26, %v2879_v55 }
0x3bc3   :  { %v2882_v58 = vrot.slane %v2880_v56, 3 }
0x3bc5   :  { %2883 = vrot.lane.b32.xlu1 %v2882_v58, %s5342_s30 }
0x3c37   :  { %v2884_v25 = vpop.permute.xlu1 %2883 }
0x3c38   :  { %4586 = vmatmul.msk.bf16.vlgmr.msra.gmra.mxu0 %vm1024_vm2, %v2884_v25 }
0x3cb5   :  { %v2897_v59 = vpop.f32.mrf.mxu0 }
0x3cb6   :  { %v2901_v60 = vadd.f32 %v2897_v59, %v5982_v12 }
0x3cb8   :  { %4963 = vtanh.f32 %v2901_v60  ;;  %v4587_v9 = vmul.f32 -1.442695, %v2901_v60 }
0x3cba   :  { %4965 = vpow2.f32 %v4587_v9 }
0x3cbd   :  { %v2899_v7 = vpop.f32.mrf.mxu0 }
0x3cbe   :  { %v4964_v61 = vpop.eup %4963 }
0x3cbf   :  { %2927 = vrot.lane.b32.xlu2 %v4964_v61, %s5329_s21 }
0x3cc0   :  { %v4966_v62 = vpop.eup %4965 }
0x3cc1   :  { %v2905_v57 = vadd.f32 1.0, %v4966_v62 }
0x3cc3   :  { %4967 = vrcp.f32 %v2905_v57  ;;  %v2917_v49 = vand.u32 2147483648, %v2905_v57  ;;  %vm2911_vm1 = vweird.f32 %v2905_v57  ;;  %v2915_v8 = vand.u32 2147483647, %v2905_v57 }
0x3cc5   :  { %v2918_v16 = vor.u32 1.1754944e-38, %v2917_v49  ;;  %vm2916_vm7 = vcmp.eq.f32.partialorder %v2915_v8, 8.507059e+37 }
0x3cc9   :  { %v4968_v48 = vpop.eup %4967 }
0x3cca   :  { %v2907_v63 = vmul.f32 %v4968_v48, %v2905_v57  ;;  %vm2912_vm15 = vweird.f32 %v4968_v48 }
0x3ccb   :  { %vm2913_vm6 = vmor %vm2911_vm1, %vm2912_vm15 }
0x3ccc   :  { %v2908_v0 = vsub.f32 1.0, %v2907_v63 }
0x3cce   :  { %v2909_v1 = vmul.f32 %v4968_v48, %v2908_v0 }
0x3cd0   :  { %v2910_v5 = vadd.f32 %v4968_v48, %v2909_v1 }
0x3cd2   :  { %v2914_v10 = vsel %vm2913_vm6, %v4968_v48, %v2910_v5 }
0x3cd3   :  { %v2919_v18 = vsel %vm2916_vm7, %v2918_v16, %v2914_v10 }
0x3cd4   :  { %v2925_v2 = vmul.f32 %v2923_v24, %v2919_v18 }
0x3d19   :  { %v2928_v17 = vpop.permute.xlu2 %2927 }
0x3d1a   :  { %v2930_v20 = vmul.f32 %v2928_v17, %v2919_v18 }
0x3d1c   :  { %2932 = vrot.lane.b32.xlu0 %v2930_v20, %s5342_s30 }
0x3d24   :  { %3160 = vrot.lane.b32.xlu0 %v3148_v52, %s5342_s30  ;;  %v6001_v52 = vld [vmem:[#allocation13 + $0x8] sm:$0xff] }
0x3d25   :  { %3223 = vmatpush.bf16.msra.mxu1 %v6001_v52  ;;  %3281 = vmatpush.bf16.msrb.mxu2 %v6001_v52 }
0x3d26   :  { %3346 = vmatpush.bf16.msrb.mxu3 %v6001_v52  ;;  %3602 = vmatpush.bf16.msra.mxu0 %v6001_v52 }
0x3d29   :  { %3224 = vmatpush.bf16.msra.mxu1 %v6004_v29  ;;  %3282 = vmatpush.bf16.msrb.mxu2 %v6004_v29 }
0x3d2a   :  { %3347 = vmatpush.bf16.msrb.mxu3 %v6004_v29  ;;  %3603 = vmatpush.bf16.msra.mxu0 %v6004_v29 }
0x3d8e   :  { %v2933_v6 = vpop.permute.xlu0 %2932 }
0x3d8f   :  { %v5991_v26 = vadd.f32 %v2933_v6, %v2925_v2 }
0x3d91   :  { %4969 = vtanh.f32 %v5991_v26  ;;  %v2987_v17 = vrot.slane %v5991_v26, 6 }
0x3d96   :  { %v3161_v27 = vpop.permute.xlu0 %3160 }
0x3d97   :  { %v4970_v43 = vpop.eup %4969  ;;  %4602 = vmatmul.msk.bf16.vlgmr.msrb.gmra.mxu0 %vm1024_vm2, %v3161_v27 }
0x3d98   :  { %2938 = vrot.lane.b32.xlu1 %v4970_v43, %s5329_s21  ;;  %3858 = vmatpush.bf16.msrb.mxu0 %v6001_v52 }
0x3d9c   :  { %3859 = vmatpush.bf16.msrb.mxu0 %v6004_v29 }
0x3e0a   :  { %v2939_v28 = vpop.permute.xlu1 %2938 }
0x3e0b   :  { %v5996_v3 = vmul.f32 %v2939_v28, %v2919_v18 }
0x3e0d   :  { %v2942_v40 = vpack.c.bf16 %v5996_v3, %v5996_v3 }
0x3e0f   :  { %2944 = vrot.lane.b32.xlu2 %v2942_v40, %s5342_s30 }
0x3e14   :  { %v3191_v53 = vpop.f32.mrf.mxu0 }
0x3e69   :  { %v2945_v31 = vpop.permute.xlu2 %2944 }
0x3e6a   :  { %4588 = vmatmul.msk.bf16.vlgmr.msrb.gmra.mxu1 %vm1024_vm2, %v2945_v31 }
0x3e6b   :  { %3411 = vmatpush.bf16.msrb.mxu1 %v6001_v52 }
0x3e6f   :  { %3412 = vmatpush.bf16.msrb.mxu1 %v6004_v29 }
0x3e7a   :  { %3225 = vmatmul.bf16.vlgmr.msra.gmra.mxu1 %v5341_v32  ;;  %v6029_v32 = vadd.f32 %v6025_v37, %v3191_v53 }
0x3e7b   :  { %3667 = vmatpush.bf16.msra.mxu1 %v6001_v52 }
0x3e7f   :  { %3668 = vmatpush.bf16.msra.mxu1 %v6004_v29 }
0x3ee7   :  { %v2958_v34 = vpop.f32.mrf.mxu1 }
0x3ee8   :  { %v2963_v35 = vrot.slane %v2958_v34, 6 }
0x3eea   :  { %v2965_v36 = vadd.f32 %v2963_v35, %v5982_v12 }
0x3eec   :  { %4971 = vtanh.f32 %v2965_v36  ;;  %v4589_v42 = vmul.f32 -1.442695, %v2965_v36 }
0x3eef   :  { %v2960_v22 = vpop.f32.mrf.mxu1 }
0x3ef2   :  { %v4972_v15 = vpop.eup %4971 }
0x3ef3   :  { %2991 = vrot.lane.b32.xlu1 %v4972_v15, %s5329_s21 }
0x3ef7   :  { %v3226_v11 = vpop.f32.mrf.mxu1 }
0x3ef8   :  { %v3230_v13 = vadd.f32 %v3226_v11, %v6029_v32 }
0x3efa   :  { %4973 = vtanh.f32 %v3230_v13  ;;  %v4612_v41 = vmul.f32 -1.442695, %v3230_v13 }
0x3efc   :  { %4975 = vpow2.f32 %v4612_v41 }
0x3efd   :  { %4977 = vpow2.f32 %v4589_v42 }
0x3eff   :  { %v3228_v38 = vpop.f32.mrf.mxu1 }
0x3f00   :  { %v4974_v39 = vpop.eup %4973 }
0x3f01   :  { %3253 = vrot.lane.b32.xlu2 %v4974_v39, %s5329_s21 }
0x3f02   :  { %v4976_v4 = vpop.eup %4975 }
0x3f03   :  { %v3234_v44 = vadd.f32 1.0, %v4976_v4  ;;  %v4978_v45 = vpop.eup %4977 }
0x3f04   :  { %v2969_v23 = vadd.f32 1.0, %v4978_v45 }
0x3f05   :  { %4979 = vrcp.f32 %v3234_v44  ;;  %v3246_v56 = vand.u32 2147483648, %v3234_v44  ;;  %vm3240_vm9 = vweird.f32 %v3234_v44  ;;  %v3244_v58 = vand.u32 2147483647, %v3234_v44 }
0x3f06   :  { %4981 = vrcp.f32 %v2969_v23  ;;  %v2981_v57 = vand.u32 2147483648, %v2969_v23  ;;  %vm2975_vm13 = vweird.f32 %v2969_v23  ;;  %v2979_v48 = vand.u32 2147483647, %v2969_v23 }
0x3f07   :  { %v3247_v59 = vor.u32 1.1754944e-38, %v3246_v56  ;;  %vm3245_vm11 = vcmp.eq.f32.partialorder %v3244_v58, 8.507059e+37 }
0x3f08   :  { %v2982_v0 = vor.u32 1.1754944e-38, %v2981_v57  ;;  %vm2980_vm15 = vcmp.eq.f32.partialorder %v2979_v48, 8.507059e+37 }
0x3f0b   :  { %v4980_v50 = vpop.eup %4979 }
0x3f0c   :  { %v3236_v14 = vmul.f32 %v4980_v50, %v3234_v44  ;;  %v4982_v19 = vpop.eup %4981  ;;  %vm3241_vm8 = vweird.f32 %v4980_v50 }
0x3f0d   :  { %v2971_v54 = vmul.f32 %v4982_v19, %v2969_v23  ;;  %vm3242_vm10 = vmor %vm3240_vm9, %vm3241_vm8  ;;  %vm2976_vm12 = vweird.f32 %v4982_v19 }
0x3f0e   :  { %v3237_v33 = vsub.f32 1.0, %v3236_v14  ;;  %vm2977_vm14 = vmor %vm2975_vm13, %vm2976_vm12 }
0x3f0f   :  { %v2972_v25 = vsub.f32 1.0, %v2971_v54 }
0x3f10   :  { %v3238_v51 = vmul.f32 %v4980_v50, %v3237_v33 }
0x3f11   :  { %v2973_v60 = vmul.f32 %v4982_v19, %v2972_v25 }
0x3f12   :  { %v3239_v55 = vadd.f32 %v4980_v50, %v3238_v51 }
0x3f13   :  { %v2974_v62 = vadd.f32 %v4982_v19, %v2973_v60 }
0x3f14   :  { %v3243_v30 = vsel %vm3242_vm10, %v4980_v50, %v3239_v55 }
0x3f15   :  { %v3248_v61 = vsel %vm3245_vm11, %v3247_v59, %v3243_v30  ;;  %v2978_v63 = vsel %vm2977_vm14, %v4982_v19, %v2974_v62 }
0x3f16   :  { %v2983_v5 = vsel %vm2980_vm15, %v2982_v0, %v2978_v63  ;;  %v3251_v8 = vmul.f32 0.0, %v3248_v61 }
0x3f17   :  { %v2989_v20 = vmul.f32 %v2987_v17, %v2983_v5 }
0x3f5b   :  { %v3254_v7 = vpop.permute.xlu2 %3253 }
0x3f5c   :  { %v3256_v9 = vmul.f32 %v3254_v7, %v3248_v61 }
0x3f5e   :  { %3258 = vrot.lane.b32.xlu1 %v3256_v9, %s5342_s30 }
0x3f65   :  { %v2992_v1 = vpop.permute.xlu1 %2991 }
0x3f66   :  { %v2994_v49 = vmul.f32 %v2992_v1, %v2983_v5 }
0x3f68   :  { %2996 = vrot.lane.b32.xlu0 %v2994_v49, %s5342_s30 }
0x3fd0   :  { %v3259_v10 = vpop.permute.xlu1 %3258 }
0x3fd1   :  { %v6035_v16 = vadd.f32 %v3259_v10, %v3251_v8 }
0x3fd3   :  { %4983 = vtanh.f32 %v6035_v16 }
0x3fd9   :  { %v4984_v18 = vpop.eup %4983 }
0x3fda   :  { %v2997_v21 = vpop.permute.xlu0 %2996  ;;  %3264 = vrot.lane.b32.xlu0 %v4984_v18, %s5329_s21 }
0x3fdb   :  { %v6040_v46 = vadd.f32 %v2997_v21, %v2989_v20 }
0x3fdd   :  { %4985 = vtanh.f32 %v6040_v46  ;;  %v3052_v10 = vrot.slane %v6040_v46, 6 }
0x3fe3   :  { %v4986_v24 = vpop.eup %4985 }
0x3fe4   :  { %3002 = vrot.lane.b32.xlu2 %v4986_v24, %s5329_s21  ;;  %v3313_v24 = vrot.slane %v6035_v16, 6 }
0x403e   :  { %v3003_v2 = vpop.permute.xlu2 %3002 }
0x403f   :  { %v6044_v6 = vmul.f32 %v3003_v2, %v2983_v5 }
0x4041   :  { %v3006_v27 = vpack.c.bf16 %v6044_v6, %v6044_v6 }
0x4043   :  { %v3008_v43 = vrot.slane %v3006_v27, 1 }
0x4045   :  { %3009 = vrot.lane.b32.xlu1 %v3008_v43, %s5342_s30 }
0x404c   :  { %v3265_v26 = vpop.permute.xlu0 %3264 }
0x404d   :  { %v3267_v28 = vmul.f32 %v3265_v26, %v3248_v61 }
0x404f   :  { %v3268_v40 = vpack.c.bf16 %v3267_v28, %v3267_v28 }
0x4051   :  { %3270 = vrot.lane.b32.xlu2 %v3268_v40, %s5342_s30  ;;  %v3145_v40 = vsel %vm203_vm0, %v5996_v3, %v6044_v6 }
0x40ab   :  { %v3271_v34 = vpop.permute.xlu2 %3270 }
0x40b7   :  { %v3010_v31 = vpop.permute.xlu1 %3009 }
0x40b8   :  { %4590 = vmatmul.msk.bf16.vlgmr.msra.gmra.mxu2 %vm1024_vm2, %v3010_v31 }
0x40b9   :  { %3476 = vmatpush.bf16.msra.mxu2 %v6001_v52 }
0x40bd   :  { %3477 = vmatpush.bf16.msra.mxu2 %v6004_v29 }
0x40c8   :  { %4613 = vmatmul.msk.bf16.vlgmr.msrb.gmra.mxu2 %vm1024_vm2, %v3271_v34 }
0x40c9   :  { %3732 = vmatpush.bf16.msrb.mxu2 %v6001_v52 }
0x40cd   :  { %3733 = vmatpush.bf16.msrb.mxu2 %v6004_v29 }
0x413b   :  { %v3023_v35 = vpop.f32.mrf.mxu2 }
0x413c   :  { %v3028_v36 = vrot.slane %v3023_v35, 4 }
0x413e   :  { %v3030_v22 = vadd.f32 %v3028_v36, %v5982_v12 }
0x4140   :  { %4987 = vtanh.f32 %v3030_v22  ;;  %v4591_v4 = vmul.f32 -1.442695, %v3030_v22 }
0x4143   :  { %v3025_v15 = vpop.f32.mrf.mxu2 }
0x4146   :  { %v4988_v53 = vpop.eup %4987 }
0x4147   :  { %3056 = vrot.lane.b32.xlu0 %v4988_v53, %s5329_s21 }
0x414b   :  { %v3284_v11 = vpop.f32.mrf.mxu2 }
0x414c   :  { %v3289_v13 = vrot.slane %v3284_v11, 6 }
0x414e   :  { %v3291_v38 = vadd.f32 %v3289_v13, %v6029_v32 }
0x4150   :  { %4989 = vtanh.f32 %v3291_v38  ;;  %v4614_v45 = vmul.f32 -1.442695, %v3291_v38 }
0x4151   :  { %4991 = vpow2.f32 %v4591_v4 }
0x4153   :  { %v3286_v39 = vpop.f32.mrf.mxu2 }
0x4156   :  { %v4990_v41 = vpop.eup %4989 }
0x4157   :  { %3317 = vrot.lane.b32.xlu1 %v4990_v41, %s5329_s21  ;;  %v4992_v42 = vpop.eup %4991 }
0x4158   :  { %v3034_v44 = vadd.f32 1.0, %v4992_v42 }
0x415a   :  { %4993 = vrcp.f32 %v3034_v44  ;;  %v3046_v56 = vand.u32 2147483648, %v3034_v44  ;;  %vm3040_vm6 = vweird.f32 %v3034_v44  ;;  %v3044_v58 = vand.u32 2147483647, %v3034_v44 }
0x415b   :  { %4995 = vpow2.f32 %v4614_v45 }
0x415c   :  { %v3047_v59 = vor.u32 1.1754944e-38, %v3046_v56  ;;  %vm3045_vm8 = vcmp.eq.f32.partialorder %v3044_v58, 8.507059e+37 }
0x4160   :  { %v4994_v50 = vpop.eup %4993 }
0x4161   :  { %v4996_v23 = vpop.eup %4995  ;;  %v3036_v14 = vmul.f32 %v4994_v50, %v3034_v44  ;;  %vm3041_vm1 = vweird.f32 %v4994_v50 }
0x4162   :  { %v3295_v33 = vadd.f32 1.0, %v4996_v23  ;;  %vm3042_vm7 = vmor %vm3040_vm6, %vm3041_vm1 }
0x4163   :  { %v3037_v19 = vsub.f32 1.0, %v3036_v14 }
0x4164   :  { %4997 = vrcp.f32 %v3295_v33  ;;  %v3307_v48 = vand.u32 2147483648, %v3295_v33  ;;  %vm3301_vm10 = vweird.f32 %v3295_v33  ;;  %v3305_v63 = vand.u32 2147483647, %v3295_v33 }
0x4165   :  { %v3038_v51 = vmul.f32 %v4994_v50, %v3037_v19 }
0x4166   :  { %v3308_v1 = vor.u32 1.1754944e-38, %v3307_v48  ;;  %vm3306_vm12 = vcmp.eq.f32.partialorder %v3305_v63, 8.507059e+37 }
0x4167   :  { %v3039_v54 = vadd.f32 %v4994_v50, %v3038_v51 }
0x4169   :  { %v3043_v25 = vsel %vm3042_vm7, %v4994_v50, %v3039_v54 }
0x416a   :  { %v4998_v55 = vpop.eup %4997  ;;  %v3048_v60 = vsel %vm3045_vm8, %v3047_v59, %v3043_v25 }
0x416b   :  { %v3297_v30 = vmul.f32 %v4998_v55, %v3295_v33  ;;  %vm3302_vm9 = vweird.f32 %v4998_v55  ;;  %v3054_v17 = vmul.f32 %v3052_v10, %v3048_v60 }
0x416c   :  { %vm3303_vm11 = vmor %vm3301_vm10, %vm3302_vm9 }
0x416d   :  { %v3298_v9 = vsub.f32 1.0, %v3297_v30 }
0x416f   :  { %v3299_v62 = vmul.f32 %v4998_v55, %v3298_v9 }
0x4171   :  { %v3300_v57 = vadd.f32 %v4998_v55, %v3299_v62 }
0x4173   :  { %v3304_v0 = vsel %vm3303_vm11, %v4998_v55, %v3300_v57 }
0x4174   :  { %v3309_v49 = vsel %vm3306_vm12, %v3308_v1, %v3304_v0 }
0x4175   :  { %v3315_v2 = vmul.f32 %v3313_v24, %v3309_v49 }
0x41b9   :  { %v3057_v7 = vpop.permute.xlu0 %3056 }
0x41ba   :  { %v3059_v61 = vmul.f32 %v3057_v7, %v3048_v60 }
0x41bc   :  { %3061 = vrot.lane.b32.xlu2 %v3059_v61, %s5342_s30 }
0x41c9   :  { %v3318_v5 = vpop.permute.xlu1 %3317 }
0x41ca   :  { %v3320_v8 = vmul.f32 %v3318_v5, %v3309_v49 }
0x41cc   :  { %3322 = vrot.lane.b32.xlu0 %v3320_v8, %s5342_s30 }
0x4216   :  { %v3062_v18 = vpop.permute.xlu2 %3061 }
0x4217   :  { %v6063_v20 = vadd.f32 %v3062_v18, %v3054_v17 }
0x4219   :  { %4999 = vtanh.f32 %v6063_v20 }
0x421f   :  { %v5000_v21 = vpop.eup %4999 }
0x4220   :  { %3067 = vrot.lane.b32.xlu1 %v5000_v21, %s5329_s21 }
0x423e   :  { %v3323_v27 = vpop.permute.xlu0 %3322 }
0x423f   :  { %v3325_v43 = vadd.f32 %v3323_v27, %v3315_v2 }
0x4241   :  { %5001 = vtanh.f32 %v3325_v43  ;;  %v3378_v59 = vrot.slane %v3325_v43, 6 }
0x4247   :  { %v5002_v26 = vpop.eup %5001 }
0x4248   :  { %3328 = vrot.lane.b32.xlu2 %v5002_v26, %s5329_s21 }
0x4292   :  { %v3068_v28 = vpop.permute.xlu1 %3067 }
0x4293   :  { %v3070_v46 = vmul.f32 %v3068_v28, %v3048_v60 }
0x4295   :  { %v3071_v31 = vpack.c.bf16 %v3070_v46, %v3070_v46  ;;  %v6073_v34 = vsel %vm245_vm4, %v3145_v40, %v3070_v46 }
0x4297   :  { %v3073_v35 = vrot.slane %v3071_v31, 2 }
0x4299   :  { %3074 = vrot.lane.b32.xlu0 %v3073_v35, %s5342_s30 }
0x42a2   :  { %v3329_v16 = vpop.permute.xlu2 %3328 }
0x42a3   :  { %v3331_v36 = vmul.f32 %v3329_v16, %v3309_v49 }
0x42a5   :  { %v3332_v22 = vpack.c.bf16 %v3331_v36, %v3331_v36 }
0x42a7   :  { %v3334_v15 = vrot.slane %v3332_v22, 1 }
0x42a9   :  { %3335 = vrot.lane.b32.xlu1 %v3334_v15, %s5342_s30 }
0x430b   :  { %v3075_v53 = vpop.permute.xlu0 %3074 }
0x430c   :  { %4592 = vmatmul.msk.bf16.vlgmr.msra.gmra.mxu3 %vm1024_vm2, %v3075_v53 }
0x430d   :  { %3537 = vmatpush.bf16.msra.mxu3 %v6001_v52 }
0x4311   :  { %3538 = vmatpush.bf16.msra.mxu3 %v6004_v29 }
0x431b   :  { %v3336_v3 = vpop.permute.xlu1 %3335 }
0x431c   :  { %4615 = vmatmul.msk.bf16.vlgmr.msrb.gmra.mxu3 %vm1024_vm2, %v3336_v3 }
0x431d   :  { %3793 = vmatpush.bf16.msrb.mxu3 %v6001_v52 }
0x4321   :  { %3794 = vmatpush.bf16.msrb.mxu3 %v6004_v29 }
0x438f   :  { %v6083_v6 = vpop.f32.mrf.mxu3 }
0x4397   :  { %v3090_v11 = vpop.f32.mrf.mxu3 }
0x439f   :  { %v3349_v13 = vpop.f32.mrf.mxu3 }
0x43a0   :  { %v3354_v38 = vrot.slane %v3349_v13, 4 }
0x43a2   :  { %v3356_v39 = vadd.f32 %v3354_v38, %v6029_v32 }
0x43a4   :  { %5003 = vtanh.f32 %v3356_v39  ;;  %v4616_v42 = vmul.f32 -1.442695, %v3356_v39 }
0x43a6   :  { %5005 = vpow2.f32 %v4616_v42 }
0x43a7   :  { %v3351_v41 = vpop.f32.mrf.mxu3 }
0x43aa   :  { %v5004_v4 = vpop.eup %5003 }
0x43ab   :  { %3382 = vrot.lane.b32.xlu2 %v5004_v4, %s5329_s21  ;;  %v3193_v4 = vpop.f32.mrf.mxu0 }
0x43ac   :  { %v5006_v44 = vpop.eup %5005  ;;  %v6102_v42 = vadd.f32 %v6025_v37, %v3193_v4 }
0x43ad   :  { %v3360_v45 = vadd.f32 1.0, %v5006_v44 }
0x43af   :  { %5007 = vrcp.f32 %v3360_v45  ;;  %v3372_v51 = vand.u32 2147483648, %v3360_v45  ;;  %vm3366_vm14 = vweird.f32 %v3360_v45  ;;  %v3370_v54 = vand.u32 2147483647, %v3360_v45 }
0x43b1   :  { %v3373_v56 = vor.u32 1.1754944e-38, %v3372_v51  ;;  %vm3371_vm1 = vcmp.eq.f32.partialorder %v3370_v54, 8.507059e+37 }
0x43b5   :  { %v5008_v50 = vpop.eup %5007 }
0x43b6   :  { %v3362_v23 = vmul.f32 %v5008_v50, %v3360_v45  ;;  %vm3367_vm13 = vweird.f32 %v5008_v50 }
0x43b7   :  { %vm3368_vm15 = vmor %vm3366_vm14, %vm3367_vm13 }
0x43b8   :  { %v3363_v14 = vsub.f32 1.0, %v3362_v23 }
0x43ba   :  { %v3364_v33 = vmul.f32 %v5008_v50, %v3363_v14 }
0x43bc   :  { %v3365_v19 = vadd.f32 %v5008_v50, %v3364_v33 }
0x43be   :  { %v3369_v55 = vsel %vm3368_vm15, %v5008_v50, %v3365_v19 }
0x43bf   :  { %v3374_v25 = vsel %vm3371_vm1, %v3373_v56, %v3369_v55 }
0x43c0   :  { %v3380_v60 = vmul.f32 %v3378_v59, %v3374_v25  ;;  %v3093_v59 = vrot.slane %v6083_v6, 2 }
0x4405   :  { %v3383_v58 = vpop.permute.xlu2 %3382 }
0x4406   :  { %v3385_v30 = vmul.f32 %v3383_v58, %v3374_v25 }
0x4408   :  { %3387 = vrot.lane.b32.xlu0 %v3385_v30, %s5342_s30 }
0x447a   :  { %v3388_v7 = vpop.permute.xlu0 %3387 }
0x447b   :  { %v3390_v61 = vadd.f32 %v3388_v7, %v3380_v60 }
0x447d   :  { %5009 = vtanh.f32 %v3390_v61  ;;  %v3443_v36 = vrot.slane %v3390_v61, 6  ;;  %v3095_v61 = vadd.f32 %v3093_v59, %v5982_v12 }
0x447f   :  { %v4593_v12 = vmul.f32 -1.442695, %v3095_v61 }
0x4483   :  { %v5010_v9 = vpop.eup %5009 }
0x4484   :  { %3393 = vrot.lane.b32.xlu1 %v5010_v9, %s5329_s21 }
0x44f6   :  { %v3394_v62 = vpop.permute.xlu1 %3393 }
0x44f7   :  { %v3396_v57 = vmul.f32 %v3394_v62, %v3374_v25 }
0x44f9   :  { %v3397_v48 = vpack.c.bf16 %v3396_v57, %v3396_v57 }
0x44fb   :  { %v3399_v63 = vrot.slane %v3397_v48, 2 }
0x44fd   :  { %3400 = vrot.lane.b32.xlu2 %v3399_v63, %s5342_s30 }
0x4557   :  { %v3401_v0 = vpop.permute.xlu2 %3400 }
0x4558   :  { %4617 = vmatmul.msk.bf16.vlgmr.msrb.gmra.mxu1 %vm1024_vm2, %v3401_v0 }
0x4559   :  { %3923 = vmatpush.bf16.msrb.mxu1 %v6001_v52 }
0x455d   :  { %3924 = vmatpush.bf16.msrb.mxu1 %v6004_v29 }
0x45d5   :  { %v3414_v1 = vpop.f32.mrf.mxu1 }
0x45d6   :  { %v3419_v5 = vrot.slane %v3414_v1, 2 }
0x45d8   :  { %v3421_v49 = vadd.f32 %v3419_v5, %v6029_v32 }
0x45da   :  { %5011 = vtanh.f32 %v3421_v49  ;;  %v4618_v17 = vmul.f32 -1.442695, %v3421_v49 }
0x45dc   :  { %5013 = vpow2.f32 %v4618_v17 }
0x45dd   :  { %v3416_v8 = vpop.f32.mrf.mxu1 }
0x45e0   :  { %v5012_v10 = vpop.eup %5011 }
0x45e1   :  { %3447 = vrot.lane.b32.xlu0 %v5012_v10, %s5329_s21 }
0x45e2   :  { %v5014_v18 = vpop.eup %5013 }
0x45e3   :  { %v3425_v21 = vadd.f32 1.0, %v5014_v18 }
0x45e5   :  { %5015 = vrcp.f32 %v3425_v21  ;;  %v3437_v28 = vand.u32 2147483648, %v3425_v21  ;;  %vm3431_vm7 = vweird.f32 %v3425_v21  ;;  %v3435_v46 = vand.u32 2147483647, %v3425_v21 }
0x45e7   :  { %v3438_v40 = vor.u32 1.1754944e-38, %v3437_v28  ;;  %vm3436_vm9 = vcmp.eq.f32.partialorder %v3435_v46, 8.507059e+37 }
0x45eb   :  { %v5016_v24 = vpop.eup %5015 }
0x45ec   :  { %v3427_v2 = vmul.f32 %v5016_v24, %v3425_v21  ;;  %vm3432_vm6 = vweird.f32 %v5016_v24 }
0x45ed   :  { %vm3433_vm8 = vmor %vm3431_vm7, %vm3432_vm6 }
0x45ee   :  { %v3428_v27 = vsub.f32 1.0, %v3427_v2 }
0x45f0   :  { %v3429_v43 = vmul.f32 %v5016_v24, %v3428_v27 }
0x45f2   :  { %v3430_v26 = vadd.f32 %v5016_v24, %v3429_v43 }
0x45f4   :  { %v3434_v32 = vsel %vm3433_vm8, %v5016_v24, %v3430_v26 }
0x45f5   :  { %v3439_v35 = vsel %vm3436_vm9, %v3438_v40, %v3434_v32 }
0x45f6   :  { %v3445_v22 = vmul.f32 %v3443_v36, %v3439_v35 }
0x4653   :  { %v3448_v31 = vpop.permute.xlu0 %3447 }
0x4654   :  { %v3450_v16 = vmul.f32 %v3448_v31, %v3439_v35 }
0x4656   :  { %3452 = vrot.lane.b32.xlu1 %v3450_v16, %s5342_s30 }
0x46c8   :  { %v3453_v15 = vpop.permute.xlu1 %3452 }
0x46c9   :  { %v3455_v53 = vadd.f32 %v3453_v15, %v3445_v22 }
0x46cb   :  { %5017 = vtanh.f32 %v3455_v53  ;;  %v3505_v63 = vrot.slane %v3455_v53, 6  ;;  %v3117_v53 = vrot.slane %v6063_v20, 6 }
0x46d1   :  { %v5018_v3 = vpop.eup %5017 }
0x46d2   :  { %3458 = vrot.lane.b32.xlu2 %v5018_v3, %s5329_s21 }
0x472c   :  { %v3459_v11 = vpop.permute.xlu2 %3458 }
0x472d   :  { %v3461_v13 = vmul.f32 %v3459_v11, %v3439_v35 }
0x472f   :  { %v3462_v38 = vpack.c.bf16 %v3461_v13, %v3461_v13 }
0x4731   :  { %v3464_v39 = vrot.slane %v3462_v38, 3 }
0x4733   :  { %3465 = vrot.lane.b32.xlu0 %v3464_v39, %s5342_s30 }
0x47a5   :  { %v3466_v41 = vpop.permute.xlu0 %3465 }
0x47a6   :  { %4619 = vmatmul.msk.bf16.vlgmr.msra.gmra.mxu2 %vm1024_vm2, %v3466_v41 }
0x47a7   :  { %3988 = vmatpush.bf16.msra.mxu2 %v6001_v52 }
0x47ab   :  { %3989 = vmatpush.bf16.msra.mxu2 %v6004_v29 }
0x4829   :  { %v3479_v44 = vpop.f32.mrf.mxu2 }
0x482a   :  { %v3483_v45 = vadd.f32 %v3479_v44, %v6102_v42 }
0x482c   :  { %5019 = vtanh.f32 %v3483_v45  ;;  %v4620_v14 = vmul.f32 -1.442695, %v3483_v45 }
0x482e   :  { %5021 = vpow2.f32 %v4620_v14 }
0x4831   :  { %v3481_v50 = vpop.f32.mrf.mxu2 }
0x4832   :  { %v5020_v23 = vpop.eup %5019 }
0x4833   :  { %3509 = vrot.lane.b32.xlu1 %v5020_v23, %s5329_s21 }
0x4834   :  { %v5022_v33 = vpop.eup %5021 }
0x4835   :  { %v3487_v19 = vadd.f32 1.0, %v5022_v33 }
0x4837   :  { %5023 = vrcp.f32 %v3487_v19  ;;  %v3499_v25 = vand.u32 2147483648, %v3487_v19  ;;  %vm3493_vm11 = vweird.f32 %v3487_v19  ;;  %v3497_v30 = vand.u32 2147483647, %v3487_v19 }
0x4838   :  { %5025 = vtanh.f32 %v3095_v61 }
0x4839   :  { %v3500_v7 = vor.u32 1.1754944e-38, %v3499_v25  ;;  %vm3498_vm13 = vcmp.eq.f32.partialorder %v3497_v30, 8.507059e+37 }
0x483d   :  { %v5024_v51 = vpop.eup %5023 }
0x483e   :  { %v3489_v54 = vmul.f32 %v5024_v51, %v3487_v19  ;;  %vm3494_vm10 = vweird.f32 %v5024_v51  ;;  %v5026_v48 = vpop.eup %5025 }
0x483f   :  { %vm3495_vm12 = vmor %vm3493_vm11, %vm3494_vm10 }
0x4840   :  { %v3490_v55 = vsub.f32 1.0, %v3489_v54 }
0x4842   :  { %v3491_v56 = vmul.f32 %v5024_v51, %v3490_v55 }
0x4844   :  { %v3492_v58 = vadd.f32 %v5024_v51, %v3491_v56 }
0x4846   :  { %v3496_v60 = vsel %vm3495_vm12, %v5024_v51, %v3492_v58 }
0x4847   :  { %v3501_v62 = vsel %vm3498_vm13, %v3500_v7, %v3496_v60 }
0x4848   :  { %v3507_v0 = vmul.f32 %v3505_v63, %v3501_v62 }
0x48a5   :  { %v3510_v9 = vpop.permute.xlu1 %3509 }
0x48a6   :  { %v3512_v57 = vmul.f32 %v3510_v9, %v3501_v62 }
0x48a8   :  { %3514 = vrot.lane.b32.xlu2 %v3512_v57, %s5342_s30 }
0x48b0   :  { %3121 = vrot.lane.b32.xlu2 %v5026_v48, %s5329_s21 }
0x4902   :  { %v3515_v1 = vpop.permute.xlu2 %3514 }
0x4903   :  { %v6110_v5 = vadd.f32 %v3515_v1, %v3507_v0 }
0x4905   :  { %5027 = vtanh.f32 %v6110_v5  ;;  %v3569_v61 = vrot.slane %v6110_v5, 6 }
0x4906   :  { %5029 = vpow2.f32 %v4593_v12 }
0x490a   :  { %v3122_v40 = vpop.permute.xlu2 %3121 }
0x490b   :  { %v5028_v6 = vpop.eup %5027 }
0x490c   :  { %3520 = vrot.lane.b32.xlu0 %v5028_v6, %s5329_s21  ;;  %v5030_v49 = vpop.eup %5029 }
0x490d   :  { %v3099_v8 = vadd.f32 1.0, %v5030_v49 }
0x490f   :  { %5031 = vrcp.f32 %v3099_v8  ;;  %v3111_v26 = vand.u32 2147483648, %v3099_v8  ;;  %vm3105_vm15 = vweird.f32 %v3099_v8  ;;  %v3109_v28 = vand.u32 2147483647, %v3099_v8 }
0x4911   :  { %v3112_v32 = vor.u32 1.1754944e-38, %v3111_v26  ;;  %vm3110_vm6 = vcmp.eq.f32.partialorder %v3109_v28, 8.507059e+37 }
0x4915   :  { %v5032_v10 = vpop.eup %5031 }
0x4916   :  { %v3101_v17 = vmul.f32 %v5032_v10, %v3099_v8  ;;  %vm3106_vm14 = vweird.f32 %v5032_v10 }
0x4917   :  { %vm3107_vm1 = vmor %vm3105_vm15, %vm3106_vm14 }
0x4918   :  { %v3102_v18 = vsub.f32 1.0, %v3101_v17 }
0x491a   :  { %v3103_v21 = vmul.f32 %v5032_v10, %v3102_v18 }
0x491c   :  { %v3104_v27 = vadd.f32 %v5032_v10, %v3103_v21 }
0x491e   :  { %v3108_v46 = vsel %vm3107_vm1, %v5032_v10, %v3104_v27 }
0x491f   :  { %v3113_v31 = vsel %vm3110_vm6, %v3112_v32, %v3108_v46 }
0x4920   :  { %v3124_v35 = vmul.f32 %v3122_v40, %v3113_v31  ;;  %v3119_v11 = vmul.f32 %v3117_v53, %v3113_v31 }
0x497e   :  { %v3521_v24 = vpop.permute.xlu0 %3520 }
0x497f   :  { %v3523_v2 = vmul.f32 %v3521_v24, %v3501_v62 }
0x4981   :  { %v3524_v43 = vpack.c.bf16 %v3523_v2, %v3523_v2 }
0x4983   :  { %3526 = vrot.lane.b32.xlu1 %v3524_v43, %s5342_s30 }
0x498b   :  { %3126 = vrot.lane.b32.xlu1 %v3124_v35, %s5342_s30 }
0x49f5   :  { %v3527_v16 = vpop.permute.xlu1 %3526 }
0x49f6   :  { %4621 = vmatmul.msk.bf16.vlgmr.msra.gmra.mxu3 %vm1024_vm2, %v3527_v16 }
0x49f7   :  { %4049 = vmatpush.bf16.msra.mxu3 %v6001_v52 }
0x49fb   :  { %4050 = vmatpush.bf16.msra.mxu3 %v6004_v29 }
0x49fd   :  { %v3127_v3 = vpop.permute.xlu1 %3126 }
0x49fe   :  { %v3129_v38 = vadd.f32 %v3127_v3, %v3119_v11 }
0x4a79   :  { %v3540_v36 = vpop.f32.mrf.mxu3 }
0x4a7a   :  { %v3545_v22 = vrot.slane %v3540_v36, 6 }
0x4a7c   :  { %v3547_v15 = vadd.f32 %v3545_v22, %v6102_v42 }
0x4a7e   :  { %5033 = vtanh.f32 %v3547_v15  ;;  %v4622_v4 = vmul.f32 -1.442695, %v3547_v15 }
0x4a7f   :  { %5035 = vtanh.f32 %v3129_v38 }
0x4a80   :  { %5037 = vpow2.f32 %v4622_v4 }
0x4a81   :  { %v3542_v13 = vpop.f32.mrf.mxu3 }
0x4a84   :  { %v5034_v39 = vpop.eup %5033 }
0x4a85   :  { %3573 = vrot.lane.b32.xlu0 %v5034_v39, %s5329_s21  ;;  %v5036_v41 = vpop.eup %5035 }
0x4a86   :  { %v5038_v44 = vpop.eup %5037 }
0x4a87   :  { %v3551_v45 = vadd.f32 1.0, %v5038_v44 }
0x4a89   :  { %5039 = vrcp.f32 %v3551_v45  ;;  %v3563_v19 = vand.u32 2147483648, %v3551_v45  ;;  %vm3557_vm8 = vweird.f32 %v3551_v45  ;;  %v3561_v51 = vand.u32 2147483647, %v3551_v45 }
0x4a8b   :  { %v3564_v55 = vor.u32 1.1754944e-38, %v3563_v19  ;;  %vm3562_vm10 = vcmp.eq.f32.partialorder %v3561_v51, 8.507059e+37 }
0x4a8d   :  { %3132 = vrot.lane.b32.xlu0 %v5036_v41, %s5329_s21 }
0x4a8f   :  { %v5040_v50 = vpop.eup %5039 }
0x4a90   :  { %v3553_v23 = vmul.f32 %v5040_v50, %v3551_v45  ;;  %vm3558_vm7 = vweird.f32 %v5040_v50 }
0x4a91   :  { %vm3559_vm9 = vmor %vm3557_vm8, %vm3558_vm7 }
0x4a92   :  { %v3554_v20 = vsub.f32 1.0, %v3553_v23 }
0x4a94   :  { %v3555_v14 = vmul.f32 %v5040_v50, %v3554_v20 }
0x4a96   :  { %v3556_v33 = vadd.f32 %v5040_v50, %v3555_v14 }
0x4a98   :  { %v3560_v54 = vsel %vm3559_vm9, %v5040_v50, %v3556_v33 }
0x4a99   :  { %v3565_v58 = vsel %vm3562_vm10, %v3564_v55, %v3560_v54 }
0x4a9a   :  { %v3571_v9 = vmul.f32 %v3569_v61, %v3565_v58 }
0x4af7   :  { %v3574_v56 = vpop.permute.xlu0 %3573 }
0x4af8   :  { %v3576_v25 = vmul.f32 %v3574_v56, %v3565_v58 }
0x4afa   :  { %3578 = vrot.lane.b32.xlu2 %v3576_v25, %s5342_s30 }
0x4aff   :  { %v3133_v30 = vpop.permute.xlu0 %3132 }
0x4b00   :  { %v3135_v59 = vmul.f32 %v3133_v30, %v3113_v31 }
0x4b02   :  { %v3147_v60 = vsel %vm225_vm3, %v6073_v34, %v3135_v59 }
0x4b03   :  { %v3149_v7 = vpack.c.bf16 %v3147_v60, %v5974_v47 }
0x4b05   :  { %3162 = vrot.lane.b32.xlu2 %v3149_v7, %s5342_s30 }
0x4b54   :  { %v3579_v62 = vpop.permute.xlu2 %3578 }
0x4b55   :  { %v3581_v57 = vadd.f32 %v3579_v62, %v3571_v9 }
0x4b57   :  { %5041 = vtanh.f32 %v3581_v57  ;;  %v3634_v15 = vrot.slane %v3581_v57, 6 }
0x4b5d   :  { %v5042_v48 = vpop.eup %5041 }
0x4b5e   :  { %3584 = vrot.lane.b32.xlu1 %v5042_v48, %s5329_s21 }
0x4b5f   :  { %v3163_v63 = vpop.permute.xlu2 %3162 }
0x4b60   :  { %4603 = vmatmul.msk.bf16.gmra.mxu0 %vm1024_vm2, %v3163_v63 }
0x4bd0   :  { %v3585_v0 = vpop.permute.xlu1 %3584 }
0x4bd1   :  { %v3587_v1 = vmul.f32 %v3585_v0, %v3565_v58 }
0x4bd3   :  { %v3588_v6 = vpack.c.bf16 %v3587_v1, %v3587_v1 }
0x4bd5   :  { %v3590_v34 = vrot.slane %v3588_v6, 1 }
0x4bd7   :  { %3591 = vrot.lane.b32.xlu0 %v3590_v34, %s5342_s30 }
0x4bdd   :  { %v6135_v5 = vpop.f32.mrf.mxu0 }
0x4be5   :  { %v6137_v12 = vpop.f32.mrf.mxu0 }
0x4c49   :  { %v3592_v47 = vpop.permute.xlu0 %3591 }
0x4c4a   :  { %4623 = vmatmul.msk.bf16.vlgmr.msra.gmra.mxu0 %vm1024_vm2, %v3592_v47  ;;  %v6155_v47 = vadd.f32 %v6025_v37, %v6135_v5 }
0x4c4b   :  { %4114 = vmatpush.bf16.msra.mxu0 %v6001_v52 }
0x4c4f   :  { %4115 = vmatpush.bf16.msra.mxu0 %v6004_v29 }
0x4cc7   :  { %v3605_v49 = vpop.f32.mrf.mxu0 }
0x4cc8   :  { %v3610_v8 = vrot.slane %v3605_v49, 4 }
0x4cca   :  { %v3612_v10 = vadd.f32 %v3610_v8, %v6102_v42 }
0x4ccc   :  { %5043 = vtanh.f32 %v3612_v10  ;;  %v4624_v21 = vmul.f32 -1.442695, %v3612_v10 }
0x4cce   :  { %5045 = vpow2.f32 %v4624_v21 }
0x4ccf   :  { %v3607_v17 = vpop.f32.mrf.mxu0 }
0x4cd2   :  { %v5044_v18 = vpop.eup %5043 }
0x4cd3   :  { %3638 = vrot.lane.b32.xlu1 %v5044_v18, %s5329_s21 }
0x4cd4   :  { %v5046_v24 = vpop.eup %5045 }
0x4cd5   :  { %v3616_v2 = vadd.f32 1.0, %v5046_v24 }
0x4cd7   :  { %5047 = vrcp.f32 %v3616_v2  ;;  %v3628_v32 = vand.u32 2147483648, %v3616_v2  ;;  %vm3622_vm12 = vweird.f32 %v3616_v2  ;;  %v3626_v40 = vand.u32 2147483647, %v3616_v2 }
0x4cd9   :  { %v3629_v35 = vor.u32 1.1754944e-38, %v3628_v32  ;;  %vm3627_vm14 = vcmp.eq.f32.partialorder %v3626_v40, 8.507059e+37 }
0x4cdd   :  { %v5048_v27 = vpop.eup %5047 }
0x4cde   :  { %v3618_v43 = vmul.f32 %v5048_v27, %v3616_v2  ;;  %vm3623_vm11 = vweird.f32 %v5048_v27 }
0x4cdf   :  { %vm3624_vm13 = vmor %vm3622_vm12, %vm3623_vm11 }
0x4ce0   :  { %v3619_v26 = vsub.f32 1.0, %v3618_v43 }
0x4ce2   :  { %v3620_v28 = vmul.f32 %v5048_v27, %v3619_v26 }
0x4ce4   :  { %v3621_v46 = vadd.f32 %v5048_v27, %v3620_v28 }
0x4ce6   :  { %v3625_v31 = vsel %vm3624_vm13, %v5048_v27, %v3621_v46 }
0x4ce7   :  { %v3630_v36 = vsel %vm3627_vm14, %v3629_v35, %v3625_v31 }
0x4ce8   :  { %v3636_v53 = vmul.f32 %v3634_v15, %v3630_v36 }
0x4d45   :  { %v3639_v16 = vpop.permute.xlu1 %3638 }
0x4d46   :  { %v3641_v22 = vmul.f32 %v3639_v16, %v3630_v36 }
0x4d48   :  { %3643 = vrot.lane.b32.xlu2 %v3641_v22, %s5342_s30 }
0x4da2   :  { %v3644_v3 = vpop.permute.xlu2 %3643 }
0x4da3   :  { %v3646_v11 = vadd.f32 %v3644_v3, %v3636_v53 }
0x4da5   :  { %5049 = vtanh.f32 %v3646_v11  ;;  %v3699_v61 = vrot.slane %v3646_v11, 6 }
0x4dab   :  { %v5050_v13 = vpop.eup %5049 }
0x4dac   :  { %3649 = vrot.lane.b32.xlu0 %v5050_v13, %s5329_s21 }
0x4e1e   :  { %v3650_v38 = vpop.permute.xlu0 %3649 }
0x4e1f   :  { %v3652_v39 = vmul.f32 %v3650_v38, %v3630_v36 }
0x4e21   :  { %v3653_v41 = vpack.c.bf16 %v3652_v39, %v3652_v39 }
0x4e23   :  { %v3655_v4 = vrot.slane %v3653_v41, 2 }
0x4e25   :  { %3656 = vrot.lane.b32.xlu1 %v3655_v4, %s5342_s30 }
0x4e97   :  { %v3657_v44 = vpop.permute.xlu1 %3656 }
0x4e98   :  { %4625 = vmatmul.msk.bf16.vlgmr.msra.gmra.mxu1 %vm1024_vm2, %v3657_v44 }
0x4e99   :  { %4179 = vmatpush.bf16.msra.mxu1 %v6001_v52 }
0x4e9d   :  { %4180 = vmatpush.bf16.msra.mxu1 %v6004_v29 }
0x4f15   :  { %v3670_v45 = vpop.f32.mrf.mxu1 }
0x4f16   :  { %v3675_v50 = vrot.slane %v3670_v45, 2 }
0x4f18   :  { %v3677_v23 = vadd.f32 %v3675_v50, %v6102_v42 }
0x4f1a   :  { %5051 = vtanh.f32 %v3677_v23  ;;  %v4626_v33 = vmul.f32 -1.442695, %v3677_v23 }
0x4f1c   :  { %5053 = vpow2.f32 %v4626_v33 }
0x4f1d   :  { %v3672_v20 = vpop.f32.mrf.mxu1 }
0x4f20   :  { %v5052_v14 = vpop.eup %5051 }
0x4f21   :  { %3703 = vrot.lane.b32.xlu2 %v5052_v14, %s5329_s21 }
0x4f22   :  { %v5054_v19 = vpop.eup %5053 }
0x4f23   :  { %v3681_v51 = vadd.f32 1.0, %v5054_v19 }
0x4f25   :  { %5055 = vrcp.f32 %v3681_v51  ;;  %v3693_v29 = vand.u32 2147483648, %v3681_v51  ;;  %vm3687_vm1 = vweird.f32 %v3681_v51  ;;  %v3691_v25 = vand.u32 2147483647, %v3681_v51 }
0x4f27   :  { %v3694_v30 = vor.u32 1.1754944e-38, %v3693_v29  ;;  %vm3692_vm7 = vcmp.eq.f32.partialorder %v3691_v25, 8.507059e+37 }
0x4f2b   :  { %v5056_v54 = vpop.eup %5055 }
0x4f2c   :  { %v3683_v55 = vmul.f32 %v5056_v54, %v3681_v51  ;;  %vm3688_vm15 = vweird.f32 %v5056_v54 }
0x4f2d   :  { %vm3689_vm6 = vmor %vm3687_vm1, %vm3688_vm15 }
0x4f2e   :  { %v3684_v56 = vsub.f32 1.0, %v3683_v55 }
0x4f30   :  { %v3685_v52 = vmul.f32 %v5056_v54, %v3684_v56 }
0x4f32   :  { %v3686_v58 = vadd.f32 %v5056_v54, %v3685_v52 }
0x4f34   :  { %v3690_v42 = vsel %vm3689_vm6, %v5056_v54, %v3686_v58 }
0x4f35   :  { %v3695_v60 = vsel %vm3692_vm7, %v3694_v30, %v3690_v42 }
0x4f36   :  { %v3701_v9 = vmul.f32 %v3699_v61, %v3695_v60 }
0x4f7b   :  { %v3704_v59 = vpop.permute.xlu2 %3703 }
0x4f7c   :  { %v3706_v7 = vmul.f32 %v3704_v59, %v3695_v60 }
0x4f7e   :  { %3708 = vrot.lane.b32.xlu0 %v3706_v7, %s5342_s30 }
0x4ff0   :  { %v3709_v62 = vpop.permute.xlu0 %3708 }
0x4ff1   :  { %v3711_v57 = vadd.f32 %v3709_v62, %v3701_v9 }
0x4ff3   :  { %5057 = vtanh.f32 %v3711_v57  ;;  %v3761_v16 = vrot.slane %v3711_v57, 6 }
0x4ff9   :  { %v5058_v48 = vpop.eup %5057 }
0x4ffa   :  { %3714 = vrot.lane.b32.xlu1 %v5058_v48, %s5329_s21 }
0x506c   :  { %v3715_v63 = vpop.permute.xlu1 %3714 }
0x506d   :  { %v3717_v0 = vmul.f32 %v3715_v63, %v3695_v60 }
0x506f   :  { %v3718_v1 = vpack.c.bf16 %v3717_v0, %v3717_v0 }
0x5071   :  { %v3720_v6 = vrot.slane %v3718_v1, 3 }
0x5073   :  { %3721 = vrot.lane.b32.xlu2 %v3720_v6, %s5342_s30 }
0x50cd   :  { %v3722_v34 = vpop.permute.xlu2 %3721 }
0x50ce   :  { %4627 = vmatmul.msk.bf16.vlgmr.msrb.gmra.mxu2 %vm1024_vm2, %v3722_v34 }
0x5151   :  { %v3735_v49 = vpop.f32.mrf.mxu2 }
0x5152   :  { %v3739_v8 = vadd.f32 %v3735_v49, %v6155_v47 }
0x5154   :  { %5059 = vtanh.f32 %v3739_v8  ;;  %v4628_v18 = vmul.f32 -1.442695, %v3739_v8 }
0x5156   :  { %5061 = vpow2.f32 %v4628_v18 }
0x5159   :  { %v3737_v10 = vpop.f32.mrf.mxu2 }
0x515a   :  { %v5060_v17 = vpop.eup %5059 }
0x515b   :  { %3765 = vrot.lane.b32.xlu0 %v5060_v17, %s5329_s21 }
0x515c   :  { %v5062_v21 = vpop.eup %5061 }
0x515d   :  { %v3743_v24 = vadd.f32 1.0, %v5062_v21 }
0x515f   :  { %5063 = vrcp.f32 %v3743_v24  ;;  %v3755_v37 = vand.u32 2147483648, %v3743_v24  ;;  %vm3749_vm9 = vweird.f32 %v3743_v24  ;;  %v3753_v5 = vand.u32 2147483647, %v3743_v24 }
0x5161   :  { %v3756_v32 = vor.u32 1.1754944e-38, %v3755_v37  ;;  %vm3754_vm11 = vcmp.eq.f32.partialorder %v3753_v5, 8.507059e+37 }
0x5165   :  { %v5064_v2 = vpop.eup %5063 }
0x5166   :  { %v3745_v27 = vmul.f32 %v5064_v2, %v3743_v24  ;;  %vm3750_vm8 = vweird.f32 %v5064_v2 }
0x5167   :  { %vm3751_vm10 = vmor %vm3749_vm9, %vm3750_vm8 }
0x5168   :  { %v3746_v43 = vsub.f32 1.0, %v3745_v27 }
0x516a   :  { %v3747_v26 = vmul.f32 %v5064_v2, %v3746_v43 }
0x516c   :  { %v3748_v28 = vadd.f32 %v5064_v2, %v3747_v26 }
0x516e   :  { %v3752_v46 = vsel %vm3751_vm10, %v5064_v2, %v3748_v28 }
0x516f   :  { %v3757_v31 = vsel %vm3754_vm11, %v3756_v32, %v3752_v46 }
0x5170   :  { %v3763_v36 = vmul.f32 %v3761_v16, %v3757_v31 }
0x51cd   :  { %v3766_v40 = vpop.permute.xlu0 %3765 }
0x51ce   :  { %v3768_v35 = vmul.f32 %v3766_v40, %v3757_v31 }
0x51d0   :  { %3770 = vrot.lane.b32.xlu1 %v3768_v35, %s5342_s30 }
0x5242   :  { %v3771_v22 = vpop.permute.xlu1 %3770 }
0x5243   :  { %v3773_v15 = vadd.f32 %v3771_v22, %v3763_v36 }
0x5245   :  { %5065 = vtanh.f32 %v3773_v15  ;;  %v3825_v30 = vrot.slane %v3773_v15, 6 }
0x524b   :  { %v5066_v53 = vpop.eup %5065 }
0x524c   :  { %3776 = vrot.lane.b32.xlu2 %v5066_v53, %s5329_s21 }
0x52a6   :  { %v3777_v3 = vpop.permute.xlu2 %3776 }
0x52a7   :  { %v6161_v11 = vmul.f32 %v3777_v3, %v3757_v31 }
0x52a9   :  { %v3780_v13 = vpack.c.bf16 %v6161_v11, %v6161_v11 }
0x52ab   :  { %3782 = vrot.lane.b32.xlu0 %v3780_v13, %s5342_s30 }
0x531d   :  { %v3783_v38 = vpop.permute.xlu0 %3782 }
0x531e   :  { %4629 = vmatmul.msk.bf16.vlgmr.msrb.gmra.mxu3 %vm1024_vm2, %v3783_v38 }
0x53a1   :  { %v3796_v39 = vpop.f32.mrf.mxu3 }
0x53a2   :  { %v3801_v41 = vrot.slane %v3796_v39, 6 }
0x53a4   :  { %v3803_v4 = vadd.f32 %v3801_v41, %v6155_v47 }
0x53a6   :  { %5067 = vtanh.f32 %v3803_v4  ;;  %v4630_v50 = vmul.f32 -1.442695, %v3803_v4 }
0x53a8   :  { %5069 = vpow2.f32 %v4630_v50 }
0x53a9   :  { %v3798_v44 = vpop.f32.mrf.mxu3 }
0x53ac   :  { %v5068_v45 = vpop.eup %5067 }
0x53ad   :  { %3829 = vrot.lane.b32.xlu1 %v5068_v45, %s5329_s21 }
0x53ae   :  { %v5070_v23 = vpop.eup %5069 }
0x53af   :  { %v3807_v20 = vadd.f32 1.0, %v5070_v23 }
0x53b1   :  { %5071 = vrcp.f32 %v3807_v20  ;;  %v3819_v55 = vand.u32 2147483648, %v3807_v20  ;;  %vm3813_vm13 = vweird.f32 %v3807_v20  ;;  %v3817_v56 = vand.u32 2147483647, %v3807_v20 }
0x53b3   :  { %v3820_v58 = vor.u32 1.1754944e-38, %v3819_v55  ;;  %vm3818_vm15 = vcmp.eq.f32.partialorder %v3817_v56, 8.507059e+37 }
0x53b7   :  { %v5072_v14 = vpop.eup %5071 }
0x53b8   :  { %v3809_v33 = vmul.f32 %v5072_v14, %v3807_v20  ;;  %vm3814_vm12 = vweird.f32 %v5072_v14 }
0x53b9   :  { %vm3815_vm14 = vmor %vm3813_vm13, %vm3814_vm12 }
0x53ba   :  { %v3810_v19 = vsub.f32 1.0, %v3809_v33 }
0x53bc   :  { %v3811_v51 = vmul.f32 %v5072_v14, %v3810_v19 }
0x53be   :  { %v3812_v54 = vadd.f32 %v5072_v14, %v3811_v51 }
0x53c0   :  { %v3816_v52 = vsel %vm3815_vm14, %v5072_v14, %v3812_v54 }
0x53c1   :  { %v3821_v25 = vsel %vm3818_vm15, %v3820_v58, %v3816_v52 }
0x53c2   :  { %v3827_v59 = vmul.f32 %v3825_v30, %v3821_v25 }
0x541f   :  { %v3830_v29 = vpop.permute.xlu1 %3829 }
0x5420   :  { %v3832_v42 = vmul.f32 %v3830_v29, %v3821_v25 }
0x5422   :  { %3834 = vrot.lane.b32.xlu2 %v3832_v42, %s5342_s30 }
0x547c   :  { %v3835_v60 = vpop.permute.xlu2 %3834 }
0x547d   :  { %v3837_v7 = vadd.f32 %v3835_v60, %v3827_v59 }
0x547f   :  { %5073 = vtanh.f32 %v3837_v7  ;;  %v3890_v40 = vrot.slane %v3837_v7, 6 }
0x5485   :  { %v5074_v61 = vpop.eup %5073 }
0x5486   :  { %3840 = vrot.lane.b32.xlu0 %v5074_v61, %s5329_s21 }
0x54f8   :  { %v3841_v9 = vpop.permute.xlu0 %3840 }
0x54f9   :  { %v3843_v62 = vmul.f32 %v3841_v9, %v3821_v25 }
0x54fb   :  { %v3844_v57 = vpack.c.bf16 %v3843_v62, %v3843_v62  ;;  %v4230_v53 = vsel %vm203_vm0, %v6161_v11, %v3843_v62 }
0x54fd   :  { %v3846_v48 = vrot.slane %v3844_v57, 1 }
0x54ff   :  { %3847 = vrot.lane.b32.xlu1 %v3846_v48, %s5342_s30 }
0x5571   :  { %v3848_v63 = vpop.permute.xlu1 %3847 }
0x5572   :  { %4631 = vmatmul.msk.bf16.vlgmr.msrb.gmra.mxu0 %vm1024_vm2, %v3848_v63 }
0x55ef   :  { %v3861_v0 = vpop.f32.mrf.mxu0 }
0x55f0   :  { %v3866_v1 = vrot.slane %v3861_v0, 4  ;;  %v5125_v0 = vld [vmem:[%s6262_s15] ss:$0 sm:$0xff] }
0x55f2   :  { %v3868_v6 = vadd.f32 %v3866_v1, %v6155_v47  ;;  %v6195_v1 = vadd.f32 %v5125_v0, %v6137_v12 }
0x55f4   :  { %5075 = vtanh.f32 %v3868_v6  ;;  %v4632_v8 = vmul.f32 -1.442695, %v3868_v6 }
0x55f6   :  { %5077 = vpow2.f32 %v4632_v8 }
0x55f7   :  { %v3863_v34 = vpop.f32.mrf.mxu0 }
0x55fa   :  { %v5076_v49 = vpop.eup %5075 }
0x55fb   :  { %3894 = vrot.lane.b32.xlu2 %v5076_v49, %s5329_s21 }
0x55fc   :  { %v5078_v10 = vpop.eup %5077 }
0x55fd   :  { %v3872_v17 = vadd.f32 1.0, %v5078_v10 }
0x55ff   :  { %5079 = vrcp.f32 %v3872_v17  ;;  %v3884_v43 = vand.u32 2147483648, %v3872_v17  ;;  %vm3878_vm6 = vweird.f32 %v3872_v17  ;;  %v3882_v26 = vand.u32 2147483647, %v3872_v17 }
0x5601   :  { %v3885_v37 = vor.u32 1.1754944e-38, %v3884_v43  ;;  %vm3883_vm8 = vcmp.eq.f32.partialorder %v3882_v26, 8.507059e+37 }
0x5605   :  { %v5080_v18 = vpop.eup %5079 }
0x5606   :  { %v3874_v21 = vmul.f32 %v5080_v18, %v3872_v17  ;;  %vm3879_vm1 = vweird.f32 %v5080_v18 }
0x5607   :  { %vm3880_vm7 = vmor %vm3878_vm6, %vm3879_vm1 }
0x5608   :  { %v3875_v24 = vsub.f32 1.0, %v3874_v21 }
0x560a   :  { %v3876_v2 = vmul.f32 %v5080_v18, %v3875_v24 }
0x560c   :  { %v3877_v27 = vadd.f32 %v5080_v18, %v3876_v2 }
0x560e   :  { %v3881_v28 = vsel %vm3880_vm7, %v5080_v18, %v3877_v27 }
0x560f   :  { %v3886_v46 = vsel %vm3883_vm8, %v3885_v37, %v3881_v28 }
0x5610   :  { %v3892_v31 = vmul.f32 %v3890_v40, %v3886_v46 }
0x5655   :  { %v3895_v5 = vpop.permute.xlu2 %3894 }
0x5656   :  { %v3897_v32 = vmul.f32 %v3895_v5, %v3886_v46 }
0x5658   :  { %3899 = vrot.lane.b32.xlu0 %v3897_v32, %s5342_s30 }
0x56ca   :  { %v3900_v35 = vpop.permute.xlu0 %3899 }
0x56cb   :  { %v3902_v16 = vadd.f32 %v3900_v35, %v3892_v31 }
0x56cd   :  { %5081 = vtanh.f32 %v3902_v16  ;;  %v3955_v42 = vrot.slane %v3902_v16, 6 }
0x56d3   :  { %v5082_v36 = vpop.eup %5081 }
0x56d4   :  { %3905 = vrot.lane.b32.xlu1 %v5082_v36, %s5329_s21 }
0x5746   :  { %v3906_v22 = vpop.permute.xlu1 %3905 }
0x5747   :  { %v3908_v15 = vmul.f32 %v3906_v22, %v3886_v46 }
0x5749   :  { %v3909_v3 = vpack.c.bf16 %v3908_v15, %v3908_v15  ;;  %v4231_v13 = vsel %vm245_vm4, %v4230_v53, %v3908_v15 }
0x574b   :  { %v3911_v38 = vrot.slane %v3909_v3, 2 }
0x574d   :  { %3912 = vrot.lane.b32.xlu2 %v3911_v38, %s5342_s30 }
0x57a7   :  { %v3913_v39 = vpop.permute.xlu2 %3912 }
0x57a8   :  { %4633 = vmatmul.msk.bf16.vlgmr.msrb.gmra.mxu1 %vm1024_vm2, %v3913_v39 }
0x5825   :  { %v3926_v41 = vpop.f32.mrf.mxu1 }
0x5826   :  { %v3931_v4 = vrot.slane %v3926_v41, 2 }
0x5828   :  { %v3933_v44 = vadd.f32 %v3931_v4, %v6155_v47 }
0x582a   :  { %5083 = vtanh.f32 %v3933_v44  ;;  %v4634_v23 = vmul.f32 -1.442695, %v3933_v44 }
0x582c   :  { %5085 = vpow2.f32 %v4634_v23 }
0x582d   :  { %v3928_v45 = vpop.f32.mrf.mxu1 }
0x5830   :  { %v5084_v50 = vpop.eup %5083 }
0x5831   :  { %3959 = vrot.lane.b32.xlu0 %v5084_v50, %s5329_s21 }
0x5832   :  { %v5086_v11 = vpop.eup %5085 }
0x5833   :  { %v3937_v20 = vadd.f32 1.0, %v5086_v11 }
0x5835   :  { %5087 = vrcp.f32 %v3937_v20  ;;  %v3949_v55 = vand.u32 2147483648, %v3937_v20  ;;  %vm3943_vm10 = vweird.f32 %v3937_v20  ;;  %v3947_v56 = vand.u32 2147483647, %v3937_v20 }
0x5837   :  { %v3950_v52 = vor.u32 1.1754944e-38, %v3949_v55  ;;  %vm3948_vm12 = vcmp.eq.f32.partialorder %v3947_v56, 8.507059e+37 }
0x583b   :  { %v5088_v14 = vpop.eup %5087 }
0x583c   :  { %v3939_v33 = vmul.f32 %v5088_v14, %v3937_v20  ;;  %vm3944_vm9 = vweird.f32 %v5088_v14 }
0x583d   :  { %vm3945_vm11 = vmor %vm3943_vm10, %vm3944_vm9 }
0x583e   :  { %v3940_v19 = vsub.f32 1.0, %v3939_v33 }
0x5840   :  { %v3941_v51 = vmul.f32 %v5088_v14, %v3940_v19 }
0x5842   :  { %v3942_v54 = vadd.f32 %v5088_v14, %v3941_v51 }
0x5844   :  { %v3946_v47 = vsel %vm3945_vm11, %v5088_v14, %v3942_v54 }
0x5845   :  { %v3951_v29 = vsel %vm3948_vm12, %v3950_v52, %v3946_v47 }
0x5846   :  { %v3957_v30 = vmul.f32 %v3955_v42, %v3951_v29 }
0x58a3   :  { %v3960_v58 = vpop.permute.xlu0 %3959 }
0x58a4   :  { %v3962_v25 = vmul.f32 %v3960_v58, %v3951_v29 }
0x58a6   :  { %3964 = vrot.lane.b32.xlu1 %v3962_v25, %s5342_s30 }
0x5918   :  { %v3965_v59 = vpop.permute.xlu1 %3964 }
0x5919   :  { %v3967_v60 = vadd.f32 %v3965_v59, %v3957_v30 }
0x591b   :  { %5089 = vtanh.f32 %v3967_v60  ;;  %v4017_v40 = vrot.slane %v3967_v60, 6 }
0x5921   :  { %v5090_v7 = vpop.eup %5089 }
0x5922   :  { %3970 = vrot.lane.b32.xlu2 %v5090_v7, %s5329_s21 }
0x597c   :  { %v3971_v61 = vpop.permute.xlu2 %3970 }
0x597d   :  { %v3973_v9 = vmul.f32 %v3971_v61, %v3951_v29 }
0x597f   :  { %v3974_v62 = vpack.c.bf16 %v3973_v9, %v3973_v9  ;;  %v6187_v57 = vsel %vm225_vm3, %v4231_v13, %v3973_v9 }
0x5981   :  { %v3976_v48 = vrot.slane %v3974_v62, 3 }
0x5983   :  { %3977 = vrot.lane.b32.xlu0 %v3976_v48, %s5342_s30 }
0x59f5   :  { %v3978_v63 = vpop.permute.xlu0 %3977 }
0x59f6   :  { %4635 = vmatmul.msk.bf16.vlgmr.msra.gmra.mxu2 %vm1024_vm2, %v3978_v63 }
0x5a79   :  { %v3991_v6 = vpop.f32.mrf.mxu2 }
0x5a7a   :  { %v3995_v34 = vadd.f32 %v3991_v6, %v6195_v1 }
0x5a7c   :  { %5091 = vtanh.f32 %v3995_v34  ;;  %v4636_v10 = vmul.f32 -1.442695, %v3995_v34 }
0x5a7e   :  { %5093 = vpow2.f32 %v4636_v10 }
0x5a81   :  { %v3993_v49 = vpop.f32.mrf.mxu2 }
0x5a82   :  { %v5092_v8 = vpop.eup %5091 }
0x5a83   :  { %4021 = vrot.lane.b32.xlu1 %v5092_v8, %s5329_s21 }
0x5a84   :  { %v5094_v17 = vpop.eup %5093 }
0x5a85   :  { %v3999_v18 = vadd.f32 1.0, %v5094_v17 }
0x5a87   :  { %5095 = vrcp.f32 %v3999_v18  ;;  %v4011_v12 = vand.u32 2147483648, %v3999_v18  ;;  %vm4005_vm14 = vweird.f32 %v3999_v18  ;;  %v4009_v26 = vand.u32 2147483647, %v3999_v18 }
0x5a89   :  { %v4012_v37 = vor.u32 1.1754944e-38, %v4011_v12  ;;  %vm4010_vm1 = vcmp.eq.f32.partialorder %v4009_v26, 8.507059e+37 }
0x5a8d   :  { %v5096_v21 = vpop.eup %5095 }
0x5a8e   :  { %v4001_v24 = vmul.f32 %v5096_v21, %v3999_v18  ;;  %vm4006_vm13 = vweird.f32 %v5096_v21 }
0x5a8f   :  { %vm4007_vm15 = vmor %vm4005_vm14, %vm4006_vm13 }
0x5a90   :  { %v4002_v2 = vsub.f32 1.0, %v4001_v24 }
0x5a92   :  { %v4003_v27 = vmul.f32 %v5096_v21, %v4002_v2 }
0x5a94   :  { %v4004_v43 = vadd.f32 %v5096_v21, %v4003_v27 }
0x5a96   :  { %v4008_v28 = vsel %vm4007_vm15, %v5096_v21, %v4004_v43 }
0x5a97   :  { %v4013_v46 = vsel %vm4010_vm1, %v4012_v37, %v4008_v28 }
0x5a98   :  { %v4019_v31 = vmul.f32 %v4017_v40, %v4013_v46 }
0x5af5   :  { %v4022_v5 = vpop.permute.xlu1 %4021 }
0x5af6   :  { %v4024_v32 = vmul.f32 %v4022_v5, %v4013_v46 }
0x5af8   :  { %4026 = vrot.lane.b32.xlu2 %v4024_v32, %s5342_s30 }
0x5b52   :  { %v4027_v35 = vpop.permute.xlu2 %4026 }
0x5b53   :  { %v4029_v16 = vadd.f32 %v4027_v35, %v4019_v31 }
0x5b55   :  { %5097 = vtanh.f32 %v4029_v16  ;;  %v4081_v58 = vrot.slane %v4029_v16, 6 }
0x5b5b   :  { %v5098_v36 = vpop.eup %5097 }
0x5b5c   :  { %4032 = vrot.lane.b32.xlu0 %v5098_v36, %s5329_s21 }
0x5bce   :  { %v4033_v22 = vpop.permute.xlu0 %4032 }
0x5bcf   :  { %v6201_v15 = vmul.f32 %v4033_v22, %v4013_v46 }
0x5bd1   :  { %v4036_v53 = vpack.c.bf16 %v6201_v15, %v6201_v15 }
0x5bd3   :  { %4038 = vrot.lane.b32.xlu1 %v4036_v53, %s5342_s30 }
0x5c45   :  { %v4039_v3 = vpop.permute.xlu1 %4038 }
0x5c46   :  { %4637 = vmatmul.msk.bf16.vlgmr.msra.gmra.mxu3 %vm1024_vm2, %v4039_v3 }
0x5cc9   :  { %v4052_v13 = vpop.f32.mrf.mxu3 }
0x5cca   :  { %v4057_v38 = vrot.slane %v4052_v13, 6 }
0x5ccc   :  { %v4059_v39 = vadd.f32 %v4057_v38, %v6195_v1 }
0x5cce   :  { %5099 = vtanh.f32 %v4059_v39  ;;  %v4638_v44 = vmul.f32 -1.442695, %v4059_v39 }
0x5cd0   :  { %5101 = vpow2.f32 %v4638_v44 }
0x5cd1   :  { %v4054_v41 = vpop.f32.mrf.mxu3 }
0x5cd4   :  { %v5100_v4 = vpop.eup %5099 }
0x5cd5   :  { %4085 = vrot.lane.b32.xlu2 %v5100_v4, %s5329_s21 }
0x5cd6   :  { %v5102_v45 = vpop.eup %5101 }
0x5cd7   :  { %v4063_v50 = vadd.f32 1.0, %v5102_v45 }
0x5cd9   :  { %5103 = vrcp.f32 %v4063_v50  ;;  %v4075_v19 = vand.u32 2147483648, %v4063_v50  ;;  %vm4069_vm7 = vweird.f32 %v4063_v50  ;;  %v4073_v51 = vand.u32 2147483647, %v4063_v50 }
0x5cdb   :  { %v4076_v55 = vor.u32 1.1754944e-38, %v4075_v19  ;;  %vm4074_vm9 = vcmp.eq.f32.partialorder %v4073_v51, 8.507059e+37 }
0x5cdf   :  { %v5104_v23 = vpop.eup %5103 }
0x5ce0   :  { %v4065_v11 = vmul.f32 %v5104_v23, %v4063_v50  ;;  %vm4070_vm6 = vweird.f32 %v5104_v23 }
0x5ce1   :  { %vm4071_vm8 = vmor %vm4069_vm7, %vm4070_vm6 }
0x5ce2   :  { %v4066_v20 = vsub.f32 1.0, %v4065_v11 }
0x5ce4   :  { %v4067_v14 = vmul.f32 %v5104_v23, %v4066_v20 }
0x5ce6   :  { %v4068_v33 = vadd.f32 %v5104_v23, %v4067_v14 }
0x5ce8   :  { %v4072_v54 = vsel %vm4071_vm8, %v5104_v23, %v4068_v33 }
0x5ce9   :  { %v4077_v47 = vsel %vm4074_vm9, %v4076_v55, %v4072_v54 }
0x5cea   :  { %v4083_v29 = vmul.f32 %v4081_v58, %v4077_v47 }
0x5d2f   :  { %v4086_v56 = vpop.permute.xlu2 %4085 }
0x5d30   :  { %v4088_v52 = vmul.f32 %v4086_v56, %v4077_v47 }
0x5d32   :  { %4090 = vrot.lane.b32.xlu0 %v4088_v52, %s5342_s30 }
0x5da4   :  { %v4091_v25 = vpop.permute.xlu0 %4090 }
0x5da5   :  { %v4093_v42 = vadd.f32 %v4091_v25, %v4083_v29 }
0x5da7   :  { %5105 = vtanh.f32 %v4093_v42  ;;  %v4146_v5 = vrot.slane %v4093_v42, 6 }
0x5dad   :  { %v5106_v30 = vpop.eup %5105 }
0x5dae   :  { %4096 = vrot.lane.b32.xlu1 %v5106_v30, %s5329_s21  ;;  %v4716_v30 = vld [vmem:[%s6263_s16 + $0x8] sm:$0xff] }
0x5daf   :  { %4269 = vmatpush.bf16.msrb.mxu2 %v4716_v30 }
0x5e20   :  { %v4097_v59 = vpop.permute.xlu1 %4096 }
0x5e21   :  { %v4099_v60 = vmul.f32 %v4097_v59, %v4077_v47  ;;  %v4715_v59 = vld [vmem:[%s6263_s16] sm:$0xff] }
0x5e22   :  { %4270 = vmatpush.bf16.msrb.mxu2 %v4715_v59 }
0x5e23   :  { %v4100_v7 = vpack.c.bf16 %v4099_v60, %v4099_v60  ;;  %v4233_v36 = vsel %vm203_vm0, %v6201_v15, %v4099_v60 }
0x5e25   :  { %v4102_v61 = vrot.slane %v4100_v7, 1 }
0x5e27   :  { %4103 = vrot.lane.b32.xlu2 %v4102_v61, %s5342_s30 }
0x5e81   :  { %v4104_v9 = vpop.permute.xlu2 %4103 }
0x5e82   :  { %4639 = vmatmul.msk.bf16.vlgmr.msra.gmra.mxu0 %vm1024_vm2, %v4104_v9 }
0x5eff   :  { %v4117_v62 = vpop.f32.mrf.mxu0 }
0x5f00   :  { %v4122_v48 = vrot.slane %v4117_v62, 4 }
0x5f02   :  { %v4124_v63 = vadd.f32 %v4122_v48, %v6195_v1  ;;  %v4738_v48 = vld [vmem:[%s6264_s17] ss:$0 sm:$0xff] }
0x5f04   :  { %5107 = vtanh.f32 %v4124_v63  ;;  %v4640_v34 = vmul.f32 -1.442695, %v4124_v63 }
0x5f06   :  { %5109 = vpow2.f32 %v4640_v34 }
0x5f07   :  { %v4119_v0 = vpop.f32.mrf.mxu0 }
0x5f0a   :  { %v5108_v6 = vpop.eup %5107 }
0x5f0b   :  { %4150 = vrot.lane.b32.xlu0 %v5108_v6, %s5329_s21 }
0x5f0c   :  { %v5110_v49 = vpop.eup %5109 }
0x5f0d   :  { %v4128_v8 = vadd.f32 1.0, %v5110_v49 }
0x5f0f   :  { %5111 = vrcp.f32 %v4128_v8  ;;  %v4140_v2 = vand.u32 2147483648, %v4128_v8  ;;  %vm4134_vm11 = vweird.f32 %v4128_v8  ;;  %v4138_v27 = vand.u32 2147483647, %v4128_v8 }
0x5f11   :  { %v4141_v12 = vor.u32 1.1754944e-38, %v4140_v2  ;;  %vm4139_vm13 = vcmp.eq.f32.partialorder %v4138_v27, 8.507059e+37 }
0x5f15   :  { %v5112_v10 = vpop.eup %5111 }
0x5f16   :  { %v4130_v17 = vmul.f32 %v5112_v10, %v4128_v8  ;;  %vm4135_vm10 = vweird.f32 %v5112_v10 }
0x5f17   :  { %vm4136_vm12 = vmor %vm4134_vm11, %vm4135_vm10 }
0x5f18   :  { %v4131_v18 = vsub.f32 1.0, %v4130_v17 }
0x5f1a   :  { %v4132_v21 = vmul.f32 %v5112_v10, %v4131_v18 }
0x5f1c   :  { %v4133_v24 = vadd.f32 %v5112_v10, %v4132_v21 }
0x5f1e   :  { %v4137_v43 = vsel %vm4136_vm12, %v5112_v10, %v4133_v24 }
0x5f1f   :  { %v4142_v28 = vsel %vm4139_vm13, %v4141_v12, %v4137_v43 }
0x5f20   :  { %v4148_v46 = vmul.f32 %v4146_v5, %v4142_v28 }
0x5f7d   :  { %v4151_v26 = vpop.permute.xlu0 %4150 }
0x5f7e   :  { %v4153_v37 = vmul.f32 %v4151_v26, %v4142_v28 }
0x5f80   :  { %4155 = vrot.lane.b32.xlu1 %v4153_v37, %s5342_s30 }
0x5ff2   :  { %v4156_v32 = vpop.permute.xlu1 %4155 }
0x5ff3   :  { %v4158_v40 = vadd.f32 %v4156_v32, %v4148_v46 }
0x5ff5   :  { %5113 = vtanh.f32 %v4158_v40  ;;  %v4211_v52 = vrot.slane %v4158_v40, 6 }
0x5ffb   :  { %v5114_v31 = vpop.eup %5113 }
0x5ffc   :  { %4161 = vrot.lane.b32.xlu2 %v5114_v31, %s5329_s21 }
0x6056   :  { %v4162_v35 = vpop.permute.xlu2 %4161 }
0x6057   :  { %v4164_v16 = vmul.f32 %v4162_v35, %v4142_v28 }
0x6059   :  { %v4165_v22 = vpack.c.bf16 %v4164_v16, %v4164_v16  ;;  %v4234_v53 = vsel %vm245_vm4, %v4233_v36, %v4164_v16 }
0x605b   :  { %v4167_v3 = vrot.slane %v4165_v22, 2 }
0x605d   :  { %4168 = vrot.lane.b32.xlu0 %v4167_v3, %s5342_s30 }
0x60cf   :  { %v4169_v13 = vpop.permute.xlu0 %4168 }
0x60d0   :  { %4641 = vmatmul.msk.bf16.vlgmr.msra.gmra.mxu1 %vm1024_vm2, %v4169_v13 }
0x614d   :  { %v4182_v38 = vpop.f32.mrf.mxu1 }
0x614e   :  { %v4187_v39 = vrot.slane %v4182_v38, 2 }
0x6150   :  { %v4189_v41 = vadd.f32 %v4187_v39, %v6195_v1 }
0x6152   :  { %5115 = vtanh.f32 %v4189_v41  ;;  %v4642_v45 = vmul.f32 -1.442695, %v4189_v41 }
0x6154   :  { %5117 = vpow2.f32 %v4642_v45 }
0x6155   :  { %v4184_v4 = vpop.f32.mrf.mxu1 }
0x6158   :  { %v5116_v44 = vpop.eup %5115 }
0x6159   :  { %4215 = vrot.lane.b32.xlu1 %v5116_v44, %s5329_s21 }
0x615a   :  { %v5118_v15 = vpop.eup %5117 }
0x615b   :  { %v4193_v50 = vadd.f32 1.0, %v5118_v15 }
0x615d   :  { %5119 = vrcp.f32 %v4193_v50  ;;  %v4205_v19 = vand.u32 2147483648, %v4193_v50  ;;  %vm4199_vm4 = vweird.f32 %v4193_v50  ;;  %v4203_v51 = vand.u32 2147483647, %v4193_v50 }
0x615f   :  { %v4206_v54 = vor.u32 1.1754944e-38, %v4205_v19  ;;  %vm4204_vm15 = vcmp.eq.f32.partialorder %v4203_v51, 8.507059e+37 }
0x6163   :  { %v5120_v23 = vpop.eup %5119 }
0x6164   :  { %v4195_v11 = vmul.f32 %v5120_v23, %v4193_v50  ;;  %vm4200_vm0 = vweird.f32 %v5120_v23 }
0x6165   :  { %vm4201_vm14 = vmor %vm4199_vm4, %vm4200_vm0 }
0x6166   :  { %v4196_v20 = vsub.f32 1.0, %v4195_v11 }
0x6168   :  { %v4197_v14 = vmul.f32 %v5120_v23, %v4196_v20 }
0x616a   :  { %v4198_v33 = vadd.f32 %v5120_v23, %v4197_v14 }
0x616c   :  { %v4202_v1 = vsel %vm4201_vm14, %v5120_v23, %v4198_v33 }
0x616d   :  { %v4207_v56 = vsel %vm4204_vm15, %v4206_v54, %v4202_v1 }
0x616e   :  { %v4213_v58 = vmul.f32 %v4211_v52, %v4207_v56 }
0x61cb   :  { %v4216_v55 = vpop.permute.xlu1 %4215 }
0x61cc   :  { %v4218_v47 = vmul.f32 %v4216_v55, %v4207_v56 }
0x61ce   :  { %4220 = vrot.lane.b32.xlu2 %v4218_v47, %s5342_s30 }
0x6228   :  { %v4221_v29 = vpop.permute.xlu2 %4220 }
0x6229   :  { %v4223_v25 = vadd.f32 %v4221_v29, %v4213_v58 }
0x622b   :  { %5121 = vtanh.f32 %v4223_v25 }
0x6231   :  { %v5122_v42 = vpop.eup %5121 }
0x6232   :  { %4226 = vrot.lane.b32.xlu0 %v5122_v42, %s5329_s21 }
0x62a4   :  { %v4227_v60 = vpop.permute.xlu0 %4226 }
0x62a5   :  { %v4229_v7 = vmul.f32 %v4227_v60, %v4207_v56 }
0x62a7   :  { %v4235_v61 = vsel %vm225_vm3, %v4234_v53, %v4229_v7 }
0x62a8   :  { %v4236_v9 = vpack.c.bf16 %v4235_v61, %v6187_v57 }
0x62aa   :  { %4246 = vrot.lane.b32.xlu1 %v4236_v9, %s5342_s30 }
0x631c   :  { %v4247_v62 = vpop.permute.xlu1 %4246 }
0x631d   :  { %4651 = vmatmul.msk.bf16.vlgmr.msrb.gmra.mxu2 %vm1024_vm2, %v4247_v62 }
0x63a0   :  { %v4272_v63 = vpop.f32.mrf.mxu2 }
0x63a1   :  { %v4273_v0 = vadd.f32 %v4738_v48, %v4272_v63 }
0x63a3   :  { %4277 = vst.msk [vmem:[%s6265_s18] sm:$0xff] %vm255_vm5, %v4273_v0 }
0x63a8   :  { %v4274_v6 = vpop.f32.mrf.mxu2 }
0x63a9   :  { %v4275_v34 = vadd.f32 %v4738_v48, %v4274_v6 }
0x63ab   :  { %4278 = vst.msk [vmem:[%s6265_s18 + $0x8] sm:$0xff] %vm255_vm5, %v4275_v34 }
0x63ac   :  { %4283 = vsyncpa [#allocation3], 1 }
0x63ad   :  { %4284 = vsyncpa [#allocation5], 1 }
0x63ae   :  { %4285 = vsyncpa [#allocation8], 1 }
0x63af   :  { %4286 = vsyncpa [#allocation11], 1 }
0x63b0   :  { %4287 = vsyncpa [#allocation14], 1 }

</bundles_post_ra>
